<compile_context>
chip_gen: v7x
topology: tpu7x:2x2x1
jax: 0.10.0
libtpu: 0.0.40
codegen_flags: <defaults>
</compile_context>

<pallas_src>
import functools
import math

import numpy as np

import jax
import jax.numpy as jnp
from jax import lax
from jax.experimental import pallas as pl
from jax.experimental.pallas import tpu as pltpu


_WINDOW_SIZE = 11
_SIGMA = 1.5
_C1 = 0.01 ** 2
_C2 = 0.03 ** 2


def _gaussian_1d(window_size=_WINDOW_SIZE, sigma=_SIGMA):
    """Same taps as the PyTorch `gaussian()` helper, as Python floats."""
    vals = [math.exp(-((x - window_size // 2) ** 2) / (2.0 * sigma ** 2))
            for x in range(window_size)]
    s = sum(vals)
    return tuple(v / s for v in vals)


def _band_matrix(n, gauss, pad):
    """(n, n) banded matrix M with M[i, o] = gauss[i - o + pad].

    `row_vector @ M` is the 1-D "same"-zero-padded Gaussian correlation, i.e.
    F.conv2d's implicit zero padding is folded into the matrix (edge columns
    simply have fewer taps)."""
    ws = len(gauss)
    m = np.zeros((n, n), dtype=np.float32)
    for i in range(n):
        for o in range(max(0, i - pad), min(n, i + pad + 1)):
            k = i - o + pad
            if 0 <= k < ws:
                m[i, o] = gauss[k]
    return m


# ---------------------------------------------------------------------------
# Pallas kernel: Bt unpadded (H, W) slices of img1/img2 + band matrices ->
#   per-slice SSIM-map sums, written as one lane-dense (1, Bt, 128) block.
# ---------------------------------------------------------------------------
def _make_ssim_kernel(bt, H, W):
    n_q = 5  # x1, x2, x1*x1, x2*x2, x1*x2

    def kernel(x1_ref, x2_ref, bh_ref, bv_ref, o_ref):
        x1 = x1_ref[...]          # (bt, H, W) f32
        x2 = x2_ref[...]
        bh = bh_ref[...]          # (W, W) banded horizontal blur (z @ bh)
        bv = bv_ref[...]          # (H, H) banded vertical blur   (bv @ z)

        hp = functools.partial(jnp.dot, preferred_element_type=jnp.float32,
                               precision=lax.Precision.HIGHEST)

        # ---- horizontal blur of all 5 quantities on the MXU ---------------
        quants = [x1, x2, x1 * x1, x2 * x2, x1 * x2]
        if H % 8 == 0:
            # Leading-dim merge is a layout no-op -> one fat matmul with
            # M = 5*bt*H rows (keeps the 256-wide MXU busy on v6e/v7x).
            q = jnp.concatenate(quants, axis=0)                  # (5bt, H, W)
            qh = hp(q.reshape(n_q * bt * H, W), bh)              # (5btH, W)
            qh = qh.reshape(n_q * bt, H, W)
            hblur = [qh[i] for i in range(n_q * bt)]             # quantity-major
        else:
            hblur = [hp(quants[qi][b], bh)
                     for qi in range(n_q) for b in range(bt)]

        def vblur(t):             # vertical blur of one (H, W) slice, MXU
            return hp(bv, t)

        # ---- per-slice vertical blur + streaming SSIM epilogue -------------
        # One slice at a time keeps the live set small (review: shrink the
        # epilogue's peak VMEM/vreg pressure).
        sums = []
        for b in range(bt):       # bt is a small compile-time constant
            mu1 = vblur(hblur[0 * bt + b])
            mu2 = vblur(hblur[1 * bt + b])
            e11 = vblur(hblur[2 * bt + b])
            e22 = vblur(hblur[3 * bt + b])
            e12 = vblur(hblur[4 * bt + b])

            mu1_sq = mu1 * mu1
            mu2_sq = mu2 * mu2
            mu1_mu2 = mu1 * mu2
            sigma1_sq = e11 - mu1_sq
            sigma2_sq = e22 - mu2_sq
            sigma12 = e12 - mu1_mu2

            num = (2.0 * mu1_mu2 + _C1) * (2.0 * sigma12 + _C2)
            den = (mu1_sq + mu2_sq + _C1) * (sigma1_sq + sigma2_sq + _C2)
            # approx=True would push the divide to the EUP; kept exact so the
            # 5e-4 reference tolerance is guaranteed on every generation.
            ssim = num * pl.reciprocal(den, approx=False)

            part = jnp.sum(ssim, axis=0, keepdims=True)          # (1, W)
            sums.append(jnp.sum(part, axis=1, keepdims=True))    # (1, 1)

        s = jnp.concatenate(sums, axis=0)                        # (bt, 1)
        # Lane-dense store: per-slice sums broadcast across 128 lanes.
        o_ref[...] = jnp.broadcast_to(s[None, :, :], (1, bt, 128))

    return kernel


# ---------------------------------------------------------------------------
# Wrapper: reproduces SSIM.forward(img1, img2)
# ---------------------------------------------------------------------------
def ssim_pallas(img1, img2, window_size=_WINDOW_SIZE, size_average=True):
    assert img1.shape == img2.shape, (img1.shape, img2.shape)
    N, C, H, W = img1.shape
    B = N * C
    pad = window_size // 2
    gauss = _gaussian_1d(window_size)

    x1 = img1.reshape(B, H, W).astype(jnp.float32)
    x2 = img2.reshape(B, H, W).astype(jnp.float32)

    # Slices per grid step: amortize per-step pipeline overhead, cap by a
    # conservative per-slice VMEM estimate, and keep >= 2 grid steps when
    # possible so the parallel axis feeds both v7x TensorCores.
    per_slice_bytes = 26 * H * W * 4
    bt = max(1, min(8, B, (24 * 2 ** 20) // per_slice_bytes))
    if B >= 2:
        bt = max(1, min(bt, pl.cdiv(B, 2)))
    num_steps = pl.cdiv(B, bt)
    b_pad = num_steps * bt
    if b_pad != B:
        x1 = jnp.pad(x1, ((0, b_pad - B), (0, 0), (0, 0)))
        x2 = jnp.pad(x2, ((0, b_pad - B), (0, 0), (0, 0)))

    # "Same" zero padding folded into compile-time banded blur matrices.
    bh = jnp.asarray(_band_matrix(W, gauss, pad))        # horizontal: z @ bh
    bv = jnp.asarray(_band_matrix(H, gauss, pad).T)      # vertical:  bv @ z
    # TODO(synk): for very large H, row-tile with a (window_size-1) halo on an
    # 'arbitrary' grid axis so the live set fits v7x's 64 MiB VMEM.
    # TODO(synk): for very large W, pad W to a multiple of 128 (256 on
    # v6e/v7x) so interior vregs / MXU tiles are unmasked.
    # TODO(synk): for B >> 128, an (H, W, B) lane-major layout would give full
    # 128-lane occupancy independent of W.

    kernel = _make_ssim_kernel(bt, H, W)

    # VMEM footprint including in-kernel temporaries (review fix): inputs
    # (double-buffered) + stacked quantities + horizontal blur + one slice's
    # vertical blurs/epilogue temps + band matrices + output rows.
    est = (4 * bt * H * W            # 2 input blocks, double-buffered
           + 10 * bt * H * W         # stacked quantities + horizontal blur
           + 12 * H * W              # one slice's epilogue temporaries
           + H * H + W * W + 2 * bt * 128) * 4
    vmem_limit = int(min(48 * 2 ** 20, max(16 * 2 ** 20, 4 * est)))

    flops = num_steps * (2 * (5 * bt * H) * W * W        # horizontal matmul
                         + 5 * bt * 2 * H * H * W        # vertical matmuls
                         + 25 * bt * H * W)              # elementwise epilogue
    cost = pl.CostEstimate(
        flops=int(flops),
        transcendentals=0,
        bytes_accessed=int((2 * b_pad * H * W
                            + num_steps * (H * H + W * W)
                            + num_steps * bt * 128) * 4))

    sums = pl.pallas_call(
        kernel,
        out_shape=jax.ShapeDtypeStruct((num_steps, bt, 128), jnp.float32),
        grid=(num_steps,),
        in_specs=[
            pl.BlockSpec((bt, H, W), lambda i: (i, 0, 0)),
            pl.BlockSpec((bt, H, W), lambda i: (i, 0, 0)),
            pl.BlockSpec((W, W), lambda i: (0, 0)),
            pl.BlockSpec((H, H), lambda i: (0, 0)),
        ],
        out_specs=pl.BlockSpec((1, bt, 128), lambda i: (i, 0, 0)),
        compiler_params=pltpu.CompilerParams(
            dimension_semantics=("parallel",),
            vmem_limit_bytes=vmem_limit,
        ),
        cost_estimate=cost,
    )(x1, x2, bh, bv)

    per_slice = sums[:, :, 0].reshape(b_pad)[:B]         # per-(n,c) map sums
    if size_average:
        return jnp.sum(per_slice) / (B * H * W)          # scalar
    per_n = jnp.sum(per_slice.reshape(N, C), axis=1) / (C * H * W)
    return per_n                                         # (N,)


# ---------------------------------------------------------------------------
# Pure-JAX reference (mirrors the PyTorch _ssim with a depthwise 2D conv)
# ---------------------------------------------------------------------------
def _ssim_reference(img1, img2, window_size=_WINDOW_SIZE, size_average=True):
    img1 = img1.astype(jnp.float32)
    img2 = img2.astype(jnp.float32)
    N, C, H, W = img1.shape
    g = jnp.asarray(_gaussian_1d(window_size), jnp.float32)
    w2d = jnp.outer(g, g)
    window = jnp.broadcast_to(w2d[None, None], (C, 1, window_size, window_size))
    pad = window_size // 2

    def conv(x):
        return lax.conv_general_dilated(
            x, window, window_strides=(1, 1),
            padding=((pad, pad), (pad, pad)),
            dimension_numbers=("NCHW", "OIHW", "NCHW"),
            feature_group_count=C,
            precision=lax.Precision.HIGHEST)

    mu1, mu2 = conv(img1), conv(img2)
    mu1_sq, mu2_sq, mu1_mu2 = mu1 * mu1, mu2 * mu2, mu1 * mu2
    sigma1_sq = conv(img1 * img1) - mu1_sq
    sigma2_sq = conv(img2 * img2) - mu2_sq
    sigma12 = conv(img1 * img2) - mu1_mu2
    ssim_map = ((2 * mu1_mu2 + _C1) * (2 * sigma12 + _C2)) / (
        (mu1_sq + mu2_sq + _C1) * (sigma1_sq + sigma2_sq + _C2))
    if size_average:
        return ssim_map.mean()
    return ssim_map.mean(axis=(1, 2, 3))


if __name__ == "__main__":
    key = jax.random.PRNGKey(0)
    k1, k2 = jax.random.split(key)

    # Small image-like inputs consistent with the module: N=2, C=4, 16x16.
    img1 = jax.random.uniform(k1, (2, 4, 16, 16), jnp.float32)
    img2 = jnp.clip(
        img1 + 0.1 * jax.random.normal(k2, (2, 4, 16, 16), jnp.float32),
        0.0, 1.0)

    ssim_avg = jax.jit(functools.partial(ssim_pallas, size_average=True))
    out = jax.block_until_ready(ssim_avg(img1, img2))
    assert out.shape == ()
    assert bool(jnp.isfinite(out)), out

    ref = _ssim_reference(img1, img2, size_average=True)
    assert abs(float(out) - float(ref)) < 5e-4, (float(out), float(ref))

    # size_average=False path (per-batch means), as in the original module.
    ssim_nb = jax.jit(functools.partial(ssim_pallas, size_average=False))
    out_nb = jax.block_until_ready(ssim_nb(img1, img2))
    ref_nb = _ssim_reference(img1, img2, size_average=False)
    assert out_nb.shape == (2,)
    assert bool(jnp.all(jnp.isfinite(out_nb)))
    assert bool(jnp.all(jnp.abs(out_nb - ref_nb) < 5e-4)), (out_nb, ref_nb)

    print("KERNEL_OK")
</pallas_src>

<mosaic_0001>
module attributes {stable_mosaic.version = 11 : i64} {
  func.func @kernel(%arg0: i32, %arg1: memref<4x16x16xf32, #tpu.memory_space<vmem>>, %arg2: memref<4x16x16xf32, #tpu.memory_space<vmem>>, %arg3: memref<16x16xf32, #tpu.memory_space<vmem>>, %arg4: memref<16x16xf32, #tpu.memory_space<vmem>>, %arg5: memref<1x4x128xf32, #tpu.memory_space<vmem>>) attributes {dimension_semantics = [#tpu.dimension_semantics<parallel>], iteration_bounds = array<i64: 2>, scalar_prefetch = 0 : i64, scratch_operands = 0 : i64, tpu.core_type = #tpu.core_type<tc>, window_params = [{transform_indices = @transform_0, window_bounds = array<i64: 4, 16, 16>}, {transform_indices = @transform_1, window_bounds = array<i64: 4, 16, 16>}, {pipeline_mode = #tpu.pipeline_mode<synchronous>, transform_indices = @transform_2, window_bounds = array<i64: 16, 16>}, {pipeline_mode = #tpu.pipeline_mode<synchronous>, transform_indices = @transform_3, window_bounds = array<i64: 16, 16>}, {transform_indices = @transform_4, window_bounds = array<i64: 1, 4, 128>}]} {
    %c0 = arith.constant 0 : index
    %c0_0 = arith.constant 0 : index
    %c0_1 = arith.constant 0 : index
    %0 = vector.load %arg1[%c0, %c0_0, %c0_1] : memref<4x16x16xf32, #tpu.memory_space<vmem>>, vector<4x16x16xf32>
    %c0_2 = arith.constant 0 : index
    %c0_3 = arith.constant 0 : index
    %c0_4 = arith.constant 0 : index
    %1 = vector.load %arg2[%c0_2, %c0_3, %c0_4] : memref<4x16x16xf32, #tpu.memory_space<vmem>>, vector<4x16x16xf32>
    %c0_5 = arith.constant 0 : index
    %c0_6 = arith.constant 0 : index
    %2 = vector.load %arg3[%c0_5, %c0_6] : memref<16x16xf32, #tpu.memory_space<vmem>>, vector<16x16xf32>
    %c0_7 = arith.constant 0 : index
    %c0_8 = arith.constant 0 : index
    %3 = vector.load %arg4[%c0_7, %c0_8] : memref<16x16xf32, #tpu.memory_space<vmem>>, vector<16x16xf32>
    %4 = arith.mulf %0, %0 : vector<4x16x16xf32>
    %5 = arith.mulf %1, %1 : vector<4x16x16xf32>
    %6 = arith.mulf %0, %1 : vector<4x16x16xf32>
    %7 = tpu.concatenate %0, %1, %4, %5, %6 in 0 : vector<4x16x16xf32>, vector<4x16x16xf32>, vector<4x16x16xf32>, vector<4x16x16xf32>, vector<4x16x16xf32> -> vector<20x16x16xf32>
    %8 = vector.shape_cast %7 : vector<20x16x16xf32> to vector<320x16xf32>
    %cst = arith.constant dense<0.000000e+00> : vector<320x16xf32>
    %9 = tpu.matmul %8, %2, %cst {dimension_numbers = #tpu.dot_dimension_numbers<[1], [0], [0], [1], [0, 0, 1, 1], [], []>, precision = #tpu.contract_precision<fp32>} : vector<320x16xf32>, vector<16x16xf32>, vector<320x16xf32> -> vector<320x16xf32>
    %10 = vector.shape_cast %9 : vector<320x16xf32> to vector<20x16x16xf32>
    %11 = vector.extract_strided_slice %10 {offsets = [0, 0, 0], sizes = [1, 16, 16], strides = [1, 1, 1]} : vector<20x16x16xf32> to vector<1x16x16xf32>
    %12 = vector.shape_cast %11 : vector<1x16x16xf32> to vector<16x16xf32>
    %13 = vector.extract_strided_slice %10 {offsets = [1, 0, 0], sizes = [1, 16, 16], strides = [1, 1, 1]} : vector<20x16x16xf32> to vector<1x16x16xf32>
    %14 = vector.shape_cast %13 : vector<1x16x16xf32> to vector<16x16xf32>
    %15 = vector.extract_strided_slice %10 {offsets = [2, 0, 0], sizes = [1, 16, 16], strides = [1, 1, 1]} : vector<20x16x16xf32> to vector<1x16x16xf32>
    %16 = vector.shape_cast %15 : vector<1x16x16xf32> to vector<16x16xf32>
    %17 = vector.extract_strided_slice %10 {offsets = [3, 0, 0], sizes = [1, 16, 16], strides = [1, 1, 1]} : vector<20x16x16xf32> to vector<1x16x16xf32>
    %18 = vector.shape_cast %17 : vector<1x16x16xf32> to vector<16x16xf32>
    %19 = vector.extract_strided_slice %10 {offsets = [4, 0, 0], sizes = [1, 16, 16], strides = [1, 1, 1]} : vector<20x16x16xf32> to vector<1x16x16xf32>
    %20 = vector.shape_cast %19 : vector<1x16x16xf32> to vector<16x16xf32>
    %21 = vector.extract_strided_slice %10 {offsets = [5, 0, 0], sizes = [1, 16, 16], strides = [1, 1, 1]} : vector<20x16x16xf32> to vector<1x16x16xf32>
    %22 = vector.shape_cast %21 : vector<1x16x16xf32> to vector<16x16xf32>
    %23 = vector.extract_strided_slice %10 {offsets = [6, 0, 0], sizes = [1, 16, 16], strides = [1, 1, 1]} : vector<20x16x16xf32> to vector<1x16x16xf32>
    %24 = vector.shape_cast %23 : vector<1x16x16xf32> to vector<16x16xf32>
    %25 = vector.extract_strided_slice %10 {offsets = [7, 0, 0], sizes = [1, 16, 16], strides = [1, 1, 1]} : vector<20x16x16xf32> to vector<1x16x16xf32>
    %26 = vector.shape_cast %25 : vector<1x16x16xf32> to vector<16x16xf32>
    %27 = vector.extract_strided_slice %10 {offsets = [8, 0, 0], sizes = [1, 16, 16], strides = [1, 1, 1]} : vector<20x16x16xf32> to vector<1x16x16xf32>
    %28 = vector.shape_cast %27 : vector<1x16x16xf32> to vector<16x16xf32>
    %29 = vector.extract_strided_slice %10 {offsets = [9, 0, 0], sizes = [1, 16, 16], strides = [1, 1, 1]} : vector<20x16x16xf32> to vector<1x16x16xf32>
    %30 = vector.shape_cast %29 : vector<1x16x16xf32> to vector<16x16xf32>
    %31 = vector.extract_strided_slice %10 {offsets = [10, 0, 0], sizes = [1, 16, 16], strides = [1, 1, 1]} : vector<20x16x16xf32> to vector<1x16x16xf32>
    %32 = vector.shape_cast %31 : vector<1x16x16xf32> to vector<16x16xf32>
    %33 = vector.extract_strided_slice %10 {offsets = [11, 0, 0], sizes = [1, 16, 16], strides = [1, 1, 1]} : vector<20x16x16xf32> to vector<1x16x16xf32>
    %34 = vector.shape_cast %33 : vector<1x16x16xf32> to vector<16x16xf32>
    %35 = vector.extract_strided_slice %10 {offsets = [12, 0, 0], sizes = [1, 16, 16], strides = [1, 1, 1]} : vector<20x16x16xf32> to vector<1x16x16xf32>
    %36 = vector.shape_cast %35 : vector<1x16x16xf32> to vector<16x16xf32>
    %37 = vector.extract_strided_slice %10 {offsets = [13, 0, 0], sizes = [1, 16, 16], strides = [1, 1, 1]} : vector<20x16x16xf32> to vector<1x16x16xf32>
    %38 = vector.shape_cast %37 : vector<1x16x16xf32> to vector<16x16xf32>
    %39 = vector.extract_strided_slice %10 {offsets = [14, 0, 0], sizes = [1, 16, 16], strides = [1, 1, 1]} : vector<20x16x16xf32> to vector<1x16x16xf32>
    %40 = vector.shape_cast %39 : vector<1x16x16xf32> to vector<16x16xf32>
    %41 = vector.extract_strided_slice %10 {offsets = [15, 0, 0], sizes = [1, 16, 16], strides = [1, 1, 1]} : vector<20x16x16xf32> to vector<1x16x16xf32>
    %42 = vector.shape_cast %41 : vector<1x16x16xf32> to vector<16x16xf32>
    %43 = vector.extract_strided_slice %10 {offsets = [16, 0, 0], sizes = [1, 16, 16], strides = [1, 1, 1]} : vector<20x16x16xf32> to vector<1x16x16xf32>
    %44 = vector.shape_cast %43 : vector<1x16x16xf32> to vector<16x16xf32>
    %45 = vector.extract_strided_slice %10 {offsets = [17, 0, 0], sizes = [1, 16, 16], strides = [1, 1, 1]} : vector<20x16x16xf32> to vector<1x16x16xf32>
    %46 = vector.shape_cast %45 : vector<1x16x16xf32> to vector<16x16xf32>
    %47 = vector.extract_strided_slice %10 {offsets = [18, 0, 0], sizes = [1, 16, 16], strides = [1, 1, 1]} : vector<20x16x16xf32> to vector<1x16x16xf32>
    %48 = vector.shape_cast %47 : vector<1x16x16xf32> to vector<16x16xf32>
    %49 = vector.extract_strided_slice %10 {offsets = [19, 0, 0], sizes = [1, 16, 16], strides = [1, 1, 1]} : vector<20x16x16xf32> to vector<1x16x16xf32>
    %50 = vector.shape_cast %49 : vector<1x16x16xf32> to vector<16x16xf32>
    %cst_9 = arith.constant dense<0.000000e+00> : vector<16x16xf32>
    %51 = tpu.matmul %3, %12, %cst_9 {dimension_numbers = #tpu.dot_dimension_numbers<[1], [0], [0], [1], [0, 0, 1, 1], [], []>, precision = #tpu.contract_precision<fp32>} : vector<16x16xf32>, vector<16x16xf32>, vector<16x16xf32> -> vector<16x16xf32>
    %cst_10 = arith.constant dense<0.000000e+00> : vector<16x16xf32>
    %52 = tpu.matmul %3, %20, %cst_10 {dimension_numbers = #tpu.dot_dimension_numbers<[1], [0], [0], [1], [0, 0, 1, 1], [], []>, precision = #tpu.contract_precision<fp32>} : vector<16x16xf32>, vector<16x16xf32>, vector<16x16xf32> -> vector<16x16xf32>
    %cst_11 = arith.constant dense<0.000000e+00> : vector<16x16xf32>
    %53 = tpu.matmul %3, %28, %cst_11 {dimension_numbers = #tpu.dot_dimension_numbers<[1], [0], [0], [1], [0, 0, 1, 1], [], []>, precision = #tpu.contract_precision<fp32>} : vector<16x16xf32>, vector<16x16xf32>, vector<16x16xf32> -> vector<16x16xf32>
    %cst_12 = arith.constant dense<0.000000e+00> : vector<16x16xf32>
    %54 = tpu.matmul %3, %36, %cst_12 {dimension_numbers = #tpu.dot_dimension_numbers<[1], [0], [0], [1], [0, 0, 1, 1], [], []>, precision = #tpu.contract_precision<fp32>} : vector<16x16xf32>, vector<16x16xf32>, vector<16x16xf32> -> vector<16x16xf32>
    %cst_13 = arith.constant dense<0.000000e+00> : vector<16x16xf32>
    %55 = tpu.matmul %3, %44, %cst_13 {dimension_numbers = #tpu.dot_dimension_numbers<[1], [0], [0], [1], [0, 0, 1, 1], [], []>, precision = #tpu.contract_precision<fp32>} : vector<16x16xf32>, vector<16x16xf32>, vector<16x16xf32> -> vector<16x16xf32>
    %56 = arith.mulf %51, %51 : vector<16x16xf32>
    %57 = arith.mulf %52, %52 : vector<16x16xf32>
    %58 = arith.mulf %51, %52 : vector<16x16xf32>
    %59 = arith.subf %53, %56 : vector<16x16xf32>
    %60 = arith.subf %54, %57 : vector<16x16xf32>
    %61 = arith.subf %55, %58 : vector<16x16xf32>
    %cst_14 = arith.constant 2.000000e+00 : f32
    %62 = vector.broadcast %cst_14 : f32 to vector<16x16xf32>
    %63 = arith.mulf %62, %58 : vector<16x16xf32>
    %cst_15 = arith.constant 9.99999974E-5 : f32
    %64 = vector.broadcast %cst_15 : f32 to vector<16x16xf32>
    %65 = arith.addf %63, %64 : vector<16x16xf32>
    %cst_16 = arith.constant 2.000000e+00 : f32
    %66 = vector.broadcast %cst_16 : f32 to vector<16x16xf32>
    %67 = arith.mulf %66, %61 : vector<16x16xf32>
    %cst_17 = arith.constant 8.99999984E-4 : f32
    %68 = vector.broadcast %cst_17 : f32 to vector<16x16xf32>
    %69 = arith.addf %67, %68 : vector<16x16xf32>
    %70 = arith.mulf %65, %69 : vector<16x16xf32>
    %71 = arith.addf %56, %57 : vector<16x16xf32>
    %cst_18 = arith.constant 9.99999974E-5 : f32
    %72 = vector.broadcast %cst_18 : f32 to vector<16x16xf32>
    %73 = arith.addf %71, %72 : vector<16x16xf32>
    %74 = arith.addf %59, %60 : vector<16x16xf32>
    %cst_19 = arith.constant 8.99999984E-4 : f32
    %75 = vector.broadcast %cst_19 : f32 to vector<16x16xf32>
    %76 = arith.addf %74, %75 : vector<16x16xf32>
    %77 = arith.mulf %73, %76 : vector<16x16xf32>
    %78 = tpu.reciprocal %77 : vector<16x16xf32> -> vector<16x16xf32>
    %79 = arith.mulf %70, %78 : vector<16x16xf32>
    %cst_20 = arith.constant dense<0.000000e+00> : vector<16xf32>
    %80 = vector.multi_reduction <add>, %79, %cst_20 [0] : vector<16x16xf32> to vector<16xf32>
    %81 = vector.shape_cast %80 : vector<16xf32> to vector<1x16xf32>
    %cst_21 = arith.constant dense<0.000000e+00> : vector<1xf32>
    %82 = vector.multi_reduction <add>, %81, %cst_21 [1] : vector<1x16xf32> to vector<1xf32>
    %83 = vector.shape_cast %82 : vector<1xf32> to vector<1x1xf32>
    %cst_22 = arith.constant dense<0.000000e+00> : vector<16x16xf32>
    %84 = tpu.matmul %3, %14, %cst_22 {dimension_numbers = #tpu.dot_dimension_numbers<[1], [0], [0], [1], [0, 0, 1, 1], [], []>, precision = #tpu.contract_precision<fp32>} : vector<16x16xf32>, vector<16x16xf32>, vector<16x16xf32> -> vector<16x16xf32>
    %cst_23 = arith.constant dense<0.000000e+00> : vector<16x16xf32>
    %85 = tpu.matmul %3, %22, %cst_23 {dimension_numbers = #tpu.dot_dimension_numbers<[1], [0], [0], [1], [0, 0, 1, 1], [], []>, precision = #tpu.contract_precision<fp32>} : vector<16x16xf32>, vector<16x16xf32>, vector<16x16xf32> -> vector<16x16xf32>
    %cst_24 = arith.constant dense<0.000000e+00> : vector<16x16xf32>
    %86 = tpu.matmul %3, %30, %cst_24 {dimension_numbers = #tpu.dot_dimension_numbers<[1], [0], [0], [1], [0, 0, 1, 1], [], []>, precision = #tpu.contract_precision<fp32>} : vector<16x16xf32>, vector<16x16xf32>, vector<16x16xf32> -> vector<16x16xf32>
    %cst_25 = arith.constant dense<0.000000e+00> : vector<16x16xf32>
    %87 = tpu.matmul %3, %38, %cst_25 {dimension_numbers = #tpu.dot_dimension_numbers<[1], [0], [0], [1], [0, 0, 1, 1], [], []>, precision = #tpu.contract_precision<fp32>} : vector<16x16xf32>, vector<16x16xf32>, vector<16x16xf32> -> vector<16x16xf32>
    %cst_26 = arith.constant dense<0.000000e+00> : vector<16x16xf32>
    %88 = tpu.matmul %3, %46, %cst_26 {dimension_numbers = #tpu.dot_dimension_numbers<[1], [0], [0], [1], [0, 0, 1, 1], [], []>, precision = #tpu.contract_precision<fp32>} : vector<16x16xf32>, vector<16x16xf32>, vector<16x16xf32> -> vector<16x16xf32>
    %89 = arith.mulf %84, %84 : vector<16x16xf32>
    %90 = arith.mulf %85, %85 : vector<16x16xf32>
    %91 = arith.mulf %84, %85 : vector<16x16xf32>
    %92 = arith.subf %86, %89 : vector<16x16xf32>
    %93 = arith.subf %87, %90 : vector<16x16xf32>
    %94 = arith.subf %88, %91 : vector<16x16xf32>
    %cst_27 = arith.constant 2.000000e+00 : f32
    %95 = vector.broadcast %cst_27 : f32 to vector<16x16xf32>
    %96 = arith.mulf %95, %91 : vector<16x16xf32>
    %cst_28 = arith.constant 9.99999974E-5 : f32
    %97 = vector.broadcast %cst_28 : f32 to vector<16x16xf32>
    %98 = arith.addf %96, %97 : vector<16x16xf32>
    %cst_29 = arith.constant 2.000000e+00 : f32
    %99 = vector.broadcast %cst_29 : f32 to vector<16x16xf32>
    %100 = arith.mulf %99, %94 : vector<16x16xf32>
    %cst_30 = arith.constant 8.99999984E-4 : f32
    %101 = vector.broadcast %cst_30 : f32 to vector<16x16xf32>
    %102 = arith.addf %100, %101 : vector<16x16xf32>
    %103 = arith.mulf %98, %102 : vector<16x16xf32>
    %104 = arith.addf %89, %90 : vector<16x16xf32>
    %cst_31 = arith.constant 9.99999974E-5 : f32
    %105 = vector.broadcast %cst_31 : f32 to vector<16x16xf32>
    %106 = arith.addf %104, %105 : vector<16x16xf32>
    %107 = arith.addf %92, %93 : vector<16x16xf32>
    %cst_32 = arith.constant 8.99999984E-4 : f32
    %108 = vector.broadcast %cst_32 : f32 to vector<16x16xf32>
    %109 = arith.addf %107, %108 : vector<16x16xf32>
    %110 = arith.mulf %106, %109 : vector<16x16xf32>
    %111 = tpu.reciprocal %110 : vector<16x16xf32> -> vector<16x16xf32>
    %112 = arith.mulf %103, %111 : vector<16x16xf32>
    %cst_33 = arith.constant dense<0.000000e+00> : vector<16xf32>
    %113 = vector.multi_reduction <add>, %112, %cst_33 [0] : vector<16x16xf32> to vector<16xf32>
    %114 = vector.shape_cast %113 : vector<16xf32> to vector<1x16xf32>
    %cst_34 = arith.constant dense<0.000000e+00> : vector<1xf32>
    %115 = vector.multi_reduction <add>, %114, %cst_34 [1] : vector<1x16xf32> to vector<1xf32>
    %116 = vector.shape_cast %115 : vector<1xf32> to vector<1x1xf32>
    %cst_35 = arith.constant dense<0.000000e+00> : vector<16x16xf32>
    %117 = tpu.matmul %3, %16, %cst_35 {dimension_numbers = #tpu.dot_dimension_numbers<[1], [0], [0], [1], [0, 0, 1, 1], [], []>, precision = #tpu.contract_precision<fp32>} : vector<16x16xf32>, vector<16x16xf32>, vector<16x16xf32> -> vector<16x16xf32>
    %cst_36 = arith.constant dense<0.000000e+00> : vector<16x16xf32>
    %118 = tpu.matmul %3, %24, %cst_36 {dimension_numbers = #tpu.dot_dimension_numbers<[1], [0], [0], [1], [0, 0, 1, 1], [], []>, precision = #tpu.contract_precision<fp32>} : vector<16x16xf32>, vector<16x16xf32>, vector<16x16xf32> -> vector<16x16xf32>
    %cst_37 = arith.constant dense<0.000000e+00> : vector<16x16xf32>
    %119 = tpu.matmul %3, %32, %cst_37 {dimension_numbers = #tpu.dot_dimension_numbers<[1], [0], [0], [1], [0, 0, 1, 1], [], []>, precision = #tpu.contract_precision<fp32>} : vector<16x16xf32>, vector<16x16xf32>, vector<16x16xf32> -> vector<16x16xf32>
    %cst_38 = arith.constant dense<0.000000e+00> : vector<16x16xf32>
    %120 = tpu.matmul %3, %40, %cst_38 {dimension_numbers = #tpu.dot_dimension_numbers<[1], [0], [0], [1], [0, 0, 1, 1], [], []>, precision = #tpu.contract_precision<fp32>} : vector<16x16xf32>, vector<16x16xf32>, vector<16x16xf32> -> vector<16x16xf32>
    %cst_39 = arith.constant dense<0.000000e+00> : vector<16x16xf32>
    %121 = tpu.matmul %3, %48, %cst_39 {dimension_numbers = #tpu.dot_dimension_numbers<[1], [0], [0], [1], [0, 0, 1, 1], [], []>, precision = #tpu.contract_precision<fp32>} : vector<16x16xf32>, vector<16x16xf32>, vector<16x16xf32> -> vector<16x16xf32>
    %122 = arith.mulf %117, %117 : vector<16x16xf32>
    %123 = arith.mulf %118, %118 : vector<16x16xf32>
    %124 = arith.mulf %117, %118 : vector<16x16xf32>
    %125 = arith.subf %119, %122 : vector<16x16xf32>
    %126 = arith.subf %120, %123 : vector<16x16xf32>
    %127 = arith.subf %121, %124 : vector<16x16xf32>
    %cst_40 = arith.constant 2.000000e+00 : f32
    %128 = vector.broadcast %cst_40 : f32 to vector<16x16xf32>
    %129 = arith.mulf %128, %124 : vector<16x16xf32>
    %cst_41 = arith.constant 9.99999974E-5 : f32
    %130 = vector.broadcast %cst_41 : f32 to vector<16x16xf32>
    %131 = arith.addf %129, %130 : vector<16x16xf32>
    %cst_42 = arith.constant 2.000000e+00 : f32
    %132 = vector.broadcast %cst_42 : f32 to vector<16x16xf32>
    %133 = arith.mulf %132, %127 : vector<16x16xf32>
    %cst_43 = arith.constant 8.99999984E-4 : f32
    %134 = vector.broadcast %cst_43 : f32 to vector<16x16xf32>
    %135 = arith.addf %133, %134 : vector<16x16xf32>
    %136 = arith.mulf %131, %135 : vector<16x16xf32>
    %137 = arith.addf %122, %123 : vector<16x16xf32>
    %cst_44 = arith.constant 9.99999974E-5 : f32
    %138 = vector.broadcast %cst_44 : f32 to vector<16x16xf32>
    %139 = arith.addf %137, %138 : vector<16x16xf32>
    %140 = arith.addf %125, %126 : vector<16x16xf32>
    %cst_45 = arith.constant 8.99999984E-4 : f32
    %141 = vector.broadcast %cst_45 : f32 to vector<16x16xf32>
    %142 = arith.addf %140, %141 : vector<16x16xf32>
    %143 = arith.mulf %139, %142 : vector<16x16xf32>
    %144 = tpu.reciprocal %143 : vector<16x16xf32> -> vector<16x16xf32>
    %145 = arith.mulf %136, %144 : vector<16x16xf32>
    %cst_46 = arith.constant dense<0.000000e+00> : vector<16xf32>
    %146 = vector.multi_reduction <add>, %145, %cst_46 [0] : vector<16x16xf32> to vector<16xf32>
    %147 = vector.shape_cast %146 : vector<16xf32> to vector<1x16xf32>
    %cst_47 = arith.constant dense<0.000000e+00> : vector<1xf32>
    %148 = vector.multi_reduction <add>, %147, %cst_47 [1] : vector<1x16xf32> to vector<1xf32>
    %149 = vector.shape_cast %148 : vector<1xf32> to vector<1x1xf32>
    %cst_48 = arith.constant dense<0.000000e+00> : vector<16x16xf32>
    %150 = tpu.matmul %3, %18, %cst_48 {dimension_numbers = #tpu.dot_dimension_numbers<[1], [0], [0], [1], [0, 0, 1, 1], [], []>, precision = #tpu.contract_precision<fp32>} : vector<16x16xf32>, vector<16x16xf32>, vector<16x16xf32> -> vector<16x16xf32>
    %cst_49 = arith.constant dense<0.000000e+00> : vector<16x16xf32>
    %151 = tpu.matmul %3, %26, %cst_49 {dimension_numbers = #tpu.dot_dimension_numbers<[1], [0], [0], [1], [0, 0, 1, 1], [], []>, precision = #tpu.contract_precision<fp32>} : vector<16x16xf32>, vector<16x16xf32>, vector<16x16xf32> -> vector<16x16xf32>
    %cst_50 = arith.constant dense<0.000000e+00> : vector<16x16xf32>
    %152 = tpu.matmul %3, %34, %cst_50 {dimension_numbers = #tpu.dot_dimension_numbers<[1], [0], [0], [1], [0, 0, 1, 1], [], []>, precision = #tpu.contract_precision<fp32>} : vector<16x16xf32>, vector<16x16xf32>, vector<16x16xf32> -> vector<16x16xf32>
    %cst_51 = arith.constant dense<0.000000e+00> : vector<16x16xf32>
    %153 = tpu.matmul %3, %42, %cst_51 {dimension_numbers = #tpu.dot_dimension_numbers<[1], [0], [0], [1], [0, 0, 1, 1], [], []>, precision = #tpu.contract_precision<fp32>} : vector<16x16xf32>, vector<16x16xf32>, vector<16x16xf32> -> vector<16x16xf32>
    %cst_52 = arith.constant dense<0.000000e+00> : vector<16x16xf32>
    %154 = tpu.matmul %3, %50, %cst_52 {dimension_numbers = #tpu.dot_dimension_numbers<[1], [0], [0], [1], [0, 0, 1, 1], [], []>, precision = #tpu.contract_precision<fp32>} : vector<16x16xf32>, vector<16x16xf32>, vector<16x16xf32> -> vector<16x16xf32>
    %155 = arith.mulf %150, %150 : vector<16x16xf32>
    %156 = arith.mulf %151, %151 : vector<16x16xf32>
    %157 = arith.mulf %150, %151 : vector<16x16xf32>
    %158 = arith.subf %152, %155 : vector<16x16xf32>
    %159 = arith.subf %153, %156 : vector<16x16xf32>
    %160 = arith.subf %154, %157 : vector<16x16xf32>
    %cst_53 = arith.constant 2.000000e+00 : f32
    %161 = vector.broadcast %cst_53 : f32 to vector<16x16xf32>
    %162 = arith.mulf %161, %157 : vector<16x16xf32>
    %cst_54 = arith.constant 9.99999974E-5 : f32
    %163 = vector.broadcast %cst_54 : f32 to vector<16x16xf32>
    %164 = arith.addf %162, %163 : vector<16x16xf32>
    %cst_55 = arith.constant 2.000000e+00 : f32
    %165 = vector.broadcast %cst_55 : f32 to vector<16x16xf32>
    %166 = arith.mulf %165, %160 : vector<16x16xf32>
    %cst_56 = arith.constant 8.99999984E-4 : f32
    %167 = vector.broadcast %cst_56 : f32 to vector<16x16xf32>
    %168 = arith.addf %166, %167 : vector<16x16xf32>
    %169 = arith.mulf %164, %168 : vector<16x16xf32>
    %170 = arith.addf %155, %156 : vector<16x16xf32>
    %cst_57 = arith.constant 9.99999974E-5 : f32
    %171 = vector.broadcast %cst_57 : f32 to vector<16x16xf32>
    %172 = arith.addf %170, %171 : vector<16x16xf32>
    %173 = arith.addf %158, %159 : vector<16x16xf32>
    %cst_58 = arith.constant 8.99999984E-4 : f32
    %174 = vector.broadcast %cst_58 : f32 to vector<16x16xf32>
    %175 = arith.addf %173, %174 : vector<16x16xf32>
    %176 = arith.mulf %172, %175 : vector<16x16xf32>
    %177 = tpu.reciprocal %176 : vector<16x16xf32> -> vector<16x16xf32>
    %178 = arith.mulf %169, %177 : vector<16x16xf32>
    %cst_59 = arith.constant dense<0.000000e+00> : vector<16xf32>
    %179 = vector.multi_reduction <add>, %178, %cst_59 [0] : vector<16x16xf32> to vector<16xf32>
    %180 = vector.shape_cast %179 : vector<16xf32> to vector<1x16xf32>
    %cst_60 = arith.constant dense<0.000000e+00> : vector<1xf32>
    %181 = vector.multi_reduction <add>, %180, %cst_60 [1] : vector<1x16xf32> to vector<1xf32>
    %182 = vector.shape_cast %181 : vector<1xf32> to vector<1x1xf32>
    %183 = tpu.concatenate %83, %116, %149, %182 in 0 : vector<1x1xf32>, vector<1x1xf32>, vector<1x1xf32>, vector<1x1xf32> -> vector<4x1xf32>
    %184 = vector.shape_cast %183 : vector<4x1xf32> to vector<1x4x1xf32>
    %185 = vector.shape_cast %184 : vector<1x4x1xf32> to vector<1x4x1xf32>
    %186 = vector.broadcast %185 : vector<1x4x1xf32> to vector<1x4x128xf32>
    %c0_61 = arith.constant 0 : index
    %c0_62 = arith.constant 0 : index
    %c0_63 = arith.constant 0 : index
    %187 = vector.load %arg5[%c0_61, %c0_62, %c0_63] : memref<1x4x128xf32, #tpu.memory_space<vmem>>, vector<1x4x128xf32>
    tpu.vector_store %arg5[%c0_61, %c0_62, %c0_63], %186 {strides = array<i32>} : memref<1x4x128xf32, #tpu.memory_space<vmem>>, vector<1x4x128xf32>,
    return
  }
  func.func @transform_0(%arg0: i32) -> (i32, i32, i32) {
    %c0_i32 = arith.constant 0 : i32
    %c0_i32_0 = arith.constant 0 : i32
    %c0_i32_1 = arith.constant 0 : i32
    return %arg0, %c0_i32, %c0_i32_0 : i32, i32, i32
  }
  func.func @transform_1(%arg0: i32) -> (i32, i32, i32) {
    %c0_i32 = arith.constant 0 : i32
    %c0_i32_0 = arith.constant 0 : i32
    %c0_i32_1 = arith.constant 0 : i32
    return %arg0, %c0_i32, %c0_i32_0 : i32, i32, i32
  }
  func.func @transform_2(%arg0: i32) -> (i32, i32) {
    %c0_i32 = arith.constant 0 : i32
    %c0_i32_0 = arith.constant 0 : i32
    %c0_i32_1 = arith.constant 0 : i32
    return %c0_i32, %c0_i32_0 : i32, i32
  }
  func.func @transform_3(%arg0: i32) -> (i32, i32) {
    %c0_i32 = arith.constant 0 : i32
    %c0_i32_0 = arith.constant 0 : i32
    %c0_i32_1 = arith.constant 0 : i32
    return %c0_i32, %c0_i32_0 : i32, i32
  }
  func.func @transform_4(%arg0: i32) -> (i32, i32, i32) {
    %c0_i32 = arith.constant 0 : i32
    %c0_i32_0 = arith.constant 0 : i32
    %c0_i32_1 = arith.constant 0 : i32
    return %arg0, %c0_i32, %c0_i32_0 : i32, i32, i32
  }
}

</mosaic_0001>

<bundles_post_ra>
// kernel: ssim_pallas.1
= control target key start
LH: loop header
LB: loop body
LE: loop exit
PB: predicated region body
PF: predicated region fallthrough
CT: control target
= control target key end

     0   :  { %9 = vsyncpa [#allocation3], 0  ;;  %s17681_s0 = inlined_call_operand.hbm [shape: f32[8,16,16], index: 0, kind: input, shape index: {}]   ;;  %s17682_s1 = inlined_call_operand.hbm [shape: f32[8,16,16], index: 1, kind: input, shape index: {}]   ;;  %s17683_s2 = inlined_call_operand.vmem [shape: f32[16,16], index: 2, kind: input, shape index: {}, may-alias: {2,3}]   ;;  %s17684_s3 = inlined_call_operand.vmem [shape: f32[16,16], index: 3, kind: input, shape index: {}, may-alias: {2,3}]   ;;  %s17685_s4 = inlined_call_operand.vmem [shape: f32[2,4,128], index: 4, kind: output, shape index: {}]  }
   0x1   :  { %11 = vsyncpa [#allocation3 + $0x1], 0 }
   0x2   :  { %12 = vsyncpa [#allocation5], 0 }
   0x3   :  { %14 = vsyncpa [#allocation5 + $0x1], 0  ;;  %s15974_s15 = smov 0   ;;  %s15976_s16 = smov 0  }
   0x4   :  { %s15978_s17 = smov 0   ;;  %s15980_s18 = smov 0  }
   0x5 LB: > { %s15993_s19 = sadd.s32 4294967295, %s15942_s18   ;;  %s15996_s20 = sadd.s32 1, %s15942_s18   ;;  %s15942_s18 = sphi %s15980_s18, %s18092_s18   ;;  %s15938_s17 = sphi %s15978_s17, %s18091_s17   ;;  %s15934_s16 = sphi %s15976_s16, %s18090_s16   ;;  %s15930_s15 = sphi %s15974_s15, %s18089_s15  }
   0x6   : > { %s24_s21 = ssub.s32 %s15942_s18, %s15996_s20  ;;  %s27_s22 = sadd.s32 1, %s15938_s17 }
   0x7   : > { %p25_p0 = scmp.eq.s32.totalorder %s24_s21, 0  ;;  %p34_p1 = scmp.ne.s32.totalorder %s15938_s17, %s15934_s16 }
   0x8   : > { %p35_p2 = scmp.eq.s32.totalorder %s15942_s18, 0  ;;  %p40_p3 = scmp.ne.s32.totalorder %s15934_s16, %s15930_s15 }
   0x9   : > { %s16006_s23 = scalar_select %p25_p0, %s15938_s17, %s27_s22  }
   0xa   : > { %p36_p4 = por %p35_p2, %p34_p1  ;;  %p41_p5 = scmp.eq.s32.totalorder %s15993_s19, 0 }
   0xb   : > { %p15791_p6 = scmp.lt.s32.totalorder %s15942_s18, 2  ;;  %s16015_s25 = sand.u32 1, %s15938_s17  }
   0xc   : > { %p16010_p7 = por %p41_p5, %p40_p3  ;;  %s12902_s26 = sshll.u32 %s16015_s25, 6 }
   0xd   : > { %s12917_s27 = sshll.u32 %s15942_s18, 10  ;;  %s168_s5 = scalar_lea.vmem [#allocation2], %s12902_s26 }
   0xe   : > { %s17852_s24 = scalar_select %p16010_p7, 1, 0 }
   0xf   : > { %s16024_s30 = scalar_lea.hbm %s17681_s0, %s12917_s27  ;;  %s176_s6 = sshll.u32 %s168_s5, 4  ;;  %s16028_s6 = int_to_ptr.vmem [resolvable:$true] %s176_s6 }
  0x10   : > { %p16030_p8 = pnand %p15791_p6, %p36_p4  ;;  %s165_s8 = scalar_lea.sflag [#allocation3], %s16015_s25 }
  0x11   : > { %s15844_s9 = scalar_lea.hbm %s16024_s30, 1024  ;;  %s15849_s12 = scalar_lea.hbm %s17681_s0, 2048 }
  0x12   : > { %p15845_p10 = scmp.ne.s32.totalorder %s16024_s30, %s15844_s9  ;;  %p15846_p11 = pneg %p16030_p8 }
  0x13   : > { %p15850_p0 = scmp.lt.u32.totalorder %s16024_s30, %s17681_s0  ;;  %p15851_p1 = scmp.lt.u32.totalorder %s15849_s12, %s15844_s9 }
  0x14   : > { %p15847_p12 = pnand %p15846_p11, %p15845_p10  ;;  %p15853_p3 = scmp.lt.u32.totalorder %s15844_s9, %s16024_s30 }
  0x15   : > { %p15852_p2 = por %p15851_p1, %p15850_p0 }
  0x16   : > { %p15848_p13 = pneg %p15847_p12 }
  0x17   : > { %p15854_p4 = por %p15853_p3, %p15852_p2 }
  0x19   : > { %p15855_p5 = pnand %p15854_p4, %p15848_p13 }
  0x1b   : > { %15858 = shalt.err (!%p15855_p5)
}
  0x1c   : > { %s15859_s15 = scalar_lea.vmem %s16028_s6, 1024  ;;  %s15944_s21 = smov [#allocation2]  }
  0x1d   : > { %p15860_p6 = scmp.ne.s32.totalorder %s16028_s6, %s15859_s15  ;;  %s15864_s22 = sshll.u32 %s15944_s21, 4  ;;  %s15865_s22 = int_to_ptr.vmem [resolvable:$false] %s15864_s22 }
  0x1e   : > { %s15866_s28 = scalar_lea.vmem %s15865_s22, 2048  ;;  %p15867_p9 = scmp.lt.s32.totalorder %s16028_s6, %s15865_s22 }
  0x1f   : > { %p15862_p10 = pnand %p15860_p6, %p15846_p11  ;;  %p15868_p0 = scmp.lt.s32.totalorder %s15866_s28, %s15859_s15 }
  0x21   : > { %p15863_p12 = pneg %p15862_p10  ;;  %p15869_p1 = por %p15868_p0, %p15867_p9 }
  0x23   : > { %p15870_p2 = pnand %p15869_p1, %p15863_p12 }
  0x25   : > { %15873 = shalt.err (!%p15870_p2)
}
  0x26   : > { %s15945_s29 = smov 128   ;;  %s15946_s5 = smov 8  }
  0x27   : > { %15787 = dma.hbm_to_vmem [thread:$0]  (!%p16030_p8), %s16024_s30, 1024, %s16028_s6, %s165_s8, %s15945_s29, %s15945_s29, %s15946_s5  }
  0x28   : > { %p206_p9 = scmp.lt.s32.totalorder %s15942_s18, 3  ;;  %s16072_s11 = scalar_lea.hbm %s17682_s1, %s12917_s27 }
  0x29   : > { %p17854_p13 = scmp.ge.s32.totalorder %s15942_s18, 1  ;;  %s190_s13 = scalar_lea.vmem [#allocation4], %s12902_s26 }
  0x2a   : > { %s198_s14 = sshll.u32 %s190_s13, 4  ;;  %s187_s30 = scalar_lea.sflag [#allocation5], %s16015_s25  ;;  %s16082_s14 = int_to_ptr.vmem [resolvable:$true] %s198_s14 }
  0x2b   : > { %p16076_p3 = pnand %p17854_p13, %p206_p9  ;;  %s15874_s6 = scalar_lea.hbm %s16072_s11, 1024 }
  0x2c   : > { %p15875_p4 = scmp.ne.s32.totalorder %s16072_s11, %s15874_s6  ;;  %s15879_s8 = scalar_lea.hbm %s17682_s1, 2048 }
  0x2d   : > { %p15880_p10 = scmp.lt.u32.totalorder %s16072_s11, %s17682_s1  ;;  %p15881_p12 = scmp.lt.u32.totalorder %s15879_s8, %s15874_s6 }
  0x2e   : > { %p15877_p5 = pnand %p15875_p4, %p15846_p11  ;;  %p15883_p1 = scmp.lt.u32.totalorder %s15874_s6, %s16072_s11 }
  0x2f   : > { %p15882_p0 = por %p15881_p12, %p15880_p10 }
  0x30   : > { %p15878_p6 = pneg %p15877_p5 }
  0x31   : > { %p15884_p2 = por %p15883_p1, %p15882_p0 }
  0x33   : > { %p15885_p9 = pnand %p15884_p2, %p15878_p6 }
  0x35   : > { %15888 = shalt.err (!%p15885_p9)
}
  0x36   : > { %s15889_s26 = scalar_lea.vmem %s16082_s14, 1024  ;;  %s15947_s22 = smov [#allocation4]  }
  0x37   : > { %p15890_p13 = scmp.ne.s32.totalorder %s16082_s14, %s15889_s26  ;;  %s15894_s28 = sshll.u32 %s15947_s22, 4  ;;  %s15895_s28 = int_to_ptr.vmem [resolvable:$false] %s15894_s28 }
  0x38   : > { %s15896_s9 = scalar_lea.vmem %s15895_s28, 2048  ;;  %p15897_p7 = scmp.lt.s32.totalorder %s16082_s14, %s15895_s28 }
  0x39   : > { %p15892_p4 = pnand %p15890_p13, %p15846_p11  ;;  %p15898_p10 = scmp.lt.s32.totalorder %s15896_s9, %s15889_s26 }
  0x3b   : > { %p15893_p5 = pneg %p15892_p4  ;;  %p15899_p12 = por %p15898_p10, %p15897_p7 }
  0x3d   : > { %p15900_p0 = pnand %p15899_p12, %p15893_p5 }
  0x3f   : > { %15903 = shalt.err (!%p15900_p0)
}
  0x40   : > { %15790 = dma.hbm_to_vmem [thread:$0]  (!%p16030_p8), %s16072_s11, 1024, %s16082_s14, %s187_s30, %s15945_s29, %s15945_s29, %s15946_s5  }
  0x41   : > { %210 = sbr.rel (%p16076_p3) target bundleno = 2100 (0x834), region = 36 }
  0x48   : > { %s212_s10 = sand.u32 1, %s15934_s16   ;;  %p17856_p7 = scmp.ne.s32.totalorder %s17852_s24, 0 }
  0x49   : > { %s12911_s13 = sshll.u32 %s212_s10, 6  ;;  %s213_s6 = scalar_lea.sflag [#allocation3], %s212_s10 }
  0x4a   : > { %s16116_s18 = scalar_lea.vmem [#allocation2], %s12911_s13 }
  0x4b   : > { %15921 = dma.done.wait (%p17856_p7), %s213_s6, 1024  }
  0x4c   : > { %15923 = vsyncadd (%p17856_p7), %s213_s6, 4294966272  ;;  %s222_s25 = scalar_lea.sflag [#allocation5], %s212_s10  ;;  %s16122_s7 = scalar_lea.vmem [#allocation4], %s12911_s13 }
  0x4d   : > { %15925 = dma.done.wait (%p17856_p7), %s222_s25, 1024  }
  0x4e   : > { %15927 = vsyncadd (%p17856_p7), %s222_s25, 4294966272  ;;  %vm304_vm0 = vcmask 130048   ;;  %v276_v0 = vld [vmem:[%s17683_s2] sm:$0xff]  ;;  %v277_v1 = vld [vmem:[%s17683_s2 + $0x8] sm:$0xff]  ;;  %vm12799_vm1 = vcmask 1040384   ;;  %vm12801_vm2 = vcmask 1041408  }
  0x4f   : > { %v16135_v2 = vld [vmem:[%s16116_s18] sm:$0xff]  ;;  %v426_v3 = vand.u32 4294901760, %v276_v0  ;;  %v429_v4 = vand.u32 4294901760, %v277_v1  ;;  %v16140_v6 = vld [vmem:[%s16116_s18 + $0x8] sm:$0xff]  ;;  %v16143_v7 = vld [vmem:[%s16116_s18 + $0x10] sm:$0xff]  ;;  %vm12803_vm3 = vcmask 1042432  }
  0x50   : > { %v306_v5 = vsel %vm304_vm0, %v16135_v2, 0  ;;  %v16147_v8 = vmul.f32 %v16135_v2, %v16135_v2  ;;  %v309_v10 = vsel %vm304_vm0, %v16140_v6, 0  ;;  %v312_v11 = vsel %vm304_vm0, %v16143_v7, 0  ;;  %v16156_v12 = vld [vmem:[%s16116_s18 + $0x18] sm:$0xff]  ;;  %v16159_v13 = vld [vmem:[%s16116_s18 + $0x20] sm:$0xff]  ;;  %v16162_v14 = vld [vmem:[%s16116_s18 + $0x28] sm:$0xff] }
  0x51   : > { %v16149_v9 = vand.u32 4294901760, %v306_v5  ;;  %v16164_v15 = vpack.c.bf16 %v429_v4, %v426_v3  ;;  %v16166_v16 = vand.u32 4294901760, %v309_v10  ;;  %v16168_v17 = vand.u32 4294901760, %v312_v11  ;;  %v16228_v43 = vld [vmem:[%s16116_s18 + $0x30] sm:$0xff]  ;;  %v16231_v44 = vld [vmem:[%s16116_s18 + $0x38] sm:$0xff]  ;;  %v16234_v45 = vld [vmem:[%s16122_s7] sm:$0xff] }
  0x52   : > { %v315_v18 = vsel %vm304_vm0, %v16156_v12, 0  ;;  %v16177_v21 = vsub.f32 %v276_v0, %v426_v3  ;;  %v16179_v22 = vsub.f32 %v277_v1, %v429_v4  ;;  %v318_v25 = vsel %vm304_vm0, %v16159_v13, 0  ;;  %v16240_v50 = vld [vmem:[%s16122_s7 + $0x8] sm:$0xff]  ;;  %v16245_v55 = vld [vmem:[%s16122_s7 + $0x10] sm:$0xff]  ;;  %v16248_v56 = vld [vmem:[%s16122_s7 + $0x18] sm:$0xff]  ;;  %p256_p8 = scmp.lt.s32.totalorder %s15993_s19, 1 }
  0x53   : > { %v16173_v19 = vsub.f32 %v306_v5, %v16149_v9  ;;  %v16175_v20 = vand.u32 4294901760, %v315_v18  ;;  %14877 = vmatprep.subr.bf16.mxu0 %v16164_v15  ;;  %v16183_v23 = vsub.f32 %v309_v10, %v16166_v16  ;;  %v16186_v24 = vsub.f32 %v312_v11, %v16168_v17  ;;  %v16273_v10 = vld [vmem:[%s16122_s7 + $0x20] sm:$0xff]  ;;  %v16276_v11 = vld [vmem:[%s16122_s7 + $0x28] sm:$0xff] }
  0x54   : > { %v321_v26 = vsel %vm304_vm0, %v16162_v14, 0  ;;  %14879 = vmatpush3.bf16.msra.mxu0 %v16164_v15  ;;  %v17700_v29 = vand.u32 4294901760, %v16177_v21  ;;  %v17697_v30 = vand.u32 4294901760, %v16179_v22  ;;  %v16201_v33 = vand.u32 4294901760, %v318_v25  ;;  %s18094_s19 = smov (!%p256_p8, %s15993_s19), 1 }
  0x55   : > { %17857 = vst [vmem:[#allocation8_spill] sm:$0xff] %v16173_v19  ;;  %17858 = vst [vmem:[#allocation9_spill] sm:$0xff] %v16183_v23  ;;  %v17696_v27 = vand.u32 4294901760, %v16173_v19  ;;  %v16195_v28 = vsub.f32 %v315_v18, %v16175_v20  ;;  %v17693_v31 = vand.u32 4294901760, %v16183_v23  ;;  %v17692_v32 = vand.u32 4294901760, %v16186_v24  ;;  %s12913_s8 = sshll.u32 %s18094_s19, 2 }
  0x56   : > { %17859 = vst [vmem:[#allocation10_spill] sm:$0xff] %v16186_v24  ;;  %v16203_v34 = vand.u32 4294901760, %v321_v26  ;;  %v896_v37 = vsub.f32 %v16177_v21, %v17700_v29  ;;  %v903_v38 = vsub.f32 %v16179_v22, %v17697_v30  ;;  %v16222_v41 = vsub.f32 %v318_v25, %v16201_v33  ;;  %s259_s26 = scalar_lea.vmem %s17685_s4, %s12913_s8 }
  0x57   : > { %17860 = vst [vmem:[#allocation11_spill] sm:$0xff] %v16195_v28  ;;  %v495_v35 = vsub.f32 %v16173_v19, %v17696_v27  ;;  %v17691_v36 = vand.u32 4294901760, %v16195_v28  ;;  %v505_v39 = vsub.f32 %v16183_v23, %v17693_v31  ;;  %v515_v40 = vsub.f32 %v16186_v24, %v17692_v32 }
  0x58   : > { %17861 = vst [vmem:[#allocation12_spill] sm:$0xff] %v16222_v41  ;;  %v16225_v42 = vsub.f32 %v321_v26, %v16203_v34  ;;  %v897_v48 = vand.u32 4294901760, %v896_v37  ;;  %v904_v49 = vand.u32 4294901760, %v903_v38  ;;  %v17689_v53 = vand.u32 4294901760, %v16222_v41 }
  0x59   : > { %v496_v46 = vand.u32 4294901760, %v495_v35  ;;  %v525_v47 = vsub.f32 %v16195_v28, %v17691_v36  ;;  %v506_v51 = vand.u32 4294901760, %v505_v39  ;;  %v516_v52 = vand.u32 4294901760, %v515_v40 }
  0x5a   : > { %17862 = vst [vmem:[#allocation13_spill] sm:$0xff] %v16225_v42  ;;  %v17687_v54 = vand.u32 4294901760, %v16225_v42  ;;  %v14880_v58 = vpack.c.bf16 %v904_v49, %v897_v48  ;;  %v324_v59 = vsel %vm304_vm0, %v16228_v43, 0  ;;  %v327_v60 = vsel %vm304_vm0, %v16231_v44, 0 }
  0x5b   : > { %13656 = vmatprep.mubr.f32.mxu0 %v496_v46  ;;  %v526_v57 = vand.u32 4294901760, %v525_v47  ;;  %v535_v61 = vsub.f32 %v16222_v41, %v17689_v53  ;;  %v16260_v63 = vand.u32 4294901760, %v324_v59  ;;  %v16262_v0 = vand.u32 4294901760, %v327_v60 }
  0x5c   : > { %13657 = vmatmul.mubr.f32.vlgmr.msra.gmra.mrb[0].mxu0 %v506_v51  ;;  %v545_v62 = vsub.f32 %v16225_v42, %v17687_v54  ;;  %14881 = vmatprep.subr.bf16.mxu0 %v14880_v58  ;;  %v330_v1 = vsel %vm304_vm0, %v16234_v45, 0  ;;  %v333_v3 = vsel %vm304_vm0, %v16240_v50, 0  ;;  %v336_v4 = vsel %vm304_vm0, %v16245_v55, 0  ;;  %v16328_v54 = vld [vmem:[%s16122_s7 + $0x38] sm:$0xff] }
  0x5d   : > { %13659 = vmatprep.mubr.f32.mxu0 %v516_v52  ;;  %v339_v5 = vsel %vm304_vm0, %v16248_v56, 0  ;;  %14883 = vmatpush3.bf16.msra.mxu0 %v14880_v58  ;;  %v536_v18 = vand.u32 4294901760, %v535_v61  ;;  %v16279_v26 = vsub.f32 %v324_v59, %v16260_v63  ;;  %v16282_v35 = vsub.f32 %v327_v60, %v16262_v0 }
  0x5e   : > { %v546_v25 = vand.u32 4294901760, %v545_v62  ;;  %v16284_v37 = vand.u32 4294901760, %v330_v1  ;;  %v16286_v38 = vand.u32 4294901760, %v333_v3  ;;  %v16288_v39 = vand.u32 4294901760, %v336_v4 }
  0x5f   : > { %17863 = vst [vmem:[#allocation14_spill] sm:$0xff] %v16279_v26  ;;  %17864 = vst [vmem:[#allocation15_spill] sm:$0xff] %v16282_v35  ;;  %v16290_v40 = vand.u32 4294901760, %v339_v5  ;;  %v17688_v46 = vand.u32 4294901760, %v16279_v26  ;;  %v17690_v47 = vand.u32 4294901760, %v16282_v35  ;;  %v342_v48 = vsel %vm304_vm0, %v16273_v10, 0 }
  0x60   : > { %13660 = vmatmul.mubr.f32.gmra.mrb[2].mxu0 %v526_v57  ;;  %v345_v49 = vsel %vm304_vm0, %v16276_v11, 0  ;;  %v16299_v51 = vsub.f32 %v330_v1, %v16284_v37  ;;  %v16302_v52 = vsub.f32 %v333_v3, %v16286_v38  ;;  %v16305_v57 = vsub.f32 %v336_v4, %v16288_v39 }
  0x61   : > { %13662 = vmatprep.mubr.f32.mxu0 %v536_v18  ;;  %v16308_v58 = vsub.f32 %v339_v5, %v16290_v40  ;;  %v555_v59 = vsub.f32 %v16279_v26, %v17688_v46  ;;  %v565_v60 = vsub.f32 %v16282_v35, %v17690_v47  ;;  %v16316_v61 = vand.u32 4294901760, %v342_v48  ;;  %v16325_v18 = vld [vmem:[%s16122_s7 + $0x30] sm:$0xff] }
  0x62   : > { %17865 = vst [vmem:[#allocation16_spill] sm:$0xff] %v16299_v51  ;;  %17866 = vst [vmem:[#allocation17_spill] sm:$0xff] %v16302_v52  ;;  %v16318_v62 = vand.u32 4294901760, %v345_v49  ;;  %v17694_v1 = vand.u32 4294901760, %v16299_v51  ;;  %v17695_v3 = vand.u32 4294901760, %v16302_v52  ;;  %v17698_v4 = vand.u32 4294901760, %v16305_v57 }
  0x63   : > { %17867 = vst [vmem:[#allocation18_spill] sm:$0xff] %v16305_v57  ;;  %17868 = vst [vmem:[#allocation19_spill] sm:$0xff] %v16308_v58  ;;  %v17699_v5 = vand.u32 4294901760, %v16308_v58  ;;  %v556_v46 = vand.u32 4294901760, %v555_v59  ;;  %v566_v53 = vand.u32 4294901760, %v565_v60  ;;  %v16331_v47 = vsub.f32 %v342_v48, %v16316_v61 }
  0x64   : > { %13663 = vmatmul.mubr.f32.gmra.mrb[4].mxu0 %v546_v25  ;;  %v16334_v36 = vsub.f32 %v345_v49, %v16318_v62  ;;  %v575_v32 = vsub.f32 %v16299_v51, %v17694_v1  ;;  %v585_v31 = vsub.f32 %v16302_v52, %v17695_v3  ;;  %v595_v25 = vsub.f32 %v16305_v57, %v17698_v4 }
  0x65   : > { %17869 = vst [vmem:[#allocation20_spill] sm:$0xff] %v16331_v47  ;;  %v605_v48 = vsub.f32 %v16308_v58, %v17699_v5  ;;  %13665 = vmatprep.mubr.f32.mxu0 %v556_v46  ;;  %v17703_v49 = vand.u32 4294901760, %v16331_v47  ;;  %v348_v60 = vsel %vm304_vm0, %v16325_v18, 0  ;;  %v351_v1 = vsel %vm304_vm0, %v16328_v54, 0 }
  0x66   : > { %17870 = vst [vmem:[#allocation21_spill] sm:$0xff] %v16334_v36  ;;  %v576_v3 = vand.u32 4294901760, %v575_v32  ;;  %v586_v27 = vand.u32 4294901760, %v585_v31  ;;  %v596_v30 = vand.u32 4294901760, %v595_v25  ;;  %v16357_v46 = vand.u32 4294901760, %v348_v60 }
  0x67   : > { %v606_v4 = vand.u32 4294901760, %v605_v48  ;;  %v615_v5 = vsub.f32 %v16331_v47, %v17703_v49  ;;  %v16359_v29 = vand.u32 4294901760, %v351_v1  ;;  %v354_v59 = vsel %vm304_vm0, %v16147_v8, 0 }
  0x68   : > { %13666 = vmatmul.mubr.f32.gmra.mrb[6].mxu0 %v566_v53  ;;  %v281_v58 = vmul.f32 %v16140_v6, %v16140_v6  ;;  %v282_v31 = vmul.f32 %v16143_v7, %v16143_v7  ;;  %v283_v32 = vmul.f32 %v16156_v12, %v16156_v12  ;;  %v17871_v25 = vand.u32 4294901760, %v16334_v36 }
  0x69   : > { %13668 = vmatprep.mubr.f32.mxu0 %v576_v3  ;;  %v616_v53 = vand.u32 4294901760, %v615_v5  ;;  %v16373_v49 = vsub.f32 %v348_v60, %v16357_v46  ;;  %v16376_v3 = vsub.f32 %v351_v1, %v16359_v29  ;;  %v16378_v8 = vand.u32 4294901760, %v354_v59 }
  0x6a   : > { %v625_v48 = vsub.f32 %v16334_v36, %v17871_v25  ;;  %v357_v47 = vsel %vm304_vm0, %v281_v58, 0  ;;  %v360_v57 = vsel %vm304_vm0, %v282_v31, 0  ;;  %v363_v52 = vsel %vm304_vm0, %v283_v32, 0 }
  0x6b   : > { %17872 = vst [vmem:[#allocation22_spill] sm:$0xff] %v16373_v49  ;;  %17873 = vst [vmem:[#allocation23_spill] sm:$0xff] %v16376_v3  ;;  %v17722_v5 = vand.u32 4294901760, %v16373_v49  ;;  %v16385_v25 = vand.u32 4294901760, %v357_v47  ;;  %v16387_v60 = vand.u32 4294901760, %v360_v57  ;;  %v16390_v1 = vsub.f32 %v354_v59, %v16378_v8 }
  0x6c   : > { %17874 = vst [vmem:[#allocation24_spill] sm:$0xff] %v16378_v8  ;;  %13669 = vmatmul.mubr.f32.gmra.mrb[8].mxu0 %v586_v27  ;;  %v16392_v36 = vand.u32 4294901760, %v363_v52  ;;  %v284_v58 = vmul.f32 %v16159_v13, %v16159_v13  ;;  %v285_v27 = vmul.f32 %v16162_v14, %v16162_v14  ;;  %v626_v31 = vand.u32 4294901760, %v625_v48 }
  0x6d   : > { %17875 = vst [vmem:[#allocation25_spill] sm:$0xff] %v16385_v25  ;;  %17876 = vst [vmem:[#allocation26_spill] sm:$0xff] %v16387_v60  ;;  %13671 = vmatprep.mubr.f32.mxu0 %v596_v30  ;;  %v635_v32 = vsub.f32 %v16373_v49, %v17722_v5  ;;  %v16402_v51 = vsub.f32 %v357_v47, %v16385_v25  ;;  %v16405_v30 = vsub.f32 %v360_v57, %v16387_v60 }
  0x6e   : > { %17877 = vst [vmem:[#allocation27_spill] sm:$0xff] %v16390_v1  ;;  %17878 = vst [vmem:[#allocation28_spill] sm:$0xff] %v16392_v36  ;;  %v17725_v59 = vand.u32 4294901760, %v16390_v1  ;;  %v16409_v35 = vsub.f32 %v363_v52, %v16392_v36  ;;  %v366_v26 = vsel %vm304_vm0, %v284_v58, 0  ;;  %v369_v42 = vsel %vm304_vm0, %v285_v27, 0 }
  0x6f   : > { %17879 = vst [vmem:[#allocation29_spill] sm:$0xff] %v16402_v51  ;;  %17880 = vst [vmem:[#allocation30_spill] sm:$0xff] %v16405_v30  ;;  %v636_v48 = vand.u32 4294901760, %v635_v32  ;;  %v17882_v41 = vand.u32 4294901760, %v16376_v3  ;;  %v17734_v47 = vand.u32 4294901760, %v16402_v51  ;;  %v17737_v57 = vand.u32 4294901760, %v16405_v30 }
  0x70   : > { %17881 = vst [vmem:[#allocation31_spill] sm:$0xff] %v16409_v35  ;;  %13672 = vmatmul.mubr.f32.gmra.mrb[10].mxu0 %v606_v4  ;;  %v655_v52 = vsub.f32 %v16390_v1, %v17725_v59  ;;  %v16422_v58 = vand.u32 4294901760, %v366_v26  ;;  %v16424_v27 = vand.u32 4294901760, %v369_v42  ;;  %v286_v4 = vmul.f32 %v16228_v43, %v16228_v43 }
  0x71   : > { %v645_v5 = vsub.f32 %v16376_v3, %v17882_v41  ;;  %13674 = vmatprep.mubr.f32.mxu0 %v616_v53  ;;  %v287_v41 = vmul.f32 %v16231_v44, %v16231_v44  ;;  %v665_v53 = vsub.f32 %v16402_v51, %v17734_v47  ;;  %v675_v1 = vsub.f32 %v16405_v30, %v17737_v57 }
  0x72   : > { %17883 = vst [vmem:[#allocation32_spill] sm:$0xff] %v16422_v58  ;;  %17884 = vst [vmem:[#allocation33_spill] sm:$0xff] %v16424_v27  ;;  %v16434_v32 = vsub.f32 %v366_v26, %v16422_v58  ;;  %v16437_v59 = vsub.f32 %v369_v42, %v16424_v27  ;;  %v372_v3 = vsel %vm304_vm0, %v286_v4, 0  ;;  %v656_v24 = vand.u32 4294901760, %v655_v52 }
  0x73   : > { %v646_v49 = vand.u32 4294901760, %v645_v5  ;;  %v375_v28 = vsel %vm304_vm0, %v287_v41, 0  ;;  %v17887_v47 = vand.u32 4294901760, %v16409_v35  ;;  %v16448_v42 = vand.u32 4294901760, %v372_v3 }
  0x74   : > { %17885 = vst [vmem:[#allocation34_spill] sm:$0xff] %v16434_v32  ;;  %17886 = vst [vmem:[#allocation35_spill] sm:$0xff] %v16437_v59  ;;  %13675 = vmatmul.mubr.f32.gmra.mrb[12].mxu0 %v626_v31  ;;  %v16450_v31 = vand.u32 4294901760, %v375_v28  ;;  %v288_v5 = vmul.f32 %v16234_v45, %v16234_v45  ;;  %v289_v4 = vmul.f32 %v16240_v50, %v16240_v50  ;;  %v666_v52 = vand.u32 4294901760, %v665_v53 }
  0x75   : > { %13677 = vmatprep.mubr.f32.mxu0 %v636_v48  ;;  %v685_v26 = vsub.f32 %v16409_v35, %v17887_v47  ;;  %17888 = vst [vmem:[#allocation36_spill] sm:$0xff] %v16448_v42  ;;  %v290_v48 = vmul.f32 %v16245_v55, %v16245_v55  ;;  %v16460_v47 = vsub.f32 %v372_v3, %v16448_v42  ;;  %v676_v53 = vand.u32 4294901760, %v675_v1 }
  0x76   : > { %17889 = vst [vmem:[#allocation37_spill] sm:$0xff] %v16450_v31  ;;  %v291_v57 = vmul.f32 %v16248_v56, %v16248_v56  ;;  %v16465_v51 = vsub.f32 %v375_v28, %v16450_v31  ;;  %v378_v35 = vsel %vm304_vm0, %v288_v5, 0  ;;  %v381_v30 = vsel %vm304_vm0, %v289_v4, 0 }
  0x77   : > { %17890 = vst [vmem:[#allocation38_spill] sm:$0xff] %v16460_v47  ;;  %v384_v23 = vsel %vm304_vm0, %v290_v48, 0  ;;  %v17892_v41 = vand.u32 4294901760, %v16434_v32  ;;  %v16474_v42 = vand.u32 4294901760, %v378_v35  ;;  %v16477_v28 = vand.u32 4294901760, %v381_v30 }
  0x78   : > { %13678 = vmatmul.mubr.f32.gmra.mrb[14].mxu0 %v646_v49  ;;  %17891 = vst [vmem:[#allocation39_spill] sm:$0xff] %v16465_v51  ;;  %v16479_v31 = vand.u32 4294901760, %v384_v23  ;;  %v387_v5 = vsel %vm304_vm0, %v291_v57, 0  ;;  %v686_v4 = vand.u32 4294901760, %v685_v26  ;;  %v292_v48 = vmul.f32 %v16273_v10, %v16273_v10 }
  0x79   : > { %13680 = vmatprep.mubr.f32.mxu0 %v656_v24  ;;  %v695_v3 = vsub.f32 %v16434_v32, %v17892_v41  ;;  %17893 = vst [vmem:[#allocation40_spill] sm:$0xff] %v16474_v42  ;;  %17894 = vst [vmem:[#allocation41_spill] sm:$0xff] %v16477_v28  ;;  %v16483_v24 = vsub.f32 %v378_v35, %v16474_v42  ;;  %v16485_v1 = vand.u32 4294901760, %v387_v5  ;;  %v17898_v41 = vand.u32 4294901760, %v16437_v59 }
  0x7a   : > { %17895 = vst [vmem:[#allocation42_spill] sm:$0xff] %v16479_v31  ;;  %v16493_v19 = vsub.f32 %v381_v30, %v16477_v28  ;;  %v16496_v32 = vsub.f32 %v384_v23, %v16479_v31  ;;  %v293_v35 = vmul.f32 %v16276_v11, %v16276_v11  ;;  %v17899_v26 = vand.u32 4294901760, %v16460_v47 }
  0x7b   : > { %17896 = vst [vmem:[#allocation43_spill] sm:$0xff] %v16483_v24  ;;  %17897 = vst [vmem:[#allocation44_spill] sm:$0xff] %v16485_v1  ;;  %v705_v49 = vsub.f32 %v16437_v59, %v17898_v41  ;;  %v696_v57 = vand.u32 4294901760, %v695_v3  ;;  %v390_v27 = vsel %vm304_vm0, %v292_v48, 0  ;;  %v17900_v41 = vand.u32 4294901760, %v16465_v51 }
  0x7c   : > { %13681 = vmatmul.mubr.f32.gmra.mrb[16].mxu0 %v666_v52  ;;  %v715_v42 = vsub.f32 %v16460_v47, %v17899_v26  ;;  %v16510_v59 = vsub.f32 %v387_v5, %v16485_v1  ;;  %v16512_v31 = vand.u32 4294901760, %v390_v27  ;;  %v393_v26 = vsel %vm304_vm0, %v293_v35, 0 }
  0x7d   : > { %13683 = vmatprep.mubr.f32.mxu0 %v676_v53  ;;  %v725_v30 = vsub.f32 %v16465_v51, %v17900_v41  ;;  %v296_v53 = vmul.f32 %v16234_v45, %v16135_v2  ;;  %v294_v48 = vmul.f32 %v16325_v18, %v16325_v18  ;;  %v706_v52 = vand.u32 4294901760, %v705_v49 }
  0x7e   : > { %17901 = vst [vmem:[#allocation45_spill] sm:$0xff] %v16512_v31  ;;  %v17902_v41 = vand.u32 4294901760, %v16483_v24  ;;  %v16524_v5 = vsub.f32 %v390_v27, %v16512_v31  ;;  %v16526_v51 = vand.u32 4294901760, %v393_v26  ;;  %v716_v2 = vand.u32 4294901760, %v715_v42 }
  0x7f   : > { %v396_v45 = vsel %vm304_vm0, %v294_v48, 0  ;;  %v295_v35 = vmul.f32 %v16328_v54, %v16328_v54  ;;  %v726_v3 = vand.u32 4294901760, %v725_v30  ;;  %v17906_v27 = vand.u32 4294901760, %v16496_v32 }
  0x80   : > { %13684 = vmatmul.mubr.f32.gmra.mrb[18].mxu0 %v686_v4  ;;  %v735_v23 = vsub.f32 %v16483_v24, %v17902_v41  ;;  %17903 = vst [vmem:[#allocation46_spill] sm:$0xff] %v16524_v5  ;;  %17904 = vst [vmem:[#allocation47_spill] sm:$0xff] %v16526_v51  ;;  %v17905_v4 = vand.u32 4294901760, %v16493_v19  ;;  %v16536_v41 = vsub.f32 %v393_v26, %v16526_v51  ;;  %v16541_v42 = vand.u32 4294901760, %v396_v45 }
  0x81   : > { %13686 = vmatprep.mubr.f32.mxu0 %v696_v57  ;;  %v755_v57 = vsub.f32 %v16496_v32, %v17906_v27  ;;  %v399_v48 = vsel %vm304_vm0, %v295_v35, 0  ;;  %v402_v24 = vsel %vm304_vm0, %v296_v53, 0  ;;  %v297_v27 = vmul.f32 %v16240_v50, %v16140_v6 }
  0x82   : > { %v745_v49 = vsub.f32 %v16493_v19, %v17905_v4  ;;  %17907 = vst [vmem:[#allocation48_spill] sm:$0xff] %v16541_v42  ;;  %v736_v30 = vand.u32 4294901760, %v735_v23  ;;  %v16546_v4 = vand.u32 4294901760, %v399_v48  ;;  %v16548_v47 = vand.u32 4294901760, %v402_v24 }
  0x83   : > { %v16551_v26 = vsub.f32 %v396_v45, %v16541_v42  ;;  %v298_v35 = vmul.f32 %v16245_v55, %v16143_v7  ;;  %v17910_v23 = vand.u32 4294901760, %v16510_v59  ;;  %v405_v6 = vsel %vm304_vm0, %v297_v27, 0 }
  0x84   : > { %13687 = vmatmul.mubr.f32.gmra.mrb[20].mxu0 %v706_v52  ;;  %17908 = vst [vmem:[#allocation49_spill] sm:$0xff] %v16546_v4  ;;  %17909 = vst [vmem:[#allocation50_spill] sm:$0xff] %v16548_v47  ;;  %v299_v52 = vmul.f32 %v16248_v56, %v16156_v12  ;;  %v16567_v45 = vsub.f32 %v402_v24, %v16548_v47  ;;  %v746_v7 = vand.u32 4294901760, %v745_v49  ;;  %v17911_v12 = vand.u32 4294901760, %v16524_v5 }
  0x85   : > { %13689 = vmatprep.mubr.f32.mxu0 %v716_v2  ;;  %v765_v53 = vsub.f32 %v16510_v59, %v17910_v23  ;;  %v16564_v2 = vsub.f32 %v399_v48, %v16546_v4  ;;  %v408_v50 = vsel %vm304_vm0, %v298_v35, 0  ;;  %v16575_v23 = vand.u32 4294901760, %v405_v6 }
  0x86   : > { %v775_v55 = vsub.f32 %v16524_v5, %v17911_v12  ;;  %v756_v48 = vand.u32 4294901760, %v755_v57  ;;  %v16577_v31 = vand.u32 4294901760, %v408_v50  ;;  %v411_v24 = vsel %vm304_vm0, %v299_v52, 0 }
  0x87   : > { %17912 = vst [vmem:[#allocation51_spill] sm:$0xff] %v16575_v23  ;;  %v300_v27 = vmul.f32 %v16273_v10, %v16159_v13  ;;  %v301_v35 = vmul.f32 %v16276_v11, %v16162_v14  ;;  %v766_v12 = vand.u32 4294901760, %v765_v53  ;;  %v17771_v56 = vand.u32 4294901760, %v16564_v2 }
  0x88   : > { %13690 = vmatmul.mubr.f32.gmra.mrb[22].mxu0 %v726_v3  ;;  %17913 = vst [vmem:[#allocation52_spill] sm:$0xff] %v16577_v31  ;;  %v17914_v3 = vand.u32 4294901760, %v16536_v41  ;;  %v776_v5 = vand.u32 4294901760, %v775_v55  ;;  %v17915_v52 = vand.u32 4294901760, %v16551_v26  ;;  %v16594_v10 = vsub.f32 %v405_v6, %v16575_v23 }
  0x89   : > { %13692 = vmatprep.mubr.f32.mxu0 %v736_v30  ;;  %v17770_v30 = vand.u32 4294901760, %v16567_v45  ;;  %v414_v57 = vsel %vm304_vm0, %v300_v27, 0  ;;  %v16599_v14 = vsub.f32 %v408_v50, %v16577_v31  ;;  %v417_v53 = vsel %vm304_vm0, %v301_v35, 0 }
  0x8a   : > { %v785_v49 = vsub.f32 %v16536_v41, %v17914_v3  ;;  %v795_v13 = vsub.f32 %v16551_v26, %v17915_v52  ;;  %17916 = vst [vmem:[#allocation53_spill] sm:$0xff] %v16594_v10  ;;  %v16596_v3 = vand.u32 4294901760, %v411_v24  ;;  %v16601_v11 = vand.u32 4294901760, %v414_v57 }
  0x8b   : > { %v303_v27 = vmul.f32 %v16328_v54, %v16231_v44  ;;  %v805_v6 = vsub.f32 %v16564_v2, %v17771_v56  ;;  %v815_v50 = vsub.f32 %v16567_v45, %v17770_v30  ;;  %v14884_v35 = vpack.c.bf16 %v16179_v22, %v16177_v21 }
  0x8c   : > { %13693 = vmatmul.mubr.f32.gmra.mrb[24].mxu0 %v746_v7  ;;  %17917 = vst [vmem:[#allocation54_spill] sm:$0xff] %v16596_v3  ;;  %17918 = vst [vmem:[#allocation55_spill] sm:$0xff] %v16601_v11  ;;  %v302_v7 = vmul.f32 %v16325_v18, %v16228_v43  ;;  %v786_v55 = vand.u32 4294901760, %v785_v49  ;;  %v796_v52 = vand.u32 4294901760, %v795_v13  ;;  %v17772_v43 = vand.u32 4294901760, %v16594_v10 }
  0x8d   : > { %13695 = vmatprep.mubr.f32.mxu0 %v756_v48  ;;  %v16619_v18 = vsub.f32 %v411_v24, %v16596_v3  ;;  %v16621_v44 = vand.u32 4294901760, %v417_v53  ;;  %v17775_v54 = vand.u32 4294901760, %v16599_v14  ;;  %v16625_v49 = vsub.f32 %v414_v57, %v16601_v11  ;;  %14885 = vmatprep.subr.bf16.mxu0 %v14884_v35 }
  0x8e   : > { %v420_v48 = vsel %vm304_vm0, %v302_v7, 0  ;;  %v423_v7 = vsel %vm304_vm0, %v303_v27, 0  ;;  %v825_v24 = vsub.f32 %v16594_v10, %v17772_v43  ;;  %v816_v57 = vand.u32 4294901760, %v815_v50 }
  0x8f   : > { %17919 = vst [vmem:[#allocation56_spill] sm:$0xff] %v16619_v18  ;;  %17920 = vst [vmem:[#allocation57_spill] sm:$0xff] %v16621_v44  ;;  %v16627_v30 = vand.u32 4294901760, %v420_v48  ;;  %v17776_v13 = vand.u32 4294901760, %v16619_v18  ;;  %v16637_v56 = vand.u32 4294901760, %v423_v7  ;;  %v835_v27 = vsub.f32 %v16599_v14, %v17775_v54 }
  0x90   : > { %13696 = vmatmul.mubr.f32.gmra.mrb[26].mxu0 %v766_v12  ;;  %v806_v12 = vand.u32 4294901760, %v805_v6  ;;  %v17782_v6 = vand.u32 4294901760, %v16625_v49  ;;  %v826_v43 = vand.u32 4294901760, %v825_v24 }
  0x91   : > { %13698 = vmatprep.mubr.f32.mxu0 %v776_v5  ;;  %17921 = vst [vmem:[#allocation58_spill] sm:$0xff] %v16627_v30  ;;  %v16635_v5 = vsub.f32 %v417_v53, %v16621_v44  ;;  %17922 = vst [vmem:[#allocation59_spill] sm:$0xff] %v16637_v56  ;;  %v845_v53 = vsub.f32 %v16619_v18, %v17776_v13  ;;  %v836_v50 = vand.u32 4294901760, %v835_v27 }
  0x92   : > { %v855_v54 = vsub.f32 %v16625_v49, %v17782_v6  ;;  %v17936_v6 = vld [vmem:[#allocation13_spill] sm:$0xff] }
  0x93   : > { %v17781_v10 = vand.u32 4294901760, %v16635_v5 }
  0x94   : > { %13699 = vmatmul.mubr.f32.gmra.mrb[28].mxu0 %v786_v55  ;;  %v16644_v55 = vsub.f32 %v420_v48, %v16627_v30  ;;  %v856_v18 = vand.u32 4294901760, %v855_v54  ;;  %v17925_v54 = vld [vmem:[#allocation37_spill] sm:$0xff] }
  0x95   : > { %13701 = vmatprep.mubr.f32.mxu0 %v796_v52  ;;  %v16651_v52 = vsub.f32 %v423_v7, %v16637_v56  ;;  %v865_v24 = vsub.f32 %v16635_v5, %v17781_v10  ;;  %v17935_v10 = vld [vmem:[#allocation12_spill] sm:$0xff] }
  0x96   : > { %v17780_v48 = vand.u32 4294901760, %v16644_v55 }
  0x97   : > { %v17779_v13 = vand.u32 4294901760, %v16651_v52 }
  0x98   : > { %13702 = vmatmul.mubr.f32.gmra.mrb[30].mxu0 %v806_v12  ;;  %v846_v12 = vand.u32 4294901760, %v845_v53  ;;  %v875_v7 = vsub.f32 %v16644_v55, %v17780_v48  ;;  %v17934_v48 = vld [vmem:[#allocation11_spill] sm:$0xff] }
  0x99   : > { %13704 = vmatprep.mubr.f32.mxu0 %v816_v57  ;;  %v866_v57 = vand.u32 4294901760, %v865_v24  ;;  %v885_v27 = vsub.f32 %v16651_v52, %v17779_v13  ;;  %v17928_v24 = vld [vmem:[#allocation45_spill] sm:$0xff]  ;;  %v17933_v13 = vld [vmem:[#allocation10_spill] sm:$0xff] }
  0x9b   : > { %v886_v53 = vand.u32 4294901760, %v885_v27  ;;  %v17931_v27 = vand.u32 4294901760, %v16179_v22  ;;  %v17940_v22 = vld [vmem:[#allocation17_spill] sm:$0xff] }
  0x9c   : > { %13705 = vmatmul.mubr.f32.gmra.mrb[32].mxu0 %v826_v43  ;;  %v876_v43 = vand.u32 4294901760, %v875_v7  ;;  %v17929_v7 = vld [vmem:[#allocation8_spill] sm:$0xff] }
  0x9d   : > { %13707 = vmatprep.mubr.f32.mxu0 %v836_v50  ;;  %v17926_v50 = vld [vmem:[#allocation40_spill] sm:$0xff] }
  0xa0   : > { %13708 = vmatmul.mubr.f32.gmra.mrb[34].mxu0 %v846_v12  ;;  %v17927_v12 = vld [vmem:[#allocation42_spill] sm:$0xff] }
  0xa1   : > { %13710 = vmatprep.mubr.f32.mxu0 %v856_v18  ;;  %v17924_v18 = vld [vmem:[#allocation36_spill] sm:$0xff] }
  0xa4   : > { %13711 = vmatmul.mubr.f32.gmra.mrb[36].mxu0 %v866_v57  ;;  %v17930_v57 = vand.u32 4294901760, %v16177_v21  ;;  %v17939_v21 = vld [vmem:[#allocation16_spill] sm:$0xff] }
  0xa5   : > { %13713 = vmatprep.mubr.f32.mxu0 %v876_v43 }
  0xa6   : > { %v14892_v43 = vpack.c.bf16 %v17931_v27, %v17930_v57  ;;  %v17941_v57 = vld [vmem:[#allocation18_spill] sm:$0xff]  ;;  %v17942_v27 = vld [vmem:[#allocation19_spill] sm:$0xff] }
  0xa8   : > { %13714 = vmatmul.mubr.f32.gmra.mrb[38].mxu0 %v886_v53  ;;  %v17932_v53 = vld [vmem:[#allocation9_spill] sm:$0xff] }
  0xa9   : > { %13720 = vmatprep.mubr.f32.mxu0 %v16149_v9 }
  0xac   : > { %13721 = vmatmul.mubr.f32.vlgmr.msra.gmra.mrb[0].mxu0 %v16166_v16 }
  0xad   : > { %13723 = vmatprep.mubr.f32.mxu0 %v16168_v17  ;;  %14887 = vmatpush3.bf16.msra.mxu0 %v14884_v35  ;;  %v17923_v35 = vld [vmem:[#allocation33_spill] sm:$0xff] }
  0xae   : > { %14889 = vmatprep.subr.bf16.mxu0 %v16164_v15 }
  0xb0   : > { %13724 = vmatmul.mubr.f32.gmra.mrb[2].mxu0 %v16175_v20 }
  0xb1   : > { %13726 = vmatprep.mubr.f32.mxu0 %v16201_v33 }
  0xb4   : > { %13727 = vmatmul.mubr.f32.gmra.mrb[4].mxu0 %v16203_v34 }
  0xb5   : > { %13729 = vmatprep.mubr.f32.mxu0 %v16260_v63 }
  0xb8   : > { %13730 = vmatmul.mubr.f32.gmra.mrb[6].mxu0 %v16262_v0 }
  0xb9   : > { %13732 = vmatprep.mubr.f32.mxu0 %v16284_v37 }
  0xbc   : > { %13733 = vmatmul.mubr.f32.gmra.mrb[8].mxu0 %v16286_v38 }
  0xbd   : > { %13735 = vmatprep.mubr.f32.mxu0 %v16288_v39 }
  0xc0   : > { %13736 = vmatmul.mubr.f32.gmra.mrb[10].mxu0 %v16290_v40 }
  0xc1   : > { %13738 = vmatprep.mubr.f32.mxu0 %v16316_v61 }
  0xc4   : > { %13739 = vmatmul.mubr.f32.gmra.mrb[12].mxu0 %v16318_v62 }
  0xc5   : > { %13741 = vmatprep.mubr.f32.mxu0 %v16357_v46 }
  0xc8   : > { %13742 = vmatmul.mubr.f32.gmra.mrb[14].mxu0 %v16359_v29 }
  0xc9   : > { %13744 = vmatprep.mubr.f32.mxu0 %v16378_v8  ;;  %v17964_v8 = vand.u32 4294901760, %v17936_v6 }
  0xcc   : > { %13745 = vmatmul.mubr.f32.gmra.mrb[16].mxu0 %v16385_v25  ;;  %v17963_v25 = vand.u32 4294901760, %v17935_v10 }
  0xcd   : > { %13747 = vmatprep.mubr.f32.mxu0 %v16387_v60  ;;  %v17962_v60 = vand.u32 4294901760, %v17934_v48 }
  0xd0   : > { %13748 = vmatmul.mubr.f32.gmra.mrb[18].mxu0 %v16392_v36  ;;  %v17961_v36 = vand.u32 4294901760, %v17933_v13 }
  0xd1   : > { %13750 = vmatprep.mubr.f32.mxu0 %v16422_v58  ;;  %v17960_v58 = vand.u32 4294901760, %v17932_v53 }
  0xd4   : > { %13751 = vmatmul.mubr.f32.gmra.mrb[20].mxu0 %v17923_v35  ;;  %v17959_v35 = vand.u32 4294901760, %v17929_v7 }
  0xd5   : > { %13753 = vmatprep.mubr.f32.mxu0 %v17924_v18  ;;  %v17958_v18 = vld [vmem:[#allocation56_spill] sm:$0xff] }
  0xd8   : > { %13754 = vmatmul.mubr.f32.gmra.mrb[22].mxu0 %v17925_v54  ;;  %v17957_v54 = vld [vmem:[#allocation53_spill] sm:$0xff] }
  0xd9   : > { %13756 = vmatprep.mubr.f32.mxu0 %v17926_v50  ;;  %v17956_v50 = vld [vmem:[#allocation46_spill] sm:$0xff] }
  0xdc   : > { %13757 = vmatmul.mubr.f32.gmra.mrb[24].mxu0 %v16477_v28  ;;  %v17955_v28 = vld [vmem:[#allocation43_spill] sm:$0xff] }
  0xdd   : > { %13759 = vmatprep.mubr.f32.mxu0 %v17927_v12  ;;  %v17954_v12 = vld [vmem:[#allocation39_spill] sm:$0xff] }
  0xe0   : > { %13760 = vmatmul.mubr.f32.gmra.mrb[26].mxu0 %v16485_v1  ;;  %v17953_v1 = vld [vmem:[#allocation38_spill] sm:$0xff] }
  0xe1   : > { %13762 = vmatprep.mubr.f32.mxu0 %v17928_v24  ;;  %v17952_v24 = vld [vmem:[#allocation35_spill] sm:$0xff] }
  0xe4   : > { %13763 = vmatmul.mubr.f32.gmra.mrb[28].mxu0 %v16526_v51  ;;  %v17951_v51 = vld [vmem:[#allocation34_spill] sm:$0xff] }
  0xe5   : > { %13765 = vmatprep.mubr.f32.mxu0 %v16541_v42  ;;  %v17950_v42 = vld [vmem:[#allocation31_spill] sm:$0xff] }
  0xe8   : > { %13766 = vmatmul.mubr.f32.gmra.mrb[30].mxu0 %v16546_v4  ;;  %v17949_v4 = vld [vmem:[#allocation30_spill] sm:$0xff] }
  0xe9   : > { %13768 = vmatprep.mubr.f32.mxu0 %v16548_v47  ;;  %v17948_v47 = vld [vmem:[#allocation29_spill] sm:$0xff] }
  0xec   : > { %13769 = vmatmul.mubr.f32.gmra.mrb[32].mxu0 %v16575_v23  ;;  %v17947_v23 = vld [vmem:[#allocation27_spill] sm:$0xff] }
  0xed   : > { %13771 = vmatprep.mubr.f32.mxu0 %v16577_v31  ;;  %v17946_v31 = vld [vmem:[#allocation23_spill] sm:$0xff] }
  0xf0   : > { %13772 = vmatmul.mubr.f32.gmra.mrb[34].mxu0 %v16596_v3  ;;  %v17945_v3 = vld [vmem:[#allocation22_spill] sm:$0xff] }
  0xf1   : > { %13774 = vmatprep.mubr.f32.mxu0 %v16601_v11  ;;  %v17944_v11 = vld [vmem:[#allocation21_spill] sm:$0xff] }
  0xf4   : > { %13775 = vmatmul.mubr.f32.gmra.mrb[36].mxu0 %v16621_v44  ;;  %v17943_v44 = vld [vmem:[#allocation20_spill] sm:$0xff] }
  0xf5   : > { %13777 = vmatprep.mubr.f32.mxu0 %v16627_v30  ;;  %v17938_v30 = vld [vmem:[#allocation15_spill] sm:$0xff] }
  0xf8   : > { %13778 = vmatmul.mubr.f32.gmra.mrb[38].mxu0 %v16637_v56  ;;  %v17937_v56 = vld [vmem:[#allocation14_spill] sm:$0xff] }
  0xf9   : > { %13784 = vmatprep.mubr.f32.mxu0 %v17929_v7  ;;  %v17977_v7 = vand.u32 4294901760, %v17949_v4 }
  0xfc   : > { %13785 = vmatmul.mubr.f32.vlgmr.msra.gmra.mrb[0].mxu0 %v17932_v53  ;;  %v18008_v53 = vld [vmem:[#allocation41_spill] sm:$0xff] }
  0xfd   : > { %13787 = vmatprep.mubr.f32.mxu0 %v17933_v13  ;;  %14891 = vmatpush3.bf16.msra.mxu0 %v16164_v15  ;;  %v17968_v13 = vand.u32 4294901760, %v17940_v22 }
  0xfe   : > { %14893 = vmatprep.subr.bf16.mxu0 %v14892_v43 }
 0x100   : > { %13788 = vmatmul.mubr.f32.gmra.mrb[2].mxu0 %v17934_v48  ;;  %v17976_v48 = vand.u32 4294901760, %v17948_v47 }
 0x101   : > { %13790 = vmatprep.mubr.f32.mxu0 %v17935_v10  ;;  %v17974_v10 = vand.u32 4294901760, %v17946_v31 }
 0x104   : > { %13791 = vmatmul.mubr.f32.gmra.mrb[4].mxu0 %v17936_v6  ;;  %v17975_v6 = vand.u32 4294901760, %v17947_v23 }
 0x105   : > { %13793 = vmatprep.mubr.f32.mxu0 %v17937_v56 }
 0x108   : > { %13794 = vmatmul.mubr.f32.gmra.mrb[6].mxu0 %v17938_v30 }
 0x109   : > { %13796 = vmatprep.mubr.f32.mxu0 %v17939_v21 }
 0x10c   : > { %13797 = vmatmul.mubr.f32.gmra.mrb[8].mxu0 %v17940_v22  ;;  %v18010_v22 = vld [vmem:[#allocation44_spill] sm:$0xff] }
 0x10d   : > { %13799 = vmatprep.mubr.f32.mxu0 %v17941_v57 }
 0x110   : > { %13800 = vmatmul.mubr.f32.gmra.mrb[10].mxu0 %v17942_v27 }
 0x111   : > { %13802 = vmatprep.mubr.f32.mxu0 %v17943_v44 }
 0x114   : > { %13803 = vmatmul.mubr.f32.gmra.mrb[12].mxu0 %v17944_v11 }
 0x115   : > { %13805 = vmatprep.mubr.f32.mxu0 %v17945_v3 }
 0x118   : > { %13806 = vmatmul.mubr.f32.gmra.mrb[14].mxu0 %v17946_v31  ;;  %v17981_v31 = vand.u32 4294901760, %v17953_v1 }
 0x119   : > { %13808 = vmatprep.mubr.f32.mxu0 %v17947_v23  ;;  %v17982_v23 = vand.u32 4294901760, %v17954_v12 }
 0x11c   : > { %13809 = vmatmul.mubr.f32.gmra.mrb[16].mxu0 %v17948_v47  ;;  %v17983_v47 = vand.u32 4294901760, %v17955_v28 }
 0x11d   : > { %13811 = vmatprep.mubr.f32.mxu0 %v17949_v4  ;;  %v17984_v4 = vand.u32 4294901760, %v16493_v19 }
 0x120   : > { %13812 = vmatmul.mubr.f32.gmra.mrb[18].mxu0 %v17950_v42 }
 0x121   : > { %13814 = vmatprep.mubr.f32.mxu0 %v17951_v51 }
 0x124   : > { %13815 = vmatmul.mubr.f32.gmra.mrb[20].mxu0 %v17952_v24 }
 0x125   : > { %13817 = vmatprep.mubr.f32.mxu0 %v17953_v1  ;;  %v17988_v1 = vand.u32 4294901760, %v16536_v41 }
 0x128   : > { %13818 = vmatmul.mubr.f32.gmra.mrb[22].mxu0 %v17954_v12  ;;  %v17989_v12 = vand.u32 4294901760, %v16551_v26 }
 0x129   : > { %13820 = vmatprep.mubr.f32.mxu0 %v17955_v28  ;;  %v17990_v28 = vand.u32 4294901760, %v16564_v2 }
 0x12c   : > { %13821 = vmatmul.mubr.f32.gmra.mrb[24].mxu0 %v16493_v19  ;;  %v17991_v19 = vand.u32 4294901760, %v16567_v45 }
 0x12d   : > { %13823 = vmatprep.mubr.f32.mxu0 %v16496_v32 }
 0x130   : > { %13824 = vmatmul.mubr.f32.gmra.mrb[26].mxu0 %v16510_v59 }
 0x131   : > { %13826 = vmatprep.mubr.f32.mxu0 %v17956_v50 }
 0x134   : > { %13827 = vmatmul.mubr.f32.gmra.mrb[28].mxu0 %v16536_v41  ;;  %v17995_v41 = vand.u32 4294901760, %v16625_v49 }
 0x135   : > { %13829 = vmatprep.mubr.f32.mxu0 %v16551_v26  ;;  %v17996_v26 = vand.u32 4294901760, %v16635_v5 }
 0x138   : > { %13830 = vmatmul.mubr.f32.gmra.mrb[30].mxu0 %v16564_v2  ;;  %v17997_v2 = vand.u32 4294901760, %v16644_v55 }
 0x139   : > { %13832 = vmatprep.mubr.f32.mxu0 %v16567_v45  ;;  %v17998_v45 = vand.u32 4294901760, %v16651_v52 }
 0x13c   : > { %13833 = vmatmul.mubr.f32.gmra.mrb[32].mxu0 %v17957_v54 }
 0x13d   : > { %13835 = vmatprep.mubr.f32.mxu0 %v16599_v14 }
 0x140   : > { %13836 = vmatmul.mubr.f32.gmra.mrb[34].mxu0 %v17958_v18 }
 0x141   : > { %13838 = vmatprep.mubr.f32.mxu0 %v16625_v49  ;;  %v18001_v49 = vld [vmem:[#allocation26_spill] sm:$0xff] }
 0x144   : > { %13839 = vmatmul.mubr.f32.gmra.mrb[36].mxu0 %v16635_v5  ;;  %v18002_v5 = vld [vmem:[#allocation28_spill] sm:$0xff] }
 0x145   : > { %13841 = vmatprep.mubr.f32.mxu0 %v16644_v55  ;;  %v18003_v55 = vld [vmem:[#allocation32_spill] sm:$0xff] }
 0x148   : > { %13842 = vmatmul.mubr.f32.gmra.mrb[38].mxu0 %v16651_v52  ;;  %v18004_v52 = vld [vmem:[#allocation33_spill] sm:$0xff] }
 0x149   : > { %13848 = vmatprep.mubr.f32.mxu0 %v17959_v35  ;;  %v17965_v35 = vand.u32 4294901760, %v17937_v56  ;;  %v17972_v56 = vand.u32 4294901760, %v17944_v11  ;;  %v17979_v11 = vand.u32 4294901760, %v17951_v51  ;;  %v17986_v51 = vand.u32 4294901760, %v16510_v59 }
 0x14a   : > { %v17993_v59 = vand.u32 4294901760, %v16599_v14  ;;  %v18000_v14 = vld [vmem:[#allocation25_spill] sm:$0xff] }
 0x14c   : > { %13849 = vmatmul.mubr.f32.vlgmr.msra.gmra.mrb[0].mxu0 %v17960_v58  ;;  %v17966_v58 = vand.u32 4294901760, %v17938_v30  ;;  %v17973_v30 = vand.u32 4294901760, %v17945_v3  ;;  %v17980_v3 = vand.u32 4294901760, %v17952_v24  ;;  %v17987_v24 = vand.u32 4294901760, %v17956_v50 }
 0x14d   : > { %13851 = vmatprep.mubr.f32.mxu0 %v17961_v36  ;;  %14895 = vmatpush3.bf16.msra.mxu0 %v14892_v43  ;;  %v17967_v36 = vand.u32 4294901760, %v17939_v21  ;;  %v17994_v50 = vand.u32 4294901760, %v17958_v18  ;;  %v18005_v18 = vld [vmem:[#allocation36_spill] sm:$0xff]  ;;  %v18009_v21 = vld [vmem:[#allocation42_spill] sm:$0xff] }
 0x14e   : > { %14897 = vmatprep.subr.bf16.mxu0 %v16164_v15  ;;  %v18007_v43 = vld [vmem:[#allocation40_spill] sm:$0xff] }
 0x150   : > { %13852 = vmatmul.mubr.f32.gmra.mrb[2].mxu0 %v17962_v60  ;;  %v17969_v60 = vand.u32 4294901760, %v17941_v57  ;;  %v18011_v57 = vld [vmem:[#allocation45_spill] sm:$0xff] }
 0x151   : > { %13854 = vmatprep.mubr.f32.mxu0 %v17963_v25  ;;  %v17970_v25 = vand.u32 4294901760, %v17942_v27  ;;  %v18012_v27 = vld [vmem:[#allocation47_spill] sm:$0xff] }
 0x154   : > { %13855 = vmatmul.mubr.f32.gmra.mrb[4].mxu0 %v17964_v8  ;;  %v17971_v8 = vand.u32 4294901760, %v17943_v44  ;;  %v17978_v44 = vand.u32 4294901760, %v17950_v42  ;;  %v17985_v42 = vand.u32 4294901760, %v16496_v32  ;;  %v17992_v32 = vand.u32 4294901760, %v17957_v54  ;;  %v18006_v54 = vld [vmem:[#allocation37_spill] sm:$0xff] }
 0x155   : > { %13857 = vmatprep.mubr.f32.mxu0 %v17965_v35  ;;  %v18013_v35 = vld [vmem:[#allocation48_spill] sm:$0xff] }
 0x158   : > { %13858 = vmatmul.mubr.f32.gmra.mrb[6].mxu0 %v17966_v58  ;;  %v18014_v58 = vld [vmem:[#allocation49_spill] sm:$0xff] }
 0x159   : > { %13860 = vmatprep.mubr.f32.mxu0 %v17967_v36  ;;  %v18015_v36 = vld [vmem:[#allocation50_spill] sm:$0xff] }
 0x15c   : > { %13861 = vmatmul.mubr.f32.gmra.mrb[8].mxu0 %v17968_v13  ;;  %v18016_v13 = vld [vmem:[#allocation51_spill] sm:$0xff] }
 0x15d   : > { %13863 = vmatprep.mubr.f32.mxu0 %v17969_v60  ;;  %v18017_v60 = vld [vmem:[#allocation52_spill] sm:$0xff] }
 0x160   : > { %13864 = vmatmul.mubr.f32.gmra.mrb[10].mxu0 %v17970_v25  ;;  %v18018_v25 = vld [vmem:[#allocation54_spill] sm:$0xff] }
 0x161   : > { %13866 = vmatprep.mubr.f32.mxu0 %v17971_v8  ;;  %v18019_v8 = vld [vmem:[#allocation55_spill] sm:$0xff] }
 0x164   : > { %13867 = vmatmul.mubr.f32.gmra.mrb[12].mxu0 %v17972_v56  ;;  %v18020_v56 = vld [vmem:[#allocation57_spill] sm:$0xff] }
 0x165   : > { %13869 = vmatprep.mubr.f32.mxu0 %v17973_v30  ;;  %v18021_v30 = vld [vmem:[#allocation58_spill] sm:$0xff] }
 0x168   : > { %13870 = vmatmul.mubr.f32.gmra.mrb[14].mxu0 %v17974_v10  ;;  %v18022_v10 = vld [vmem:[#allocation59_spill] sm:$0xff] }
 0x169   : > { %13872 = vmatprep.mubr.f32.mxu0 %v17975_v6 }
 0x16c   : > { %13873 = vmatmul.mubr.f32.gmra.mrb[16].mxu0 %v17976_v48 }
 0x16d   : > { %13875 = vmatprep.mubr.f32.mxu0 %v17977_v7 }
 0x170   : > { %13876 = vmatmul.mubr.f32.gmra.mrb[18].mxu0 %v17978_v44 }
 0x171   : > { %13878 = vmatprep.mubr.f32.mxu0 %v17979_v11 }
 0x174   : > { %13879 = vmatmul.mubr.f32.gmra.mrb[20].mxu0 %v17980_v3 }
 0x175   : > { %13881 = vmatprep.mubr.f32.mxu0 %v17981_v31 }
 0x178   : > { %13882 = vmatmul.mubr.f32.gmra.mrb[22].mxu0 %v17982_v23 }
 0x179   : > { %13884 = vmatprep.mubr.f32.mxu0 %v17983_v47 }
 0x17c   : > { %13885 = vmatmul.mubr.f32.gmra.mrb[24].mxu0 %v17984_v4 }
 0x17d   : > { %13887 = vmatprep.mubr.f32.mxu0 %v17985_v42 }
 0x180   : > { %13888 = vmatmul.mubr.f32.gmra.mrb[26].mxu0 %v17986_v51 }
 0x181   : > { %13890 = vmatprep.mubr.f32.mxu0 %v17987_v24 }
 0x184   : > { %13891 = vmatmul.mubr.f32.gmra.mrb[28].mxu0 %v17988_v1 }
 0x185   : > { %13893 = vmatprep.mubr.f32.mxu0 %v17989_v12 }
 0x188   : > { %13894 = vmatmul.mubr.f32.gmra.mrb[30].mxu0 %v17990_v28 }
 0x189   : > { %13896 = vmatprep.mubr.f32.mxu0 %v17991_v19 }
 0x18c   : > { %13897 = vmatmul.mubr.f32.gmra.mrb[32].mxu0 %v17992_v32 }
 0x18d   : > { %13899 = vmatprep.mubr.f32.mxu0 %v17993_v59 }
 0x190   : > { %13900 = vmatmul.mubr.f32.gmra.mrb[34].mxu0 %v17994_v50 }
 0x191   : > { %13902 = vmatprep.mubr.f32.mxu0 %v17995_v41 }
 0x194   : > { %13903 = vmatmul.mubr.f32.gmra.mrb[36].mxu0 %v17996_v26 }
 0x195   : > { %13905 = vmatprep.mubr.f32.mxu0 %v17997_v2 }
 0x198   : > { %13906 = vmatmul.mubr.f32.gmra.mrb[38].mxu0 %v17998_v45 }
 0x199   : > { %13912 = vmatprep.mubr.f32.mxu0 %v16149_v9 }
 0x19c   : > { %13913 = vmatmul.mubr.f32.vlgmr.msra.gmra.mrb[0].mxu0 %v16166_v16 }
 0x19d   : > { %13915 = vmatprep.mubr.f32.mxu0 %v16168_v17  ;;  %14899 = vmatpush3.bf16.msra.mxu0 %v16164_v15  ;;  %v17999_v15 = vld [vmem:[#allocation24_spill] sm:$0xff] }
 0x1a0   : > { %13916 = vmatmul.mubr.f32.gmra.mrb[2].mxu0 %v16175_v20 }
 0x1a1   : > { %13918 = vmatprep.mubr.f32.mxu0 %v16201_v33 }
 0x1a4   : > { %13919 = vmatmul.mubr.f32.gmra.mrb[4].mxu0 %v16203_v34 }
 0x1a5   : > { %13921 = vmatprep.mubr.f32.mxu0 %v16260_v63 }
 0x1a8   : > { %13922 = vmatmul.mubr.f32.gmra.mrb[6].mxu0 %v16262_v0 }
 0x1a9   : > { %13924 = vmatprep.mubr.f32.mxu0 %v16284_v37 }
 0x1ac   : > { %13925 = vmatmul.mubr.f32.gmra.mrb[8].mxu0 %v16286_v38 }
 0x1ad   : > { %13927 = vmatprep.mubr.f32.mxu0 %v16288_v39 }
 0x1b0   : > { %13928 = vmatmul.mubr.f32.gmra.mrb[10].mxu0 %v16290_v40 }
 0x1b1   : > { %13930 = vmatprep.mubr.f32.mxu0 %v16316_v61 }
 0x1b4   : > { %13931 = vmatmul.mubr.f32.gmra.mrb[12].mxu0 %v16318_v62 }
 0x1b5   : > { %13933 = vmatprep.mubr.f32.mxu0 %v16357_v46 }
 0x1b8   : > { %13934 = vmatmul.mubr.f32.gmra.mrb[14].mxu0 %v16359_v29 }
 0x1b9   : > { %13936 = vmatprep.mubr.f32.mxu0 %v17999_v15 }
 0x1bc   : > { %13937 = vmatmul.mubr.f32.gmra.mrb[16].mxu0 %v18000_v14 }
 0x1bd   : > { %13939 = vmatprep.mubr.f32.mxu0 %v18001_v49 }
 0x1c0   : > { %13940 = vmatmul.mubr.f32.gmra.mrb[18].mxu0 %v18002_v5 }
 0x1c1   : > { %13942 = vmatprep.mubr.f32.mxu0 %v18003_v55 }
 0x1c4   : > { %13943 = vmatmul.mubr.f32.gmra.mrb[20].mxu0 %v18004_v52 }
 0x1c5   : > { %13945 = vmatprep.mubr.f32.mxu0 %v18005_v18 }
 0x1c8   : > { %13946 = vmatmul.mubr.f32.gmra.mrb[22].mxu0 %v18006_v54 }
 0x1c9   : > { %13948 = vmatprep.mubr.f32.mxu0 %v18007_v43 }
 0x1cc   : > { %13949 = vmatmul.mubr.f32.gmra.mrb[24].mxu0 %v18008_v53 }
 0x1cd   : > { %13951 = vmatprep.mubr.f32.mxu0 %v18009_v21 }
 0x1d0   : > { %13952 = vmatmul.mubr.f32.gmra.mrb[26].mxu0 %v18010_v22 }
 0x1d1   : > { %13954 = vmatprep.mubr.f32.mxu0 %v18011_v57 }
 0x1d4   : > { %13955 = vmatmul.mubr.f32.gmra.mrb[28].mxu0 %v18012_v27 }
 0x1d5   : > { %13957 = vmatprep.mubr.f32.mxu0 %v18013_v35 }
 0x1d8   : > { %13958 = vmatmul.mubr.f32.gmra.mrb[30].mxu0 %v18014_v58 }
 0x1d9   : > { %13960 = vmatprep.mubr.f32.mxu0 %v18015_v36 }
 0x1dc   : > { %13961 = vmatmul.mubr.f32.gmra.mrb[32].mxu0 %v18016_v13 }
 0x1dd   : > { %13963 = vmatprep.mubr.f32.mxu0 %v18017_v60 }
 0x1e0   : > { %13964 = vmatmul.mubr.f32.gmra.mrb[34].mxu0 %v18018_v25 }
 0x1e1   : > { %13966 = vmatprep.mubr.f32.mxu0 %v18019_v8 }
 0x1e4   : > { %13967 = vmatmul.mubr.f32.gmra.mrb[36].mxu0 %v18020_v56 }
 0x1e5   : > { %13969 = vmatprep.mubr.f32.mxu0 %v18021_v30 }
 0x1e8   : > { %13970 = vmatmul.mubr.f32.gmra.mrb[38].mxu0 %v18022_v10 }
 0x1e9   : > { %13976 = vmatprep.mubr.f32.mxu0 %v16149_v9  ;;  %v278_v9 = vld [vmem:[%s17684_s3] sm:$0xff] }
 0x1ec   : > { %13977 = vmatmul.mubr.f32.vlgmr.msra.gmra.mrb[0].mxu0 %v16166_v16  ;;  %v2562_v16 = vsel %vm304_vm0, %v278_v9, 0 }
 0x1ed   : > { %13979 = vmatprep.mubr.f32.mxu0 %v16168_v17  ;;  %v16919_v17 = vand.u32 4294901760, %v2562_v16 }
 0x1f0   : > { %13980 = vmatmul.mubr.f32.gmra.mrb[2].mxu0 %v16175_v20  ;;  %v16922_v20 = vsub.f32 %v2562_v16, %v16919_v17 }
 0x1f1   : > { %13982 = vmatprep.mubr.f32.mxu0 %v16201_v33 }
 0x1f4   : > { %13983 = vmatmul.mubr.f32.gmra.mrb[4].mxu0 %v16203_v34 }
 0x1f5   : > { %13985 = vmatprep.mubr.f32.mxu0 %v16260_v63  ;;  %v279_v63 = vld [vmem:[%s17684_s3 + $0x8] sm:$0xff] }
 0x1f8   : > { %13986 = vmatmul.mubr.f32.gmra.mrb[6].mxu0 %v16262_v0  ;;  %v2565_v0 = vsel %vm304_vm0, %v279_v63, 0 }
 0x1f9   : > { %13988 = vmatprep.mubr.f32.mxu0 %v16284_v37  ;;  %v16936_v37 = vand.u32 4294901760, %v2565_v0 }
 0x1fc   : > { %13989 = vmatmul.mubr.f32.gmra.mrb[8].mxu0 %v16286_v38  ;;  %v16939_v38 = vsub.f32 %v2565_v0, %v16936_v37 }
 0x1fd   : > { %13991 = vmatprep.mubr.f32.mxu0 %v16288_v39 }
 0x1fe   : > { %v16942_v39 = vand.u32 4294901760, %v16939_v38 }
 0x200   : > { %13992 = vmatmul.mubr.f32.gmra.mrb[10].mxu0 %v16290_v40  ;;  %v2647_v6 = vsub.f32 %v16939_v38, %v16942_v39 }
 0x201   : > { %13994 = vmatprep.mubr.f32.mxu0 %v16316_v61 }
 0x202   : > { %v16949_v42 = vand.u32 4294901760, %v2647_v6 }
 0x204   : > { %13995 = vmatmul.mubr.f32.gmra.mrb[12].mxu0 %v16318_v62 }
 0x205   : > { %13997 = vmatprep.mubr.f32.mxu0 %v16357_v46 }
 0x208   : > { %13998 = vmatmul.mubr.f32.gmra.mrb[14].mxu0 %v16359_v29  ;;  %v16925_v29 = vand.u32 4294901760, %v16922_v20 }
 0x209   : > { %14000 = vmatprep.mubr.f32.mxu0 %v17999_v15 }
 0x20a   : > { %v2637_v33 = vsub.f32 %v16922_v20, %v16925_v29 }
 0x20c   : > { %14001 = vmatmul.mubr.f32.gmra.mrb[16].mxu0 %v18000_v14  ;;  %v16929_v34 = vand.u32 4294901760, %v2637_v33 }
 0x20d   : > { %14003 = vmatprep.mubr.f32.mxu0 %v18001_v49 }
 0x20e   : > { %14040 = vmatprep.mubr.f32.mxu1 %v16929_v34 }
 0x210   : > { %14004 = vmatmul.mubr.f32.gmra.mrb[18].mxu0 %v18002_v5 }
 0x211   : > { %14006 = vmatprep.mubr.f32.mxu0 %v18003_v55 }
 0x214   : > { %14007 = vmatmul.mubr.f32.gmra.mrb[20].mxu0 %v18004_v52 }
 0x215   : > { %14009 = vmatprep.mubr.f32.mxu0 %v18005_v18 }
 0x218   : > { %14010 = vmatmul.mubr.f32.gmra.mrb[22].mxu0 %v18006_v54 }
 0x219   : > { %14012 = vmatprep.mubr.f32.mxu0 %v18007_v43 }
 0x21c   : > { %14013 = vmatmul.mubr.f32.gmra.mrb[24].mxu0 %v18008_v53 }
 0x21d   : > { %14015 = vmatprep.mubr.f32.mxu0 %v18009_v21 }
 0x220   : > { %14016 = vmatmul.mubr.f32.gmra.mrb[26].mxu0 %v18010_v22 }
 0x221   : > { %14018 = vmatprep.mubr.f32.mxu0 %v18011_v57 }
 0x224   : > { %14019 = vmatmul.mubr.f32.gmra.mrb[28].mxu0 %v18012_v27 }
 0x225   : > { %14021 = vmatprep.mubr.f32.mxu0 %v18013_v35 }
 0x228   : > { %14022 = vmatmul.mubr.f32.gmra.mrb[30].mxu0 %v18014_v58 }
 0x229   : > { %14024 = vmatprep.mubr.f32.mxu0 %v18015_v36 }
 0x22c   : > { %14025 = vmatmul.mubr.f32.gmra.mrb[32].mxu0 %v18016_v13 }
 0x22d   : > { %14027 = vmatprep.mubr.f32.mxu0 %v18017_v60 }
 0x230   : > { %14028 = vmatmul.mubr.f32.gmra.mrb[34].mxu0 %v18018_v25 }
 0x231   : > { %14030 = vmatprep.mubr.f32.mxu0 %v18019_v8 }
 0x234   : > { %14031 = vmatmul.mubr.f32.gmra.mrb[36].mxu0 %v18020_v56 }
 0x235   : > { %14033 = vmatprep.mubr.f32.mxu0 %v18021_v30 }
 0x238   : > { %14034 = vmatmul.mubr.f32.gmra.mrb[38].mxu0 %v18022_v10 }
 0x2bf   : > { %v13978_v40 = vpop.f32.mrb[0].mxu0 }
 0x2c0   : > { %v2571_v61 = vand.u32 4294901760, %v13978_v40  ;;  %v2323_v62 = vpop.f32.mrb[1].mxu0 }
 0x2c1   : > { %v2568_v46 = vand.u32 4294901760, %v2323_v62 }
 0x2c2   : > { %v2663_v48 = vsub.f32 %v13978_v40, %v2571_v61 }
 0x2c3   : > { %v16946_v7 = vpack.c.bf16 %v2571_v61, %v2568_v46  ;;  %v2656_v44 = vsub.f32 %v2323_v62, %v2568_v46  ;;  %v13981_v11 = vpop.f32.mrb[2].mxu0 }
 0x2c4   : > { %v2664_v3 = vand.u32 4294901760, %v2663_v48  ;;  %v5129_v31 = vand.u32 4294901760, %v13981_v11  ;;  %v2335_v23 = vpop.f32.mrb[3].mxu0 }
 0x2c5   : > { %v2657_v47 = vand.u32 4294901760, %v2656_v44  ;;  %v5126_v4 = vand.u32 4294901760, %v2335_v23  ;;  %14901 = vmatprep.subr.bf16.mxu1 %v16946_v7  ;;  %v14908_v51 = vpack.c.bf16 %v2663_v48, %v2656_v44 }
 0x2c6   : > { %v2665_v24 = vsub.f32 %v2663_v48, %v2664_v3  ;;  %v5221_v1 = vsub.f32 %v13981_v11, %v5129_v31  ;;  %14903 = vmatpush3.bf16.msra.mxu1 %v16946_v7 }
 0x2c7   : > { %v2658_v12 = vsub.f32 %v2656_v44, %v2657_v47  ;;  %v16952_v28 = vpack.c.bf16 %v5129_v31, %v5126_v4  ;;  %v5214_v19 = vsub.f32 %v2335_v23, %v5126_v4  ;;  %v13984_v32 = vpop.f32.mrb[4].mxu0  ;;  %v16954_v59 = vpack.c.bf16 %v2664_v3, %v2657_v47 }
 0x2c8   : > { %v5222_v50 = vand.u32 4294901760, %v5221_v1  ;;  %v7687_v41 = vand.u32 4294901760, %v13984_v32  ;;  %v2347_v26 = vpop.f32.mrb[5].mxu0  ;;  %v2666_v2 = vand.u32 4294901760, %v2665_v24 }
 0x2c9   : > { %v5215_v45 = vand.u32 4294901760, %v5214_v19  ;;  %v7684_v15 = vand.u32 4294901760, %v2347_v26  ;;  %14041 = vmatmul.mubr.f32.vlgmr.msra.gmra.mrb[0].mxu1 %v16949_v42  ;;  %v2659_v14 = vand.u32 4294901760, %v2658_v12  ;;  %v16957_v49 = vpack.c.bf16 %v5221_v1, %v5214_v19 }
 0x2ca   : > { %v5223_v5 = vsub.f32 %v5221_v1, %v5222_v50  ;;  %v7779_v55 = vsub.f32 %v13984_v32, %v7687_v41  ;;  %14047 = vmatprep.mubr.f32.mxu1 %v16919_v17 }
 0x2cb   : > { %v5216_v52 = vsub.f32 %v5214_v19, %v5215_v45  ;;  %v16960_v18 = vpack.c.bf16 %v7687_v41, %v7684_v15  ;;  %v7772_v54 = vsub.f32 %v2347_v26, %v7684_v15  ;;  %v13987_v43 = vpop.f32.mrb[6].mxu0  ;;  %v14904_v53 = vpack.c.bf16 %v2666_v2, %v2659_v14 }
 0x2cc   : > { %v7780_v21 = vand.u32 4294901760, %v7779_v55  ;;  %v10245_v22 = vand.u32 4294901760, %v13987_v43  ;;  %v2359_v57 = vpop.f32.mrb[7].mxu0  ;;  %v5224_v27 = vand.u32 4294901760, %v5223_v5  ;;  %v16962_v35 = vpack.c.bf16 %v5222_v50, %v5215_v45 }
 0x2cd   : > { %18023 = vst [vmem:[#allocation8_spill] sm:$0xff] %v16960_v18  ;;  %v7773_v58 = vand.u32 4294901760, %v7772_v54  ;;  %v10242_v36 = vand.u32 4294901760, %v2359_v57  ;;  %14905 = vmatprep.subr.bf16.mxu1 %v14904_v53  ;;  %v5217_v13 = vand.u32 4294901760, %v5216_v52  ;;  %v16964_v60 = vpack.c.bf16 %v7779_v55, %v7772_v54 }
 0x2ce   : > { %v7781_v25 = vsub.f32 %v7779_v55, %v7780_v21  ;;  %v10337_v8 = vsub.f32 %v13987_v43, %v10245_v22  ;;  %14907 = vmatpush3.bf16.msra.mxu1 %v14904_v53 }
 0x2cf   : > { %18024 = vst [vmem:[#allocation9_spill] sm:$0xff] %v16964_v60  ;;  %v7774_v56 = vsub.f32 %v7772_v54, %v7773_v58  ;;  %v16966_v30 = vpack.c.bf16 %v10245_v22, %v10242_v36  ;;  %v10330_v10 = vsub.f32 %v2359_v57, %v10242_v36  ;;  %v13990_v9 = vpop.f32.mrb[8].mxu0  ;;  %14909 = vmatprep.subr.bf16.mxu1 %v14908_v51 }
 0x2d0   : > { %v16968_v16 = vpack.c.bf16 %v5224_v27, %v5217_v13  ;;  %v10338_v33 = vand.u32 4294901760, %v10337_v8  ;;  %v3073_v63 = vand.u32 4294901760, %v13990_v9  ;;  %v2371_v0 = vpop.f32.mrb[9].mxu0  ;;  %v7782_v40 = vand.u32 4294901760, %v7781_v25 }
 0x2d1   : > { %18025 = vst [vmem:[#allocation10_spill] sm:$0xff] %v16966_v30  ;;  %v16970_v61 = vpack.c.bf16 %v7780_v21, %v7773_v58  ;;  %v10331_v62 = vand.u32 4294901760, %v10330_v10  ;;  %v3070_v46 = vand.u32 4294901760, %v2371_v0  ;;  %14048 = vmatmul.mubr.f32.vlgmr.msra.gmra.mrb[0].mxu1 %v16936_v37  ;;  %v7775_v6 = vand.u32 4294901760, %v7774_v56 }
 0x2d2   : > { %v16973_v48 = vpack.c.bf16 %v10337_v8, %v10330_v10  ;;  %v10339_v44 = vsub.f32 %v10337_v8, %v10338_v33  ;;  %v3165_v11 = vsub.f32 %v13990_v9, %v3073_v63  ;;  %14911 = vmatpush3.bf16.msra.mxu1 %v14908_v51  ;;  %14054 = vmatprep.mubr.f32.mxu1 %v16922_v20 }
 0x2d3   : > { %18026 = vst [vmem:[#allocation11_spill] sm:$0xff] %v16970_v61  ;;  %v10332_v3 = vsub.f32 %v10330_v10, %v10331_v62  ;;  %v16976_v31 = vpack.c.bf16 %v3073_v63, %v3070_v46  ;;  %v3158_v23 = vsub.f32 %v2371_v0, %v3070_v46  ;;  %v13993_v47 = vpop.f32.mrb[10].mxu0  ;;  %14913 = vmatprep.subr.bf16.mxu1 %v16946_v7 }
 0x2d4   : > { %18027 = vst [vmem:[#allocation12_spill] sm:$0xff] %v16973_v48  ;;  %v16979_v4 = vpack.c.bf16 %v7782_v40, %v7775_v6  ;;  %v3166_v24 = vand.u32 4294901760, %v3165_v11  ;;  %v5631_v1 = vand.u32 4294901760, %v13993_v47  ;;  %v2383_v12 = vpop.f32.mrb[11].mxu0  ;;  %v10340_v19 = vand.u32 4294901760, %v10339_v44 }
 0x2d5   : > { %v16981_v32 = vpack.c.bf16 %v10338_v33, %v10331_v62  ;;  %v3159_v50 = vand.u32 4294901760, %v3158_v23  ;;  %v5628_v41 = vand.u32 4294901760, %v2383_v12  ;;  %v16983_v51 = vpack.c.bf16 %v3165_v11, %v3158_v23 }
 0x2d6   : > { %18028 = vst [vmem:[#allocation13_spill] sm:$0xff] %v16979_v4  ;;  %v10333_v26 = vand.u32 4294901760, %v10332_v3  ;;  %v3167_v2 = vsub.f32 %v3165_v11, %v3166_v24  ;;  %v5723_v45 = vsub.f32 %v13993_v47, %v5631_v1 }
 0x2d7   : > { %18029 = vst [vmem:[#allocation14_spill] sm:$0xff] %v16981_v32  ;;  %v3160_v15 = vsub.f32 %v3158_v23, %v3159_v50  ;;  %v16985_v14 = vpack.c.bf16 %v5631_v1, %v5628_v41  ;;  %v5716_v5 = vsub.f32 %v2383_v12, %v5628_v41  ;;  %v13996_v55 = vpop.f32.mrb[12].mxu0  ;;  %v16987_v52 = vpack.c.bf16 %v3166_v24, %v3159_v50 }
 0x2d8   : > { %v5724_v54 = vand.u32 4294901760, %v5723_v45  ;;  %v8189_v43 = vand.u32 4294901760, %v13996_v55  ;;  %v2395_v53 = vpop.f32.mrb[13].mxu0  ;;  %v3168_v21 = vand.u32 4294901760, %v3167_v2  ;;  %v16989_v22 = vpack.c.bf16 %v10340_v19, %v10333_v26 }
 0x2d9   : > { %v5717_v57 = vand.u32 4294901760, %v5716_v5  ;;  %v8186_v27 = vand.u32 4294901760, %v2395_v53  ;;  %14055 = vmatmul.mubr.f32.vlgmr.msra.gmra.mrb[0].mxu1 %v16939_v38  ;;  %v3161_v58 = vand.u32 4294901760, %v3160_v15  ;;  %v16992_v36 = vpack.c.bf16 %v5723_v45, %v5716_v5 }
 0x2da   : > { %18030 = vst [vmem:[#allocation15_spill] sm:$0xff] %v16989_v22  ;;  %v5725_v13 = vsub.f32 %v5723_v45, %v5724_v54  ;;  %v8281_v25 = vsub.f32 %v13996_v55, %v8189_v43  ;;  %14915 = vmatpush3.bf16.msra.mxu1 %v16946_v7  ;;  %14061 = vmatprep.mubr.f32.mxu1 %v16925_v29 }
 0x2db   : > { %v5718_v8 = vsub.f32 %v5716_v5, %v5717_v57  ;;  %v16996_v56 = vpack.c.bf16 %v8189_v43, %v8186_v27  ;;  %v8274_v10 = vsub.f32 %v2395_v53, %v8186_v27  ;;  %14917 = vmatprep.subr.bf16.mxu1 %v16954_v59  ;;  %v13999_v9 = vpop.f32.mrb[14].mxu0  ;;  %v16999_v33 = vpack.c.bf16 %v3168_v21, %v3161_v58 }
 0x2dc   : > { %v8282_v63 = vand.u32 4294901760, %v8281_v25  ;;  %v10747_v0 = vand.u32 4294901760, %v13999_v9  ;;  %v2407_v40 = vpop.f32.mrb[15].mxu0  ;;  %v5726_v62 = vand.u32 4294901760, %v5725_v13  ;;  %v17001_v46 = vpack.c.bf16 %v5724_v54, %v5717_v57 }
 0x2dd   : > { %18031 = vst [vmem:[#allocation16_spill] sm:$0xff] %v16996_v56  ;;  %v8275_v6 = vand.u32 4294901760, %v8274_v10  ;;  %v10744_v44 = vand.u32 4294901760, %v2407_v40  ;;  %v5719_v11 = vand.u32 4294901760, %v5718_v8  ;;  %v17003_v3 = vpack.c.bf16 %v8281_v25, %v8274_v10 }
 0x2de   : > { %v8283_v23 = vsub.f32 %v8281_v25, %v8282_v63  ;;  %v10839_v47 = vsub.f32 %v13999_v9, %v10747_v0 }
 0x2df   : > { %18032 = vst [vmem:[#allocation17_spill] sm:$0xff] %v17003_v3  ;;  %v8276_v24 = vsub.f32 %v8274_v10, %v8275_v6  ;;  %v17005_v1 = vpack.c.bf16 %v10747_v0, %v10744_v44  ;;  %v10832_v12 = vsub.f32 %v2407_v40, %v10744_v44  ;;  %v14002_v19 = vpop.f32.mrb[16].mxu0  ;;  %v17007_v50 = vpack.c.bf16 %v5726_v62, %v5719_v11 }
 0x2e0   : > { %v10840_v41 = vand.u32 4294901760, %v10839_v47  ;;  %v3575_v26 = vand.u32 4294901760, %v14002_v19  ;;  %v2419_v2 = vpop.f32.mrb[17].mxu0  ;;  %v8284_v45 = vand.u32 4294901760, %v8283_v23  ;;  %v17009_v15 = vpack.c.bf16 %v8282_v63, %v8275_v6 }
 0x2e1   : > { %18033 = vst [vmem:[#allocation18_spill] sm:$0xff] %v17005_v1  ;;  %v10833_v5 = vand.u32 4294901760, %v10832_v12  ;;  %v3572_v55 = vand.u32 4294901760, %v2419_v2  ;;  %14062 = vmatmul.mubr.f32.vlgmr.msra.gmra.mrb[0].mxu1 %v16942_v39  ;;  %v8277_v54 = vand.u32 4294901760, %v8276_v24  ;;  %v17012_v43 = vpack.c.bf16 %v10839_v47, %v10832_v12 }
 0x2e2   : > { %18034 = vst [vmem:[#allocation19_spill] sm:$0xff] %v17009_v15  ;;  %v10841_v53 = vsub.f32 %v10839_v47, %v10840_v41  ;;  %v3667_v21 = vsub.f32 %v14002_v19, %v3575_v26  ;;  %14919 = vmatpush3.bf16.msra.mxu1 %v16954_v59  ;;  %14068 = vmatprep.mubr.f32.mxu1 %v16919_v17 }
 0x2e3   : > { %18035 = vst [vmem:[#allocation20_spill] sm:$0xff] %v17012_v43  ;;  %v10834_v57 = vsub.f32 %v10832_v12, %v10833_v5  ;;  %v17016_v27 = vpack.c.bf16 %v3575_v26, %v3572_v55  ;;  %v3660_v58 = vsub.f32 %v2419_v2, %v3572_v55  ;;  %14921 = vmatprep.subr.bf16.mxu1 %v16946_v7  ;;  %v14005_v13 = vpop.f32.mrb[18].mxu0 }
 0x2e4   : > { %v17019_v25 = vpack.c.bf16 %v8284_v45, %v8277_v54  ;;  %v3668_v8 = vand.u32 4294901760, %v3667_v21  ;;  %v6133_v10 = vand.u32 4294901760, %v14005_v13  ;;  %v2431_v9 = vpop.f32.mrb[19].mxu0  ;;  %v10842_v63 = vand.u32 4294901760, %v10841_v53 }
 0x2e5   : > { %v17021_v0 = vpack.c.bf16 %v10840_v41, %v10833_v5  ;;  %v3661_v40 = vand.u32 4294901760, %v3660_v58  ;;  %v6130_v62 = vand.u32 4294901760, %v2431_v9  ;;  %v17023_v59 = vpack.c.bf16 %v3667_v21, %v3660_v58 }
 0x2e6   : > { %18036 = vst [vmem:[#allocation21_spill] sm:$0xff] %v17019_v25  ;;  %v10835_v6 = vand.u32 4294901760, %v10834_v57  ;;  %v3669_v44 = vsub.f32 %v3667_v21, %v3668_v8  ;;  %v6225_v11 = vsub.f32 %v14005_v13, %v6133_v10 }
 0x2e7   : > { %18037 = vst [vmem:[#allocation22_spill] sm:$0xff] %v17021_v0  ;;  %v3662_v23 = vsub.f32 %v3660_v58, %v3661_v40  ;;  %v17025_v47 = vpack.c.bf16 %v6133_v10, %v6130_v62  ;;  %v6218_v24 = vsub.f32 %v2431_v9, %v6130_v62  ;;  %v14008_v12 = vpop.f32.mrb[20].mxu0  ;;  %v17027_v19 = vpack.c.bf16 %v3668_v8, %v3661_v40 }
 0x2e8   : > { %v6226_v26 = vand.u32 4294901760, %v6225_v11  ;;  %v8691_v2 = vand.u32 4294901760, %v14008_v12  ;;  %v2443_v45 = vpop.f32.mrb[21].mxu0  ;;  %v3670_v55 = vand.u32 4294901760, %v3669_v44  ;;  %v17029_v41 = vpack.c.bf16 %v10842_v63, %v10835_v6 }
 0x2e9   : > { %v6219_v5 = vand.u32 4294901760, %v6218_v24  ;;  %v8688_v54 = vand.u32 4294901760, %v2443_v45  ;;  %14069 = vmatmul.mubr.f32.vlgmr.msra.gmra.mrb[0].mxu1 %v16936_v37  ;;  %v3663_v53 = vand.u32 4294901760, %v3662_v23  ;;  %v17032_v21 = vpack.c.bf16 %v6225_v11, %v6218_v24 }
 0x2ea   : > { %18038 = vst [vmem:[#allocation23_spill] sm:$0xff] %v17029_v41  ;;  %v6227_v57 = vsub.f32 %v6225_v11, %v6226_v26  ;;  %v8783_v58 = vsub.f32 %v14008_v12, %v8691_v2  ;;  %14923 = vmatpush3.bf16.msra.mxu1 %v16946_v7  ;;  %14075 = vmatprep.mubr.f32.mxu1 %v16919_v17 }
 0x2eb   : > { %v6220_v13 = vsub.f32 %v6218_v24, %v6219_v5  ;;  %v17036_v8 = vpack.c.bf16 %v8691_v2, %v8688_v54  ;;  %v8776_v10 = vsub.f32 %v2443_v45, %v8688_v54  ;;  %14925 = vmatprep.subr.bf16.mxu1 %v16976_v31  ;;  %v14011_v9 = vpop.f32.mrb[22].mxu0  ;;  %v17039_v63 = vpack.c.bf16 %v3670_v55, %v3663_v53 }
 0x2ec   : > { %v8784_v40 = vand.u32 4294901760, %v8783_v58  ;;  %v11249_v62 = vand.u32 4294901760, %v14011_v9  ;;  %v2455_v6 = vpop.f32.mrb[23].mxu0  ;;  %v6228_v44 = vand.u32 4294901760, %v6227_v57  ;;  %v17041_v23 = vpack.c.bf16 %v6226_v26, %v6219_v5 }
 0x2ed   : > { %18039 = vst [vmem:[#allocation27_spill] sm:$0xff] %v17036_v8  ;;  %v8777_v11 = vand.u32 4294901760, %v8776_v10  ;;  %v11246_v12 = vand.u32 4294901760, %v2455_v6  ;;  %v6221_v7 = vand.u32 4294901760, %v6220_v13  ;;  %v17043_v0 = vpack.c.bf16 %v8783_v58, %v8776_v10 }
 0x2ee   : > { %v8785_v24 = vsub.f32 %v8783_v58, %v8784_v40  ;;  %v11341_v2 = vsub.f32 %v14011_v9, %v11249_v62 }
 0x2ef   : > { %18040 = vst [vmem:[#allocation29_spill] sm:$0xff] %v17043_v0  ;;  %v8778_v43 = vsub.f32 %v8776_v10, %v8777_v11  ;;  %v17045_v45 = vpack.c.bf16 %v11249_v62, %v11246_v12  ;;  %v11334_v54 = vsub.f32 %v2455_v6, %v11246_v12  ;;  %v14014_v41 = vpop.f32.mrb[24].mxu0  ;;  %v17047_v55 = vpack.c.bf16 %v6228_v44, %v6221_v7 }
 0x2f0   : > { %v11342_v53 = vand.u32 4294901760, %v11341_v2  ;;  %v4077_v1 = vand.u32 4294901760, %v14014_v41  ;;  %v2467_v32 = vpop.f32.mrb[25].mxu0  ;;  %v8786_v57 = vand.u32 4294901760, %v8785_v24  ;;  %v17049_v26 = vpack.c.bf16 %v8784_v40, %v8777_v11 }
 0x2f1   : > { %18041 = vst [vmem:[#allocation30_spill] sm:$0xff] %v17045_v45  ;;  %v11335_v5 = vand.u32 4294901760, %v11334_v54  ;;  %v4074_v48 = vand.u32 4294901760, %v2467_v32  ;;  %14076 = vmatmul.mubr.f32.vlgmr.msra.gmra.mrb[0].mxu1 %v16936_v37  ;;  %v8779_v13 = vand.u32 4294901760, %v8778_v43  ;;  %v17052_v58 = vpack.c.bf16 %v11341_v2, %v11334_v54 }
 0x2f2   : > { %18042 = vst [vmem:[#allocation31_spill] sm:$0xff] %v17049_v26  ;;  %v11343_v10 = vsub.f32 %v11341_v2, %v11342_v53  ;;  %v4169_v9 = vsub.f32 %v14014_v41, %v4077_v1  ;;  %14927 = vmatpush3.bf16.msra.mxu1 %v16976_v31  ;;  %14082 = vmatprep.mubr.f32.mxu1 %v16929_v34 }
 0x2f3   : > { %18043 = vst [vmem:[#allocation34_spill] sm:$0xff] %v17052_v58  ;;  %v11336_v62 = vsub.f32 %v11334_v54, %v11335_v5  ;;  %v17056_v6 = vpack.c.bf16 %v4077_v1, %v4074_v48  ;;  %v4162_v44 = vsub.f32 %v2467_v32, %v4074_v48  ;;  %14929 = vmatprep.subr.bf16.mxu1 %v16999_v33  ;;  %v14017_v40 = vpop.f32.mrb[26].mxu0 }
 0x2f4   : > { %v17059_v11 = vpack.c.bf16 %v8786_v57, %v8779_v13  ;;  %v4170_v12 = vand.u32 4294901760, %v4169_v9  ;;  %v6635_v7 = vand.u32 4294901760, %v14017_v40  ;;  %v2479_v43 = vpop.f32.mrb[27].mxu0  ;;  %v11344_v24 = vand.u32 4294901760, %v11343_v10 }
 0x2f5   : > { %v17061_v58 = vpack.c.bf16 %v11342_v53, %v11335_v5  ;;  %v4163_v41 = vand.u32 4294901760, %v4162_v44  ;;  %v6632_v2 = vand.u32 4294901760, %v2479_v43  ;;  %14083 = vmatmul.mubr.f32.vlgmr.msra.gmra.mrb[2].mxu1 %v16949_v42  ;;  %v17064_v45 = vpack.c.bf16 %v4169_v9, %v4162_v44 }
 0x2f6   : > { %18044 = vst [vmem:[#allocation35_spill] sm:$0xff] %v17059_v11  ;;  %v11337_v1 = vand.u32 4294901760, %v11336_v62  ;;  %v4171_v54 = vsub.f32 %v4169_v9, %v4170_v12  ;;  %v6727_v48 = vsub.f32 %v14017_v40, %v6635_v7  ;;  %14931 = vmatpush3.bf16.msra.mxu1 %v16999_v33  ;;  %14089 = vmatprep.mubr.f32.mxu1 %v16919_v17 }
 0x2f7   : > { %18045 = vst [vmem:[#allocation38_spill] sm:$0xff] %v17061_v58  ;;  %v4164_v32 = vsub.f32 %v4162_v44, %v4163_v41  ;;  %v17068_v57 = vpack.c.bf16 %v6635_v7, %v6632_v2  ;;  %v6720_v13 = vsub.f32 %v2479_v43, %v6632_v2  ;;  %14933 = vmatprep.subr.bf16.mxu1 %v16983_v51  ;;  %v14020_v53 = vpop.f32.mrb[28].mxu0 }
 0x2f8   : > { %v17071_v5 = vpack.c.bf16 %v4170_v12, %v4163_v41  ;;  %v6728_v10 = vand.u32 4294901760, %v6727_v48  ;;  %v9193_v58 = vand.u32 4294901760, %v14020_v53  ;;  %v2491_v22 = vpop.f32.mrb[29].mxu0  ;;  %v4172_v30 = vand.u32 4294901760, %v4171_v54 }
 0x2f9   : > { %v17073_v62 = vpack.c.bf16 %v11344_v24, %v11337_v1  ;;  %v6721_v9 = vand.u32 4294901760, %v6720_v13  ;;  %v9190_v40 = vand.u32 4294901760, %v2491_v22  ;;  %v4165_v33 = vand.u32 4294901760, %v4164_v32 }
 0x2fa   : > { %v17075_v26 = vpack.c.bf16 %v6727_v48, %v6720_v13  ;;  %v6729_v44 = vsub.f32 %v6727_v48, %v6728_v10  ;;  %v9285_v7 = vsub.f32 %v14020_v53, %v9193_v58 }
 0x2fb   : > { %18046 = vst [vmem:[#allocation39_spill] sm:$0xff] %v17073_v62  ;;  %v6722_v0 = vsub.f32 %v6720_v13, %v6721_v9  ;;  %v17077_v43 = vpack.c.bf16 %v9193_v58, %v9190_v40  ;;  %v9278_v2 = vsub.f32 %v2491_v22, %v9190_v40  ;;  %v14023_v11 = vpop.f32.mrb[30].mxu0  ;;  %v17079_v12 = vpack.c.bf16 %v4172_v30, %v4165_v33 }
 0x2fc   : > { %v9286_v41 = vand.u32 4294901760, %v9285_v7  ;;  %v11751_v8 = vand.u32 4294901760, %v14023_v11  ;;  %v2503_v15 = vpop.f32.mrb[31].mxu0  ;;  %v6730_v54 = vand.u32 4294901760, %v6729_v44  ;;  %v17081_v24 = vpack.c.bf16 %v6728_v10, %v6721_v9 }
 0x2fd   : > { %18047 = vst [vmem:[#allocation43_spill] sm:$0xff] %v17077_v43  ;;  %v9279_v1 = vand.u32 4294901760, %v9278_v2  ;;  %v11748_v62 = vand.u32 4294901760, %v2503_v15  ;;  %14090 = vmatmul.mubr.f32.vlgmr.msra.gmra.mrb[2].mxu1 %v16936_v37  ;;  %v6723_v32 = vand.u32 4294901760, %v6722_v0  ;;  %v17084_v48 = vpack.c.bf16 %v9285_v7, %v9278_v2 }
 0x2fe   : > { %v9287_v13 = vsub.f32 %v9285_v7, %v9286_v41  ;;  %v11843_v58 = vsub.f32 %v14023_v11, %v11751_v8  ;;  %14935 = vmatpush3.bf16.msra.mxu1 %v16983_v51  ;;  %14096 = vmatprep.mubr.f32.mxu1 %v16922_v20 }
 0x2ff   : > { %18048 = vst [vmem:[#allocation46_spill] sm:$0xff] %v17084_v48  ;;  %v9280_v30 = vsub.f32 %v9278_v2, %v9279_v1  ;;  %v17088_v22 = vpack.c.bf16 %v11751_v8, %v11748_v62  ;;  %v11836_v53 = vsub.f32 %v2503_v15, %v11748_v62  ;;  %14937 = vmatprep.subr.bf16.mxu1 %v16976_v31  ;;  %v14026_v10 = vpop.f32.mrb[32].mxu0 }
 0x300   : > { %v17091_v9 = vpack.c.bf16 %v6730_v54, %v6723_v32  ;;  %v11844_v40 = vand.u32 4294901760, %v11843_v58  ;;  %v4579_v33 = vand.u32 4294901760, %v14026_v10  ;;  %v2515_v0 = vpop.f32.mrb[33].mxu0  ;;  %v9288_v44 = vand.u32 4294901760, %v9287_v13 }
 0x301   : > { %18049 = vst [vmem:[#allocation53_spill] sm:$0xff] %v17088_v22  ;;  %v17093_v48 = vpack.c.bf16 %v9286_v41, %v9279_v1  ;;  %v11837_v11 = vand.u32 4294901760, %v11836_v53  ;;  %v4576_v7 = vand.u32 4294901760, %v2515_v0  ;;  %v9281_v51 = vand.u32 4294901760, %v9280_v30 }
 0x302   : > { %v17095_v43 = vpack.c.bf16 %v11843_v58, %v11836_v53  ;;  %v11845_v2 = vsub.f32 %v11843_v58, %v11844_v40  ;;  %v4671_v8 = vsub.f32 %v14026_v10, %v4579_v33 }
 0x303   : > { %18050 = vst [vmem:[#allocation56_spill] sm:$0xff] %v17093_v48  ;;  %v11838_v22 = vsub.f32 %v11836_v53, %v11837_v11  ;;  %v17097_v15 = vpack.c.bf16 %v4579_v33, %v4576_v7  ;;  %v4664_v62 = vsub.f32 %v2515_v0, %v4576_v7  ;;  %v14029_v3 = vpop.f32.mrb[34].mxu0  ;;  %v17099_v54 = vpack.c.bf16 %v9288_v44, %v9281_v51 }
 0x304   : > { %18051 = vst [vmem:[#allocation24_spill] sm:$0xff] %v17095_v43  ;;  %v4672_v32 = vand.u32 4294901760, %v4671_v8  ;;  %v7137_v25 = vand.u32 4294901760, %v14029_v3  ;;  %v2527_v56 = vpop.f32.mrb[35].mxu0  ;;  %v11846_v13 = vand.u32 4294901760, %v11845_v2  ;;  %v17101_v41 = vpack.c.bf16 %v11844_v40, %v11837_v11 }
 0x305   : > { %18052 = vst [vmem:[#allocation25_spill] sm:$0xff] %v17099_v54  ;;  %v4665_v1 = vand.u32 4294901760, %v4664_v62  ;;  %v7134_v48 = vand.u32 4294901760, %v2527_v56  ;;  %14097 = vmatmul.mubr.f32.vlgmr.msra.gmra.mrb[2].mxu1 %v16939_v38  ;;  %v17104_v30 = vpack.c.bf16 %v4671_v8, %v4664_v62  ;;  %v11839_v58 = vand.u32 4294901760, %v11838_v22 }
 0x306   : > { %18053 = vst [vmem:[#allocation26_spill] sm:$0xff] %v17101_v41  ;;  %v4673_v53 = vsub.f32 %v4671_v8, %v4672_v32  ;;  %v7229_v10 = vsub.f32 %v14029_v3, %v7137_v25  ;;  %14939 = vmatpush3.bf16.msra.mxu1 %v16976_v31  ;;  %14103 = vmatprep.mubr.f32.mxu1 %v16925_v29 }
 0x307   : > { %v4666_v33 = vsub.f32 %v4664_v62, %v4665_v1  ;;  %v17108_v0 = vpack.c.bf16 %v7137_v25, %v7134_v48  ;;  %v7222_v44 = vsub.f32 %v2527_v56, %v7134_v48  ;;  %14941 = vmatprep.subr.bf16.mxu1 %v16987_v52  ;;  %v14032_v40 = vpop.f32.mrb[36].mxu0  ;;  %v17111_v11 = vpack.c.bf16 %v4672_v32, %v4665_v1 }
 0x308   : > { %v7230_v7 = vand.u32 4294901760, %v7229_v10  ;;  %v9695_v51 = vand.u32 4294901760, %v14032_v40  ;;  %v2539_v2 = vpop.f32.mrb[37].mxu0  ;;  %v4674_v41 = vand.u32 4294901760, %v4673_v53  ;;  %v17113_v22 = vpack.c.bf16 %v11846_v13, %v11839_v58 }
 0x309   : > { %v7223_v3 = vand.u32 4294901760, %v7222_v44  ;;  %v9692_v8 = vand.u32 4294901760, %v2539_v2  ;;  %v4667_v43 = vand.u32 4294901760, %v4666_v33  ;;  %v17115_v54 = vpack.c.bf16 %v7229_v10, %v7222_v44 }
 0x30a   : > { %18054 = vst [vmem:[#allocation28_spill] sm:$0xff] %v17113_v22  ;;  %v7231_v62 = vsub.f32 %v7229_v10, %v7230_v7  ;;  %v9787_v25 = vsub.f32 %v14032_v40, %v9695_v51 }
 0x30b   : > { %v7224_v61 = vsub.f32 %v7222_v44, %v7223_v3  ;;  %v17117_v56 = vpack.c.bf16 %v9695_v51, %v9692_v8  ;;  %v9780_v48 = vsub.f32 %v2539_v2, %v9692_v8  ;;  %v14035_v60 = vpop.f32.mrb[38].mxu0  ;;  %v17119_v32 = vpack.c.bf16 %v4674_v41, %v4667_v43 }
 0x30c   : > { %v9788_v1 = vand.u32 4294901760, %v9787_v25  ;;  %v12253_v4 = vand.u32 4294901760, %v14035_v60  ;;  %v2551_v18 = vpop.f32.mrb[39].mxu0  ;;  %v7232_v53 = vand.u32 4294901760, %v7231_v62  ;;  %v17121_v13 = vpack.c.bf16 %v7230_v7, %v7223_v3 }
 0x30d   : > { %v9781_v58 = vand.u32 4294901760, %v9780_v48  ;;  %v12250_v22 = vand.u32 4294901760, %v2551_v18  ;;  %14104 = vmatmul.mubr.f32.vlgmr.msra.gmra.mrb[2].mxu1 %v16942_v39  ;;  %v7225_v33 = vand.u32 4294901760, %v7224_v61  ;;  %v17124_v10 = vpack.c.bf16 %v9787_v25, %v9780_v48 }
 0x30e   : > { %v9789_v44 = vsub.f32 %v9787_v25, %v9788_v1  ;;  %v12345_v40 = vsub.f32 %v14035_v60, %v12253_v4  ;;  %14943 = vmatpush3.bf16.msra.mxu1 %v16987_v52  ;;  %14110 = vmatprep.mubr.f32.mxu1 %v16919_v17 }
 0x30f   : > { %18055 = vst [vmem:[#allocation32_spill] sm:$0xff] %v17124_v10  ;;  %v9782_v43 = vsub.f32 %v9780_v48, %v9781_v58  ;;  %v17128_v41 = vpack.c.bf16 %v12253_v4, %v12250_v22  ;;  %v12338_v51 = vsub.f32 %v2551_v18, %v12250_v22  ;;  %14945 = vmatprep.subr.bf16.mxu1 %v16976_v31 }
 0x310   : > { %v17131_v7 = vpack.c.bf16 %v7232_v53, %v7225_v33  ;;  %v12346_v2 = vand.u32 4294901760, %v12345_v40  ;;  %v9790_v3 = vand.u32 4294901760, %v9789_v44  ;;  %v17133_v8 = vpack.c.bf16 %v9788_v1, %v9781_v58  ;;  %v18056_v44 = vld [vmem:[#allocation8_spill] sm:$0xff] }
 0x311   : > { %v12339_v61 = vand.u32 4294901760, %v12338_v51  ;;  %v9783_v62 = vand.u32 4294901760, %v9782_v43  ;;  %v17135_v25 = vpack.c.bf16 %v12345_v40, %v12338_v51 }
 0x312   : > { %v12347_v60 = vsub.f32 %v12345_v40, %v12346_v2 }
 0x313   : > { %v12340_v52 = vsub.f32 %v12338_v51, %v12339_v61  ;;  %v17137_v10 = vpack.c.bf16 %v9790_v3, %v9783_v62  ;;  %v17139_v48 = vpack.c.bf16 %v12346_v2, %v12339_v61 }
 0x314   : > { %v12348_v4 = vand.u32 4294901760, %v12347_v60 }
 0x315   : > { %v12341_v18 = vand.u32 4294901760, %v12340_v52  ;;  %14111 = vmatmul.mubr.f32.vlgmr.msra.gmra.mrb[2].mxu1 %v16936_v37 }
 0x316   : > { %14947 = vmatpush3.bf16.msra.mxu1 %v16976_v31  ;;  %14117 = vmatprep.mubr.f32.mxu1 %v16919_v17 }
 0x317   : > { %14949 = vmatprep.subr.bf16.mxu1 %v17016_v27  ;;  %v17145_v22 = vpack.c.bf16 %v12348_v4, %v12341_v18  ;;  %v18057_v18 = vld [vmem:[#allocation13_spill] sm:$0xff] }
 0x31d   : > { %14118 = vmatmul.mubr.f32.vlgmr.msra.gmra.mrb[2].mxu1 %v16936_v37 }
 0x31e   : > { %14951 = vmatpush3.bf16.msra.mxu1 %v17016_v27  ;;  %14124 = vmatprep.mubr.f32.mxu1 %v16929_v34 }
 0x31f   : > { %14953 = vmatprep.subr.bf16.mxu1 %v17039_v63 }
 0x321   : > { %14125 = vmatmul.mubr.f32.vlgmr.msra.gmra.mrb[4].mxu1 %v16949_v42 }
 0x322   : > { %14955 = vmatpush3.bf16.msra.mxu1 %v17039_v63  ;;  %14131 = vmatprep.mubr.f32.mxu1 %v16919_v17 }
 0x323   : > { %14957 = vmatprep.subr.bf16.mxu1 %v17023_v59 }
 0x329   : > { %14132 = vmatmul.mubr.f32.vlgmr.msra.gmra.mrb[4].mxu1 %v16936_v37 }
 0x32a   : > { %14959 = vmatpush3.bf16.msra.mxu1 %v17023_v59  ;;  %14138 = vmatprep.mubr.f32.mxu1 %v16922_v20 }
 0x32b   : > { %14961 = vmatprep.subr.bf16.mxu1 %v17016_v27 }
 0x331   : > { %14139 = vmatmul.mubr.f32.vlgmr.msra.gmra.mrb[4].mxu1 %v16939_v38 }
 0x332   : > { %14963 = vmatpush3.bf16.msra.mxu1 %v17016_v27  ;;  %14145 = vmatprep.mubr.f32.mxu1 %v16925_v29 }
 0x333   : > { %14965 = vmatprep.subr.bf16.mxu1 %v17027_v19 }
 0x339   : > { %14146 = vmatmul.mubr.f32.vlgmr.msra.gmra.mrb[4].mxu1 %v16942_v39 }
 0x33a   : > { %14967 = vmatpush3.bf16.msra.mxu1 %v17027_v19  ;;  %14152 = vmatprep.mubr.f32.mxu1 %v16919_v17 }
 0x33b   : > { %14969 = vmatprep.subr.bf16.mxu1 %v17016_v27 }
 0x341   : > { %14153 = vmatmul.mubr.f32.vlgmr.msra.gmra.mrb[4].mxu1 %v16936_v37 }
 0x342   : > { %14971 = vmatpush3.bf16.msra.mxu1 %v17016_v27  ;;  %14159 = vmatprep.mubr.f32.mxu1 %v16919_v17 }
 0x343   : > { %14973 = vmatprep.subr.bf16.mxu1 %v17056_v6 }
 0x349   : > { %14160 = vmatmul.mubr.f32.vlgmr.msra.gmra.mrb[4].mxu1 %v16936_v37 }
 0x34a   : > { %14975 = vmatpush3.bf16.msra.mxu1 %v17056_v6  ;;  %14166 = vmatprep.mubr.f32.mxu1 %v16929_v34 }
 0x34b   : > { %14977 = vmatprep.subr.bf16.mxu1 %v17079_v12 }
 0x34d   : > { %14167 = vmatmul.mubr.f32.vlgmr.msra.gmra.mrb[6].mxu1 %v16949_v42 }
 0x34e   : > { %14979 = vmatpush3.bf16.msra.mxu1 %v17079_v12  ;;  %14173 = vmatprep.mubr.f32.mxu1 %v16919_v17 }
 0x34f   : > { %14981 = vmatprep.subr.bf16.mxu1 %v17064_v45 }
 0x355   : > { %14174 = vmatmul.mubr.f32.vlgmr.msra.gmra.mrb[6].mxu1 %v16936_v37 }
 0x356   : > { %14983 = vmatpush3.bf16.msra.mxu1 %v17064_v45  ;;  %14180 = vmatprep.mubr.f32.mxu1 %v16922_v20 }
 0x357   : > { %14985 = vmatprep.subr.bf16.mxu1 %v17056_v6 }
 0x35d   : > { %14181 = vmatmul.mubr.f32.vlgmr.msra.gmra.mrb[6].mxu1 %v16939_v38 }
 0x35e   : > { %14987 = vmatpush3.bf16.msra.mxu1 %v17056_v6  ;;  %14187 = vmatprep.mubr.f32.mxu1 %v16925_v29 }
 0x35f   : > { %14989 = vmatprep.subr.bf16.mxu1 %v17071_v5 }
 0x365   : > { %14188 = vmatmul.mubr.f32.vlgmr.msra.gmra.mrb[6].mxu1 %v16942_v39 }
 0x366   : > { %14991 = vmatpush3.bf16.msra.mxu1 %v17071_v5  ;;  %14194 = vmatprep.mubr.f32.mxu1 %v16919_v17 }
 0x367   : > { %14993 = vmatprep.subr.bf16.mxu1 %v17056_v6 }
 0x36d   : > { %14195 = vmatmul.mubr.f32.vlgmr.msra.gmra.mrb[6].mxu1 %v16936_v37 }
 0x36e   : > { %14995 = vmatpush3.bf16.msra.mxu1 %v17056_v6  ;;  %14201 = vmatprep.mubr.f32.mxu1 %v16919_v17 }
 0x36f   : > { %14997 = vmatprep.subr.bf16.mxu1 %v17097_v15 }
 0x375   : > { %14202 = vmatmul.mubr.f32.vlgmr.msra.gmra.mrb[6].mxu1 %v16936_v37 }
 0x376   : > { %14999 = vmatpush3.bf16.msra.mxu1 %v17097_v15  ;;  %14208 = vmatprep.mubr.f32.mxu1 %v16929_v34 }
 0x377   : > { %15001 = vmatprep.subr.bf16.mxu1 %v17119_v32 }
 0x379   : > { %14209 = vmatmul.mubr.f32.vlgmr.msra.gmra.mrb[8].mxu1 %v16949_v42 }
 0x37a   : > { %15003 = vmatpush3.bf16.msra.mxu1 %v17119_v32  ;;  %14215 = vmatprep.mubr.f32.mxu1 %v16919_v17 }
 0x37b   : > { %15005 = vmatprep.subr.bf16.mxu1 %v17104_v30 }
 0x381   : > { %14216 = vmatmul.mubr.f32.vlgmr.msra.gmra.mrb[8].mxu1 %v16936_v37 }
 0x382   : > { %15007 = vmatpush3.bf16.msra.mxu1 %v17104_v30  ;;  %14222 = vmatprep.mubr.f32.mxu1 %v16922_v20 }
 0x383   : > { %15009 = vmatprep.subr.bf16.mxu1 %v17097_v15 }
 0x389   : > { %14223 = vmatmul.mubr.f32.vlgmr.msra.gmra.mrb[8].mxu1 %v16939_v38 }
 0x38a   : > { %15011 = vmatpush3.bf16.msra.mxu1 %v17097_v15  ;;  %14229 = vmatprep.mubr.f32.mxu1 %v16925_v29 }
 0x38b   : > { %15013 = vmatprep.subr.bf16.mxu1 %v17111_v11 }
 0x391   : > { %14230 = vmatmul.mubr.f32.vlgmr.msra.gmra.mrb[8].mxu1 %v16942_v39 }
 0x392   : > { %15015 = vmatpush3.bf16.msra.mxu1 %v17111_v11  ;;  %14236 = vmatprep.mubr.f32.mxu1 %v16919_v17 }
 0x393   : > { %15017 = vmatprep.subr.bf16.mxu1 %v17097_v15 }
 0x399   : > { %14237 = vmatmul.mubr.f32.vlgmr.msra.gmra.mrb[8].mxu1 %v16936_v37 }
 0x39a   : > { %15019 = vmatpush3.bf16.msra.mxu1 %v17097_v15  ;;  %14243 = vmatprep.mubr.f32.mxu1 %v16919_v17 }
 0x39b   : > { %15021 = vmatprep.subr.bf16.mxu1 %v16952_v28 }
 0x3a1   : > { %14244 = vmatmul.mubr.f32.vlgmr.msra.gmra.mrb[8].mxu1 %v16936_v37 }
 0x3a2   : > { %15023 = vmatpush3.bf16.msra.mxu1 %v16952_v28  ;;  %14250 = vmatprep.mubr.f32.mxu1 %v16929_v34 }
 0x3a3   : > { %15025 = vmatprep.subr.bf16.mxu1 %v16968_v16 }
 0x3a5   : > { %14251 = vmatmul.mubr.f32.vlgmr.msra.gmra.mrb[10].mxu1 %v16949_v42 }
 0x3a6   : > { %15027 = vmatpush3.bf16.msra.mxu1 %v16968_v16  ;;  %14257 = vmatprep.mubr.f32.mxu1 %v16919_v17 }
 0x3a7   : > { %15029 = vmatprep.subr.bf16.mxu1 %v16957_v49 }
 0x3ad   : > { %14258 = vmatmul.mubr.f32.vlgmr.msra.gmra.mrb[10].mxu1 %v16936_v37 }
 0x3ae   : > { %15031 = vmatpush3.bf16.msra.mxu1 %v16957_v49  ;;  %14264 = vmatprep.mubr.f32.mxu1 %v16922_v20 }
 0x3af   : > { %15033 = vmatprep.subr.bf16.mxu1 %v16952_v28 }
 0x3b5   : > { %14265 = vmatmul.mubr.f32.vlgmr.msra.gmra.mrb[10].mxu1 %v16939_v38 }
 0x3b6   : > { %15035 = vmatpush3.bf16.msra.mxu1 %v16952_v28  ;;  %14271 = vmatprep.mubr.f32.mxu1 %v16925_v29 }
 0x3b7   : > { %15037 = vmatprep.subr.bf16.mxu1 %v16962_v35 }
 0x3bd   : > { %14272 = vmatmul.mubr.f32.vlgmr.msra.gmra.mrb[10].mxu1 %v16942_v39 }
 0x3be   : > { %15039 = vmatpush3.bf16.msra.mxu1 %v16962_v35  ;;  %14278 = vmatprep.mubr.f32.mxu1 %v16919_v17 }
 0x3bf   : > { %15041 = vmatprep.subr.bf16.mxu1 %v16952_v28 }
 0x3c4   : > { %v14077_v49 = vpop.f32.mrb[0].mxu1 }
 0x3c5   : > { %v3059_v16 = vpop.f32.mrb[1].mxu1  ;;  %14279 = vmatmul.mubr.f32.vlgmr.msra.gmra.mrb[10].mxu1 %v16936_v37  ;;  %v17263_v35 = vmul.f32 %v14077_v49, %v14077_v49 }
 0x3c6   : > { %15043 = vmatpush3.bf16.msra.mxu1 %v16952_v28  ;;  %14285 = vmatprep.mubr.f32.mxu1 %v16919_v17  ;;  %v17270_v27 = vmul.f32 %v3059_v16, %v3059_v16 }
 0x3c7   : > { %15045 = vmatprep.subr.bf16.mxu1 %v16985_v14 }
 0x3cd   : > { %14286 = vmatmul.mubr.f32.vlgmr.msra.gmra.mrb[10].mxu1 %v16936_v37 }
 0x3ce   : > { %15047 = vmatpush3.bf16.msra.mxu1 %v16985_v14  ;;  %14292 = vmatprep.mubr.f32.mxu1 %v16929_v34 }
 0x3cf   : > { %15049 = vmatprep.subr.bf16.mxu1 %v17007_v50 }
 0x3d1   : > { %14293 = vmatmul.mubr.f32.vlgmr.msra.gmra.mrb[12].mxu1 %v16949_v42 }
 0x3d2   : > { %15051 = vmatpush3.bf16.msra.mxu1 %v17007_v50  ;;  %14299 = vmatprep.mubr.f32.mxu1 %v16919_v17 }
 0x3d3   : > { %15053 = vmatprep.subr.bf16.mxu1 %v16992_v36 }
 0x3d9   : > { %14300 = vmatmul.mubr.f32.vlgmr.msra.gmra.mrb[12].mxu1 %v16936_v37 }
 0x3da   : > { %15055 = vmatpush3.bf16.msra.mxu1 %v16992_v36  ;;  %14306 = vmatprep.mubr.f32.mxu1 %v16922_v20 }
 0x3db   : > { %15057 = vmatprep.subr.bf16.mxu1 %v16985_v14 }
 0x3e1   : > { %14307 = vmatmul.mubr.f32.vlgmr.msra.gmra.mrb[12].mxu1 %v16939_v38 }
 0x3e2   : > { %15059 = vmatpush3.bf16.msra.mxu1 %v16985_v14  ;;  %14313 = vmatprep.mubr.f32.mxu1 %v16925_v29 }
 0x3e3   : > { %15061 = vmatprep.subr.bf16.mxu1 %v17001_v46 }
 0x3e9   : > { %14314 = vmatmul.mubr.f32.vlgmr.msra.gmra.mrb[12].mxu1 %v16942_v39 }
 0x3ea   : > { %15063 = vmatpush3.bf16.msra.mxu1 %v17001_v46  ;;  %14320 = vmatprep.mubr.f32.mxu1 %v16919_v17 }
 0x3eb   : > { %15065 = vmatprep.subr.bf16.mxu1 %v16985_v14 }
 0x3f0   : > { %v14119_v28 = vpop.f32.mrb[2].mxu1 }
 0x3f1   : > { %v17265_v31 = vmul.f32 %v14119_v28, %v14119_v28  ;;  %v17267_v36 = vmul.f32 %v14119_v28, %v14077_v49  ;;  %v3561_v50 = vpop.f32.mrb[3].mxu1  ;;  %14321 = vmatmul.mubr.f32.vlgmr.msra.gmra.mrb[12].mxu1 %v16936_v37  ;;  %v18058_v28 = vld [vmem:[#allocation9_spill] sm:$0xff] }
 0x3f2   : > { %v17272_v59 = vmul.f32 %v3561_v50, %v3561_v50  ;;  %v17274_v19 = vmul.f32 %v3561_v50, %v3059_v16  ;;  %15067 = vmatpush3.bf16.msra.mxu1 %v16985_v14  ;;  %14327 = vmatprep.mubr.f32.mxu1 %v16919_v17 }
 0x3f3   : > { %v5100_v46 = vadd.f32 %v17265_v31, %v17263_v35  ;;  %15069 = vmatprep.subr.bf16.mxu1 %v17025_v47 }
 0x3f4   : > { %v5099_v63 = vadd.f32 %v17272_v59, %v17270_v27  ;;  %v5089_v58 = vmul.f32 2.0, %v17274_v19 }
 0x3f6   : > { %v5101_v15 = vadd.f32 0.0001, %v5099_v63 }
 0x3f9   : > { %14328 = vmatmul.mubr.f32.vlgmr.msra.gmra.mrb[12].mxu1 %v16936_v37 }
 0x3fa   : > { %15071 = vmatpush3.bf16.msra.mxu1 %v17025_v47  ;;  %14334 = vmatprep.mubr.f32.mxu1 %v16929_v34 }
 0x3fb   : > { %15073 = vmatprep.subr.bf16.mxu1 %v17047_v55 }
 0x3fd   : > { %14335 = vmatmul.mubr.f32.vlgmr.msra.gmra.mrb[14].mxu1 %v16949_v42 }
 0x3fe   : > { %15075 = vmatpush3.bf16.msra.mxu1 %v17047_v55  ;;  %14341 = vmatprep.mubr.f32.mxu1 %v16919_v17 }
 0x3ff   : > { %15077 = vmatprep.subr.bf16.mxu1 %v17032_v21 }
 0x405   : > { %14342 = vmatmul.mubr.f32.vlgmr.msra.gmra.mrb[14].mxu1 %v16936_v37 }
 0x406   : > { %15079 = vmatpush3.bf16.msra.mxu1 %v17032_v21  ;;  %14348 = vmatprep.mubr.f32.mxu1 %v16922_v20 }
 0x407   : > { %15081 = vmatprep.subr.bf16.mxu1 %v17025_v47 }
 0x40d   : > { %14349 = vmatmul.mubr.f32.vlgmr.msra.gmra.mrb[14].mxu1 %v16939_v38 }
 0x40e   : > { %15083 = vmatpush3.bf16.msra.mxu1 %v17025_v47  ;;  %14355 = vmatprep.mubr.f32.mxu1 %v16925_v29 }
 0x40f   : > { %15085 = vmatprep.subr.bf16.mxu1 %v17041_v23 }
 0x415   : > { %14356 = vmatmul.mubr.f32.vlgmr.msra.gmra.mrb[14].mxu1 %v16942_v39 }
 0x416   : > { %15087 = vmatpush3.bf16.msra.mxu1 %v17041_v23  ;;  %14362 = vmatprep.mubr.f32.mxu1 %v16919_v17 }
 0x417   : > { %15089 = vmatprep.subr.bf16.mxu1 %v17025_v47 }
 0x41c   : > { %v14161_v14 = vpop.f32.mrb[4].mxu1 }
 0x41d   : > { %v5084_v21 = vsub.f32 %v14161_v14, %v17263_v35  ;;  %v4063_v45 = vpop.f32.mrb[5].mxu1  ;;  %14363 = vmatmul.mubr.f32.vlgmr.msra.gmra.mrb[14].mxu1 %v16936_v37 }
 0x41e   : > { %v5083_v55 = vsub.f32 %v4063_v45, %v17270_v27  ;;  %15091 = vmatpush3.bf16.msra.mxu1 %v17025_v47  ;;  %14369 = vmatprep.mubr.f32.mxu1 %v16919_v17  ;;  %v18061_v45 = vld [vmem:[#allocation21_spill] sm:$0xff] }
 0x41f   : > { %15093 = vmatprep.subr.bf16.mxu1 %v17068_v57 }
 0x425   : > { %14370 = vmatmul.mubr.f32.vlgmr.msra.gmra.mrb[14].mxu1 %v16936_v37 }
 0x426   : > { %15095 = vmatpush3.bf16.msra.mxu1 %v17068_v57  ;;  %14376 = vmatprep.mubr.f32.mxu1 %v16929_v34 }
 0x427   : > { %15097 = vmatprep.subr.bf16.mxu1 %v17091_v9 }
 0x429   : > { %14377 = vmatmul.mubr.f32.vlgmr.msra.gmra.mrb[16].mxu1 %v16949_v42 }
 0x42a   : > { %15099 = vmatpush3.bf16.msra.mxu1 %v17091_v9  ;;  %14383 = vmatprep.mubr.f32.mxu1 %v16919_v17 }
 0x42b   : > { %15101 = vmatprep.subr.bf16.mxu1 %v17075_v26 }
 0x431   : > { %14384 = vmatmul.mubr.f32.vlgmr.msra.gmra.mrb[16].mxu1 %v16936_v37 }
 0x432   : > { %15103 = vmatpush3.bf16.msra.mxu1 %v17075_v26  ;;  %14390 = vmatprep.mubr.f32.mxu1 %v16922_v20 }
 0x433   : > { %15105 = vmatprep.subr.bf16.mxu1 %v17068_v57 }
 0x439   : > { %14391 = vmatmul.mubr.f32.vlgmr.msra.gmra.mrb[16].mxu1 %v16939_v38 }
 0x43a   : > { %15107 = vmatpush3.bf16.msra.mxu1 %v17068_v57  ;;  %14397 = vmatprep.mubr.f32.mxu1 %v16925_v29 }
 0x43b   : > { %15109 = vmatprep.subr.bf16.mxu1 %v17081_v24 }
 0x441   : > { %14398 = vmatmul.mubr.f32.vlgmr.msra.gmra.mrb[16].mxu1 %v16942_v39 }
 0x442   : > { %15111 = vmatpush3.bf16.msra.mxu1 %v17081_v24  ;;  %14404 = vmatprep.mubr.f32.mxu1 %v16919_v17  ;;  %v5102_v24 = vadd.f32 0.0001, %v5100_v46  ;;  %v18059_v46 = vld [vmem:[#allocation11_spill] sm:$0xff] }
 0x443   : > { %15113 = vmatprep.subr.bf16.mxu1 %v17068_v57 }
 0x448   : > { %v14203_v47 = vpop.f32.mrb[6].mxu1 }
 0x449   : > { %v5086_v23 = vsub.f32 %v14203_v47, %v17265_v31  ;;  %v4565_v26 = vpop.f32.mrb[7].mxu1  ;;  %14405 = vmatmul.mubr.f32.vlgmr.msra.gmra.mrb[16].mxu1 %v16936_v37  ;;  %v18063_v47 = vld [vmem:[#allocation19_spill] sm:$0xff] }
 0x44a   : > { %v5085_v6 = vsub.f32 %v4565_v26, %v17272_v59  ;;  %15115 = vmatpush3.bf16.msra.mxu1 %v17068_v57  ;;  %14411 = vmatprep.mubr.f32.mxu1 %v16919_v17 }
 0x44b   : > { %v5104_v5 = vadd.f32 %v5086_v23, %v5084_v21  ;;  %15117 = vmatprep.subr.bf16.mxu1 %v17108_v0  ;;  %v18060_v21 = vld [vmem:[#allocation16_spill] sm:$0xff] }
 0x44c   : > { %v5103_v12 = vadd.f32 %v5085_v6, %v5083_v55  ;;  %v18062_v55 = vld [vmem:[#allocation17_spill] sm:$0xff] }
 0x44d   : > { %v5106_v9 = vadd.f32 0.0009, %v5104_v5 }
 0x44e   : > { %v5105_v30 = vadd.f32 0.0009, %v5103_v12 }
 0x44f   : > { %v5108_v11 = vmul.f32 %v5106_v9, %v5102_v24 }
 0x450   : > { %v5107_v32 = vmul.f32 %v5105_v30, %v5101_v15 }
 0x451   : > { %14412 = vmatmul.mubr.f32.vlgmr.msra.gmra.mrb[16].mxu1 %v16936_v37  ;;  %15828 = vrcp.f32 %v5108_v11  ;;  %v18064_v11 = vld [vmem:[#allocation27_spill] sm:$0xff] }
 0x452   : > { %15119 = vmatpush3.bf16.msra.mxu1 %v17108_v0  ;;  %14418 = vmatprep.mubr.f32.mxu1 %v16929_v34  ;;  %15830 = vrcp.f32 %v5107_v32 }
 0x453   : > { %15121 = vmatprep.subr.bf16.mxu1 %v17131_v7 }
 0x455   : > { %14419 = vmatmul.mubr.f32.vlgmr.msra.gmra.mrb[18].mxu1 %v16949_v42 }
 0x456   : > { %15123 = vmatpush3.bf16.msra.mxu1 %v17131_v7  ;;  %14425 = vmatprep.mubr.f32.mxu1 %v16919_v17  ;;  %v5091_v7 = vadd.f32 0.0001, %v5089_v58 }
 0x457   : > { %15125 = vmatprep.subr.bf16.mxu1 %v17115_v54 }
 0x45b   : > { %v15829_v61 = vpop.eup %15828 }
 0x45c   : > { %v15831_v60 = vpop.eup %15830 }
 0x45d   : > { %14426 = vmatmul.mubr.f32.vlgmr.msra.gmra.mrb[18].mxu1 %v16936_v37 }
 0x45e   : > { %15127 = vmatpush3.bf16.msra.mxu1 %v17115_v54  ;;  %14432 = vmatprep.mubr.f32.mxu1 %v16922_v20  ;;  %v5090_v54 = vmul.f32 2.0, %v17267_v36 }
 0x45f   : > { %15129 = vmatprep.subr.bf16.mxu1 %v17108_v0 }
 0x460   : > { %v5092_v43 = vadd.f32 0.0001, %v5090_v54  ;;  %v18066_v54 = vld [vmem:[#allocation29_spill] sm:$0xff] }
 0x465   : > { %14433 = vmatmul.mubr.f32.vlgmr.msra.gmra.mrb[18].mxu1 %v16939_v38 }
 0x466   : > { %15131 = vmatpush3.bf16.msra.mxu1 %v17108_v0  ;;  %14439 = vmatprep.mubr.f32.mxu1 %v16925_v29 }
 0x467   : > { %15133 = vmatprep.subr.bf16.mxu1 %v17121_v13 }
 0x46d   : > { %14440 = vmatmul.mubr.f32.vlgmr.msra.gmra.mrb[18].mxu1 %v16942_v39 }
 0x46e   : > { %15135 = vmatpush3.bf16.msra.mxu1 %v17121_v13  ;;  %14446 = vmatprep.mubr.f32.mxu1 %v16919_v17 }
 0x46f   : > { %15137 = vmatprep.subr.bf16.mxu1 %v17108_v0 }
 0x474   : > { %v14245_v57 = vpop.f32.mrb[8].mxu1 }
 0x475   : > { %v5088_v1 = vsub.f32 %v14245_v57, %v17267_v36  ;;  %v5067_v53 = vpop.f32.mrb[9].mxu1  ;;  %14447 = vmatmul.mubr.f32.vlgmr.msra.gmra.mrb[18].mxu1 %v16936_v37  ;;  %v18065_v57 = vld [vmem:[#allocation35_spill] sm:$0xff] }
 0x476   : > { %v5087_v33 = vsub.f32 %v5067_v53, %v17274_v19  ;;  %15139 = vmatpush3.bf16.msra.mxu1 %v17108_v0  ;;  %14453 = vmatprep.mubr.f32.mxu1 %v16919_v17 }
 0x477   : > { %v5094_v13 = vmul.f32 2.0, %v5088_v1  ;;  %15141 = vmatprep.subr.bf16.mxu1 %v18056_v44  ;;  %v18067_v1 = vld [vmem:[#allocation31_spill] sm:$0xff] }
 0x478   : > { %v5093_v40 = vmul.f32 2.0, %v5087_v33 }
 0x479   : > { %v5096_v51 = vadd.f32 0.0009, %v5094_v13 }
 0x47a   : > { %v5095_v2 = vadd.f32 0.0009, %v5093_v40  ;;  %v18069_v40 = vld [vmem:[#allocation25_spill] sm:$0xff] }
 0x47b   : > { %v5098_v3 = vmul.f32 %v5096_v51, %v5092_v43  ;;  %v18070_v43 = vld [vmem:[#allocation46_spill] sm:$0xff]  ;;  %v18071_v51 = vld [vmem:[#allocation56_spill] sm:$0xff] }
 0x47c   : > { %v5097_v62 = vmul.f32 %v5095_v2, %v5091_v7 }
 0x47d   : > { %v5112_v52 = vmul.f32 %v15829_v61, %v5098_v3  ;;  %14454 = vmatmul.mubr.f32.vlgmr.msra.gmra.mrb[18].mxu1 %v16936_v37 }
 0x47e   : > { %v5111_v4 = vmul.f32 %v15831_v60, %v5097_v62  ;;  %15143 = vmatpush3.bf16.msra.mxu1 %v18056_v44  ;;  %14460 = vmatprep.mubr.f32.mxu1 %v16929_v34 }
 0x47f   : > { %v5114_v0 = vsel %vm304_vm0, %v5112_v52, 0.0  ;;  %15145 = vmatprep.subr.bf16.mxu1 %v18057_v18 }
 0x480   : > { %v5113_v49 = vsel %vm304_vm0, %v5111_v4, 0.0 }
 0x481   : > { %14461 = vmatmul.mubr.f32.vlgmr.msra.gmra.mrb[20].mxu1 %v16949_v42  ;;  %v5115_v16 = vadd.f32 %v5114_v0, %v5113_v49 }
 0x482   : > { %15147 = vmatpush3.bf16.msra.mxu1 %v18057_v18  ;;  %14467 = vmatprep.mubr.f32.mxu1 %v16919_v17 }
 0x483   : > { %15149 = vmatprep.subr.bf16.mxu1 %v18058_v28  ;;  %v5116_v35 = vrot.slane %v5115_v16, 4 }
 0x485   : > { %v5117_v31 = vadd.f32 %v5116_v35, %v5115_v16 }
 0x487   : > { %v5118_v36 = vrot.slane %v5117_v31, 2 }
 0x489   : > { %14468 = vmatmul.mubr.f32.vlgmr.msra.gmra.mrb[20].mxu1 %v16936_v37  ;;  %v5119_v50 = vadd.f32 %v5118_v36, %v5117_v31 }
 0x48a   : > { %15151 = vmatpush3.bf16.msra.mxu1 %v18058_v28  ;;  %14474 = vmatprep.mubr.f32.mxu1 %v16922_v20  ;;  %v18072_v28 = vld [vmem:[#allocation32_spill] sm:$0xff] }
 0x48b   : > { %15153 = vmatprep.subr.bf16.mxu1 %v18056_v44  ;;  %v5120_v27 = vrot.slane %v5119_v50, 1 }
 0x48d   : > { %v5121_v59 = vadd.f32 %v5120_v27, %v5119_v50 }
 0x48f   : > { %v5122_v19 = vsel %vm304_vm0, %v5121_v59, 0.0  ;;  %v18073_v59 = vld [vmem:[#allocation10_spill] sm:$0xff] }
 0x490   : > { %5123 = vadd.xlane.f32.xlu0 %v5122_v19 }
 0x491   : > { %14475 = vmatmul.mubr.f32.vlgmr.msra.gmra.mrb[20].mxu1 %v16939_v38 }
 0x492   : > { %15155 = vmatpush3.bf16.msra.mxu1 %v18056_v44  ;;  %14481 = vmatprep.mubr.f32.mxu1 %v16925_v29 }
 0x493   : > { %15157 = vmatprep.subr.bf16.mxu1 %v18059_v46 }
 0x499   : > { %14482 = vmatmul.mubr.f32.vlgmr.msra.gmra.mrb[20].mxu1 %v16942_v39 }
 0x49a   : > { %15159 = vmatpush3.bf16.msra.mxu1 %v18059_v46  ;;  %14488 = vmatprep.mubr.f32.mxu1 %v16919_v17 }
 0x49b   : > { %15161 = vmatprep.subr.bf16.mxu1 %v18056_v44 }
 0x4a0   : > { %v14287_v63 = vpop.f32.mrb[10].mxu1 }
 0x4a1   : > { %v5617_v14 = vpop.f32.mrb[11].mxu1  ;;  %14489 = vmatmul.mubr.f32.vlgmr.msra.gmra.mrb[20].mxu1 %v16936_v37  ;;  %v17410_v26 = vmul.f32 %v14287_v63, %v14287_v63 }
 0x4a2   : > { %15163 = vmatpush3.bf16.msra.mxu1 %v18056_v44  ;;  %14495 = vmatprep.mubr.f32.mxu1 %v16919_v17  ;;  %v17417_v24 = vmul.f32 %v5617_v14, %v5617_v14  ;;  %v18068_v44 = vld [vmem:[#allocation43_spill] sm:$0xff] }
 0x4a3   : > { %15165 = vmatprep.subr.bf16.mxu1 %v18060_v21 }
 0x4a9   : > { %14496 = vmatmul.mubr.f32.vlgmr.msra.gmra.mrb[20].mxu1 %v16936_v37 }
 0x4aa   : > { %15167 = vmatpush3.bf16.msra.mxu1 %v18060_v21  ;;  %14502 = vmatprep.mubr.f32.mxu1 %v16929_v34 }
 0x4ab   : > { %15169 = vmatprep.subr.bf16.mxu1 %v18061_v45 }
 0x4ad   : > { %14503 = vmatmul.mubr.f32.vlgmr.msra.gmra.mrb[22].mxu1 %v16949_v42 }
 0x4ae   : > { %15171 = vmatpush3.bf16.msra.mxu1 %v18061_v45  ;;  %14509 = vmatprep.mubr.f32.mxu1 %v16919_v17 }
 0x4af   : > { %15173 = vmatprep.subr.bf16.mxu1 %v18062_v55 }
 0x4b5   : > { %14510 = vmatmul.mubr.f32.vlgmr.msra.gmra.mrb[22].mxu1 %v16936_v37 }
 0x4b6   : > { %15175 = vmatpush3.bf16.msra.mxu1 %v18062_v55  ;;  %14516 = vmatprep.mubr.f32.mxu1 %v16922_v20 }
 0x4b7   : > { %15177 = vmatprep.subr.bf16.mxu1 %v18060_v21 }
 0x4bd   : > { %14517 = vmatmul.mubr.f32.vlgmr.msra.gmra.mrb[22].mxu1 %v16939_v38 }
 0x4be   : > { %15179 = vmatpush3.bf16.msra.mxu1 %v18060_v21  ;;  %14523 = vmatprep.mubr.f32.mxu1 %v16925_v29 }
 0x4bf   : > { %15181 = vmatprep.subr.bf16.mxu1 %v18063_v47 }
 0x4c5   : > { %14524 = vmatmul.mubr.f32.vlgmr.msra.gmra.mrb[22].mxu1 %v16942_v39 }
 0x4c6   : > { %15183 = vmatpush3.bf16.msra.mxu1 %v18063_v47  ;;  %14530 = vmatprep.mubr.f32.mxu1 %v16919_v17 }
 0x4c7   : > { %15185 = vmatprep.subr.bf16.mxu1 %v18060_v21 }
 0x4cc   : > { %v14329_v23 = vpop.f32.mrb[12].mxu1 }
 0x4cd   : > { %v17412_v6 = vmul.f32 %v14329_v23, %v14329_v23  ;;  %v17414_v5 = vmul.f32 %v14329_v23, %v14287_v63  ;;  %v6119_v12 = vpop.f32.mrb[13].mxu1  ;;  %14531 = vmatmul.mubr.f32.vlgmr.msra.gmra.mrb[22].mxu1 %v16936_v37 }
 0x4ce   : > { %v17419_v9 = vmul.f32 %v6119_v12, %v6119_v12  ;;  %v17421_v15 = vmul.f32 %v6119_v12, %v5617_v14  ;;  %15187 = vmatpush3.bf16.msra.mxu1 %v18060_v21  ;;  %14537 = vmatprep.mubr.f32.mxu1 %v16919_v17 }
 0x4cf   : > { %v7658_v30 = vadd.f32 %v17412_v6, %v17410_v26  ;;  %15189 = vmatprep.subr.bf16.mxu1 %v18064_v11  ;;  %v7648_v35 = vmul.f32 2.0, %v17414_v5 }
 0x4d0   : > { %v7657_v32 = vadd.f32 %v17419_v9, %v17417_v24  ;;  %v7647_v50 = vmul.f32 2.0, %v17421_v15 }
 0x4d1   : > { %v7660_v52 = vadd.f32 0.0001, %v7658_v30  ;;  %v7650_v46 = vadd.f32 0.0001, %v7648_v35 }
 0x4d2   : > { %v7659_v0 = vadd.f32 0.0001, %v7657_v32  ;;  %v7649_v14 = vadd.f32 0.0001, %v7647_v50  ;;  %v18085_v50 = vld [vmem:[#allocation53_spill] sm:$0xff] }
 0x4d5   : > { %14538 = vmatmul.mubr.f32.vlgmr.msra.gmra.mrb[22].mxu1 %v16936_v37 }
 0x4d6   : > { %15191 = vmatpush3.bf16.msra.mxu1 %v18064_v11  ;;  %14544 = vmatprep.mubr.f32.mxu1 %v16929_v34 }
 0x4d7   : > { %15193 = vmatprep.subr.bf16.mxu1 %v18065_v57 }
 0x4d9   : > { %14545 = vmatmul.mubr.f32.vlgmr.msra.gmra.mrb[24].mxu1 %v16949_v42 }
 0x4da   : > { %15195 = vmatpush3.bf16.msra.mxu1 %v18065_v57  ;;  %14551 = vmatprep.mubr.f32.mxu1 %v16919_v17 }
 0x4db   : > { %15197 = vmatprep.subr.bf16.mxu1 %v18066_v54 }
 0x4e1   : > { %14552 = vmatmul.mubr.f32.vlgmr.msra.gmra.mrb[24].mxu1 %v16936_v37 }
 0x4e2   : > { %15199 = vmatpush3.bf16.msra.mxu1 %v18066_v54  ;;  %14558 = vmatprep.mubr.f32.mxu1 %v16922_v20 }
 0x4e3   : > { %15201 = vmatprep.subr.bf16.mxu1 %v18064_v11 }
 0x4e9   : > { %14559 = vmatmul.mubr.f32.vlgmr.msra.gmra.mrb[24].mxu1 %v16939_v38 }
 0x4ea   : > { %15203 = vmatpush3.bf16.msra.mxu1 %v18064_v11  ;;  %14565 = vmatprep.mubr.f32.mxu1 %v16925_v29 }
 0x4eb   : > { %15205 = vmatprep.subr.bf16.mxu1 %v18067_v1 }
 0x4f1   : > { %14566 = vmatmul.mubr.f32.vlgmr.msra.gmra.mrb[24].mxu1 %v16942_v39 }
 0x4f2   : > { %15207 = vmatpush3.bf16.msra.mxu1 %v18067_v1  ;;  %14572 = vmatprep.mubr.f32.mxu1 %v16919_v17 }
 0x4f3   : > { %15209 = vmatprep.subr.bf16.mxu1 %v18064_v11 }
 0x4f8   : > { %v14371_v53 = vpop.f32.mrb[14].mxu1 }
 0x4f9   : > { %v7642_v58 = vsub.f32 %v14371_v53, %v17410_v26  ;;  %v6621_v33 = vpop.f32.mrb[15].mxu1  ;;  %14573 = vmatmul.mubr.f32.vlgmr.msra.gmra.mrb[24].mxu1 %v16936_v37  ;;  %v18076_v53 = vld [vmem:[#allocation14_spill] sm:$0xff] }
 0x4fa   : > { %v7641_v13 = vsub.f32 %v6621_v33, %v17417_v24  ;;  %15211 = vmatpush3.bf16.msra.mxu1 %v18064_v11  ;;  %14579 = vmatprep.mubr.f32.mxu1 %v16919_v17 }
 0x4fb   : > { %15213 = vmatprep.subr.bf16.mxu1 %v18068_v44 }
 0x501   : > { %14580 = vmatmul.mubr.f32.vlgmr.msra.gmra.mrb[24].mxu1 %v16936_v37 }
 0x502   : > { %15215 = vmatpush3.bf16.msra.mxu1 %v18068_v44  ;;  %14586 = vmatprep.mubr.f32.mxu1 %v16929_v34 }
 0x503   : > { %15217 = vmatprep.subr.bf16.mxu1 %v18069_v40 }
 0x505   : > { %14587 = vmatmul.mubr.f32.vlgmr.msra.gmra.mrb[26].mxu1 %v16949_v42 }
 0x506   : > { %15219 = vmatpush3.bf16.msra.mxu1 %v18069_v40  ;;  %14593 = vmatprep.mubr.f32.mxu1 %v16919_v17  ;;  %v18079_v40 = vld [vmem:[#allocation20_spill] sm:$0xff] }
 0x507   : > { %15221 = vmatprep.subr.bf16.mxu1 %v18070_v43 }
 0x50d   : > { %14594 = vmatmul.mubr.f32.vlgmr.msra.gmra.mrb[26].mxu1 %v16936_v37 }
 0x50e   : > { %15223 = vmatpush3.bf16.msra.mxu1 %v18070_v43  ;;  %14600 = vmatprep.mubr.f32.mxu1 %v16922_v20  ;;  %v18080_v43 = vld [vmem:[#allocation22_spill] sm:$0xff] }
 0x50f   : > { %15225 = vmatprep.subr.bf16.mxu1 %v18068_v44 }
 0x515   : > { %14601 = vmatmul.mubr.f32.vlgmr.msra.gmra.mrb[26].mxu1 %v16939_v38 }
 0x516   : > { %15227 = vmatpush3.bf16.msra.mxu1 %v18068_v44  ;;  %14607 = vmatprep.mubr.f32.mxu1 %v16925_v29 }
 0x517   : > { %15229 = vmatprep.subr.bf16.mxu1 %v18071_v51 }
 0x51d   : > { %14608 = vmatmul.mubr.f32.vlgmr.msra.gmra.mrb[26].mxu1 %v16942_v39 }
 0x51e   : > { %15231 = vmatpush3.bf16.msra.mxu1 %v18071_v51  ;;  %14614 = vmatprep.mubr.f32.mxu1 %v16919_v17 }
 0x51f   : > { %15233 = vmatprep.subr.bf16.mxu1 %v18068_v44 }
 0x524   : > { %v14413_v7 = vpop.f32.mrb[16].mxu1 }
 0x525   : > { %v7644_v2 = vsub.f32 %v14413_v7, %v17412_v6  ;;  %v7123_v3 = vpop.f32.mrb[17].mxu1  ;;  %14615 = vmatmul.mubr.f32.vlgmr.msra.gmra.mrb[26].mxu1 %v16936_v37 }
 0x526   : > { %v7643_v61 = vsub.f32 %v7123_v3, %v17419_v9  ;;  %15235 = vmatpush3.bf16.msra.mxu1 %v18068_v44  ;;  %14621 = vmatprep.mubr.f32.mxu1 %v16919_v17  ;;  %v18075_v9 = vld [vmem:[#allocation12_spill] sm:$0xff]  ;;  %v18078_v44 = vld [vmem:[#allocation23_spill] sm:$0xff] }
 0x527   : > { %v7662_v62 = vadd.f32 %v7644_v2, %v7642_v58  ;;  %15237 = vmatprep.subr.bf16.mxu1 %v17117_v56 }
 0x528   : > { %v7661_v60 = vadd.f32 %v7643_v61, %v7641_v13  ;;  %v18077_v13 = vld [vmem:[#allocation18_spill] sm:$0xff] }
 0x529   : > { %v7664_v4 = vadd.f32 0.0009, %v7662_v62 }
 0x52a   : > { %v7663_v18 = vadd.f32 0.0009, %v7661_v60 }
 0x52b   : > { %v7666_v49 = vmul.f32 %v7664_v4, %v7660_v52 }
 0x52c   : > { %v7665_v16 = vmul.f32 %v7663_v18, %v7659_v0  ;;  %v18081_v0 = vld [vmem:[#allocation30_spill] sm:$0xff] }
 0x52d   : > { %14622 = vmatmul.mubr.f32.vlgmr.msra.gmra.mrb[26].mxu1 %v16936_v37  ;;  %15832 = vrcp.f32 %v7666_v49  ;;  %v18082_v49 = vld [vmem:[#allocation39_spill] sm:$0xff] }
 0x52e   : > { %15239 = vmatpush3.bf16.msra.mxu1 %v17117_v56  ;;  %14628 = vmatprep.mubr.f32.mxu1 %v16929_v34  ;;  %15834 = vrcp.f32 %v7665_v16  ;;  %v18083_v16 = vld [vmem:[#allocation34_spill] sm:$0xff] }
 0x52f   : > { %15241 = vmatprep.subr.bf16.mxu1 %v17137_v10 }
 0x531   : > { %14629 = vmatmul.mubr.f32.vlgmr.msra.gmra.mrb[28].mxu1 %v16949_v42 }
 0x532   : > { %15243 = vmatpush3.bf16.msra.mxu1 %v17137_v10  ;;  %14635 = vmatprep.mubr.f32.mxu1 %v16919_v17 }
 0x533   : > { %15245 = vmatprep.subr.bf16.mxu1 %v18072_v28 }
 0x537   : > { %v15833_v55 = vpop.eup %15832 }
 0x538   : > { %v15835_v23 = vpop.eup %15834 }
 0x539   : > { %14636 = vmatmul.mubr.f32.vlgmr.msra.gmra.mrb[28].mxu1 %v16936_v37 }
 0x53a   : > { %15247 = vmatpush3.bf16.msra.mxu1 %v18072_v28  ;;  %14642 = vmatprep.mubr.f32.mxu1 %v16922_v20  ;;  %v18084_v28 = vld [vmem:[#allocation38_spill] sm:$0xff] }
 0x53b   : > { %15249 = vmatprep.subr.bf16.mxu1 %v17117_v56 }
 0x541   : > { %14643 = vmatmul.mubr.f32.vlgmr.msra.gmra.mrb[28].mxu1 %v16939_v38 }
 0x542   : > { %15251 = vmatpush3.bf16.msra.mxu1 %v17117_v56  ;;  %14649 = vmatprep.mubr.f32.mxu1 %v16925_v29 }
 0x543   : > { %15253 = vmatprep.subr.bf16.mxu1 %v17133_v8 }
 0x549   : > { %14650 = vmatmul.mubr.f32.vlgmr.msra.gmra.mrb[28].mxu1 %v16942_v39 }
 0x54a   : > { %15255 = vmatpush3.bf16.msra.mxu1 %v17133_v8  ;;  %14656 = vmatprep.mubr.f32.mxu1 %v16919_v17 }
 0x54b   : > { %15257 = vmatprep.subr.bf16.mxu1 %v17117_v56 }
 0x550   : > { %v14455_v10 = vpop.f32.mrb[18].mxu1 }
 0x551   : > { %v7646_v31 = vsub.f32 %v14455_v10, %v17414_v5  ;;  %v7625_v36 = vpop.f32.mrb[19].mxu1  ;;  %14657 = vmatmul.mubr.f32.vlgmr.msra.gmra.mrb[28].mxu1 %v16936_v37  ;;  %v18074_v5 = vld [vmem:[#allocation15_spill] sm:$0xff] }
 0x552   : > { %v7645_v27 = vsub.f32 %v7625_v36, %v17421_v15  ;;  %15259 = vmatpush3.bf16.msra.mxu1 %v17117_v56  ;;  %14663 = vmatprep.mubr.f32.mxu1 %v16919_v17 }
 0x553   : > { %v7652_v8 = vmul.f32 2.0, %v7646_v31  ;;  %15261 = vmatprep.subr.bf16.mxu1 %v18073_v59 }
 0x554   : > { %v7651_v19 = vmul.f32 2.0, %v7645_v27  ;;  %v18086_v27 = vld [vmem:[#allocation28_spill] sm:$0xff] }
 0x555   : > { %v7654_v63 = vadd.f32 0.0009, %v7652_v8  ;;  %v18087_v8 = vld [vmem:[#allocation24_spill] sm:$0xff] }
 0x556   : > { %v7653_v21 = vadd.f32 0.0009, %v7651_v19 }
 0x557   : > { %v7656_v45 = vmul.f32 %v7654_v63, %v7650_v46 }
 0x558   : > { %v7655_v47 = vmul.f32 %v7653_v21, %v7649_v14 }
 0x559   : > { %v7670_v26 = vmul.f32 %v15833_v55, %v7656_v45  ;;  %14664 = vmatmul.mubr.f32.vlgmr.msra.gmra.mrb[28].mxu1 %v16936_v37 }
 0x55a   : > { %v7669_v6 = vmul.f32 %v15835_v23, %v7655_v47  ;;  %15263 = vmatpush3.bf16.msra.mxu1 %v18073_v59  ;;  %14670 = vmatprep.mubr.f32.mxu1 %v16929_v34 }
 0x55b   : > { %v7672_v56 = vsel %vm304_vm0, %v7670_v26, 0.0  ;;  %15265 = vmatprep.subr.bf16.mxu1 %v18074_v5 }
 0x55c   : > { %v7671_v12 = vsel %vm304_vm0, %v7669_v6, 0.0 }
 0x55d   : > { %14671 = vmatmul.mubr.f32.vlgmr.msra.gmra.mrb[30].mxu1 %v16949_v42  ;;  %v7673_v24 = vadd.f32 %v7672_v56, %v7671_v12 }
 0x55e   : > { %15267 = vmatpush3.bf16.msra.mxu1 %v18074_v5  ;;  %14677 = vmatprep.mubr.f32.mxu1 %v16919_v17 }
 0x55f   : > { %15269 = vmatprep.subr.bf16.mxu1 %v18075_v9  ;;  %v7674_v15 = vrot.slane %v7673_v24, 4 }
 0x561   : > { %v7675_v30 = vadd.f32 %v7674_v15, %v7673_v24 }
 0x563   : > { %v7676_v11 = vrot.slane %v7675_v30, 2 }
 0x565   : > { %14678 = vmatmul.mubr.f32.vlgmr.msra.gmra.mrb[30].mxu1 %v16936_v37  ;;  %v7677_v32 = vadd.f32 %v7676_v11, %v7675_v30 }
 0x566   : > { %15271 = vmatpush3.bf16.msra.mxu1 %v18075_v9  ;;  %14684 = vmatprep.mubr.f32.mxu1 %v16922_v20 }
 0x567   : > { %15273 = vmatprep.subr.bf16.mxu1 %v18073_v59  ;;  %v7678_v57 = vrot.slane %v7677_v32, 1 }
 0x569   : > { %v7679_v54 = vadd.f32 %v7678_v57, %v7677_v32 }
 0x56b   : > { %v7680_v1 = vsel %vm304_vm0, %v7679_v54, 0.0 }
 0x56c   : > { %7681 = vadd.xlane.f32.xlu0 %v7680_v1 }
 0x56d   : > { %14685 = vmatmul.mubr.f32.vlgmr.msra.gmra.mrb[30].mxu1 %v16939_v38 }
 0x56e   : > { %15275 = vmatpush3.bf16.msra.mxu1 %v18073_v59  ;;  %14691 = vmatprep.mubr.f32.mxu1 %v16925_v29 }
 0x56f   : > { %15277 = vmatprep.subr.bf16.mxu1 %v18076_v53 }
 0x575   : > { %14692 = vmatmul.mubr.f32.vlgmr.msra.gmra.mrb[30].mxu1 %v16942_v39 }
 0x576   : > { %15279 = vmatpush3.bf16.msra.mxu1 %v18076_v53  ;;  %14698 = vmatprep.mubr.f32.mxu1 %v16919_v17 }
 0x577   : > { %15281 = vmatprep.subr.bf16.mxu1 %v18073_v59 }
 0x57c   : > { %v14497_v58 = vpop.f32.mrb[20].mxu1 }
 0x57d   : > { %v8175_v33 = vpop.f32.mrb[21].mxu1  ;;  %14699 = vmatmul.mubr.f32.vlgmr.msra.gmra.mrb[30].mxu1 %v16936_v37  ;;  %v17557_v7 = vmul.f32 %v14497_v58, %v14497_v58 }
 0x57e   : > { %15283 = vmatpush3.bf16.msra.mxu1 %v18073_v59  ;;  %14705 = vmatprep.mubr.f32.mxu1 %v16919_v17  ;;  %v17564_v62 = vmul.f32 %v8175_v33, %v8175_v33  ;;  %v18088_v59 = vld [vmem:[#allocation26_spill] sm:$0xff] }
 0x57f   : > { %15285 = vmatprep.subr.bf16.mxu1 %v18077_v13 }
 0x585   : > { %14706 = vmatmul.mubr.f32.vlgmr.msra.gmra.mrb[30].mxu1 %v16936_v37 }
 0x586   : > { %15287 = vmatpush3.bf16.msra.mxu1 %v18077_v13  ;;  %14712 = vmatprep.mubr.f32.mxu1 %v16929_v34 }
 0x587   : > { %15289 = vmatprep.subr.bf16.mxu1 %v18078_v44 }
 0x589   : > { %14713 = vmatmul.mubr.f32.vlgmr.msra.gmra.mrb[32].mxu1 %v16949_v42 }
 0x58a   : > { %15291 = vmatpush3.bf16.msra.mxu1 %v18078_v44  ;;  %14719 = vmatprep.mubr.f32.mxu1 %v16919_v17 }
 0x58b   : > { %15293 = vmatprep.subr.bf16.mxu1 %v18079_v40 }
 0x591   : > { %14720 = vmatmul.mubr.f32.vlgmr.msra.gmra.mrb[32].mxu1 %v16936_v37 }
 0x592   : > { %15295 = vmatpush3.bf16.msra.mxu1 %v18079_v40  ;;  %14726 = vmatprep.mubr.f32.mxu1 %v16922_v20 }
 0x593   : > { %15297 = vmatprep.subr.bf16.mxu1 %v18077_v13 }
 0x599   : > { %14727 = vmatmul.mubr.f32.vlgmr.msra.gmra.mrb[32].mxu1 %v16939_v38 }
 0x59a   : > { %15299 = vmatpush3.bf16.msra.mxu1 %v18077_v13  ;;  %14733 = vmatprep.mubr.f32.mxu1 %v16925_v29 }
 0x59b   : > { %15301 = vmatprep.subr.bf16.mxu1 %v18080_v43 }
 0x5a1   : > { %14734 = vmatmul.mubr.f32.vlgmr.msra.gmra.mrb[32].mxu1 %v16942_v39 }
 0x5a2   : > { %15303 = vmatpush3.bf16.msra.mxu1 %v18080_v43  ;;  %14740 = vmatprep.mubr.f32.mxu1 %v16919_v17 }
 0x5a3   : > { %15305 = vmatprep.subr.bf16.mxu1 %v18077_v13 }
 0x5a8   : > { %v14539_v51 = vpop.f32.mrb[22].mxu1 }
 0x5a9   : > { %v17559_v2 = vmul.f32 %v14539_v51, %v14539_v51  ;;  %v17561_v3 = vmul.f32 %v14539_v51, %v14497_v58  ;;  %v8677_v61 = vpop.f32.mrb[23].mxu1  ;;  %14741 = vmatmul.mubr.f32.vlgmr.msra.gmra.mrb[32].mxu1 %v16936_v37 }
 0x5aa   : > { %v17566_v60 = vmul.f32 %v8677_v61, %v8677_v61  ;;  %v17568_v52 = vmul.f32 %v8677_v61, %v8175_v33  ;;  %15307 = vmatpush3.bf16.msra.mxu1 %v18077_v13  ;;  %14747 = vmatprep.mubr.f32.mxu1 %v16919_v17 }
 0x5ab   : > { %v10216_v4 = vadd.f32 %v17559_v2, %v17557_v7  ;;  %15309 = vmatprep.subr.bf16.mxu1 %v18081_v0 }
 0x5ac   : > { %v10215_v18 = vadd.f32 %v17566_v60, %v17564_v62 }
 0x5ad   : > { %v10218_v55 = vadd.f32 0.0001, %v10216_v4 }
 0x5ae   : > { %v10217_v23 = vadd.f32 0.0001, %v10215_v18 }
 0x5b1   : > { %14748 = vmatmul.mubr.f32.vlgmr.msra.gmra.mrb[32].mxu1 %v16936_v37 }
 0x5b2   : > { %15311 = vmatpush3.bf16.msra.mxu1 %v18081_v0  ;;  %14754 = vmatprep.mubr.f32.mxu1 %v16929_v34 }
 0x5b3   : > { %15313 = vmatprep.subr.bf16.mxu1 %v18082_v49 }
 0x5b5   : > { %14755 = vmatmul.mubr.f32.vlgmr.msra.gmra.mrb[34].mxu1 %v16949_v42 }
 0x5b6   : > { %15315 = vmatpush3.bf16.msra.mxu1 %v18082_v49  ;;  %14761 = vmatprep.mubr.f32.mxu1 %v16919_v17 }
 0x5b7   : > { %15317 = vmatprep.subr.bf16.mxu1 %v18083_v16 }
 0x5bd   : > { %14762 = vmatmul.mubr.f32.vlgmr.msra.gmra.mrb[34].mxu1 %v16936_v37 }
 0x5be   : > { %15319 = vmatpush3.bf16.msra.mxu1 %v18083_v16  ;;  %14768 = vmatprep.mubr.f32.mxu1 %v16922_v20 }
 0x5bf   : > { %15321 = vmatprep.subr.bf16.mxu1 %v18081_v0 }
 0x5c5   : > { %14769 = vmatmul.mubr.f32.vlgmr.msra.gmra.mrb[34].mxu1 %v16939_v38 }
 0x5c6   : > { %15323 = vmatpush3.bf16.msra.mxu1 %v18081_v0  ;;  %14775 = vmatprep.mubr.f32.mxu1 %v16925_v29 }
 0x5c7   : > { %15325 = vmatprep.subr.bf16.mxu1 %v18084_v28 }
 0x5cd   : > { %14776 = vmatmul.mubr.f32.vlgmr.msra.gmra.mrb[34].mxu1 %v16942_v39 }
 0x5ce   : > { %15327 = vmatpush3.bf16.msra.mxu1 %v18084_v28  ;;  %14782 = vmatprep.mubr.f32.mxu1 %v16919_v17 }
 0x5cf   : > { %15329 = vmatprep.subr.bf16.mxu1 %v18081_v0 }
 0x5d4   : > { %v14581_v10 = vpop.f32.mrb[24].mxu1 }
 0x5d5   : > { %v10200_v35 = vsub.f32 %v14581_v10, %v17557_v7  ;;  %v9179_v31 = vpop.f32.mrb[25].mxu1  ;;  %14783 = vmatmul.mubr.f32.vlgmr.msra.gmra.mrb[34].mxu1 %v16936_v37 }
 0x5d6   : > { %v10199_v36 = vsub.f32 %v9179_v31, %v17564_v62  ;;  %15331 = vmatpush3.bf16.msra.mxu1 %v18081_v0  ;;  %14789 = vmatprep.mubr.f32.mxu1 %v16919_v17 }
 0x5d7   : > { %15333 = vmatprep.subr.bf16.mxu1 %v18085_v50 }
 0x5dd   : > { %14790 = vmatmul.mubr.f32.vlgmr.msra.gmra.mrb[34].mxu1 %v16936_v37 }
 0x5de   : > { %15335 = vmatpush3.bf16.msra.mxu1 %v18085_v50  ;;  %14796 = vmatprep.mubr.f32.mxu1 %v16929_v34 }
 0x5df   : > { %15337 = vmatprep.subr.bf16.mxu1 %v18086_v27 }
 0x5e1   : > { %14797 = vmatmul.mubr.f32.vlgmr.msra.gmra.mrb[36].mxu1 %v16949_v42 }
 0x5e2   : > { %15339 = vmatpush3.bf16.msra.mxu1 %v18086_v27  ;;  %14803 = vmatprep.mubr.f32.mxu1 %v16919_v17 }
 0x5e3   : > { %15341 = vmatprep.subr.bf16.mxu1 %v18087_v8 }
 0x5e9   : > { %14804 = vmatmul.mubr.f32.vlgmr.msra.gmra.mrb[36].mxu1 %v16936_v37 }
 0x5ea   : > { %15343 = vmatpush3.bf16.msra.mxu1 %v18087_v8  ;;  %14810 = vmatprep.mubr.f32.mxu1 %v16922_v20 }
 0x5eb   : > { %15345 = vmatprep.subr.bf16.mxu1 %v18085_v50 }
 0x5f1   : > { %14811 = vmatmul.mubr.f32.vlgmr.msra.gmra.mrb[36].mxu1 %v16939_v38 }
 0x5f2   : > { %15347 = vmatpush3.bf16.msra.mxu1 %v18085_v50  ;;  %14817 = vmatprep.mubr.f32.mxu1 %v16925_v29 }
 0x5f3   : > { %15349 = vmatprep.subr.bf16.mxu1 %v18088_v59 }
 0x5f9   : > { %14818 = vmatmul.mubr.f32.vlgmr.msra.gmra.mrb[36].mxu1 %v16942_v39 }
 0x5fa   : > { %15351 = vmatpush3.bf16.msra.mxu1 %v18088_v59  ;;  %14824 = vmatprep.mubr.f32.mxu1 %v16919_v17 }
 0x5fb   : > { %15353 = vmatprep.subr.bf16.mxu1 %v18085_v50 }
 0x600   : > { %v14623_v19 = vpop.f32.mrb[26].mxu1 }
 0x601   : > { %v10202_v46 = vsub.f32 %v14623_v19, %v17559_v2  ;;  %v9681_v63 = vpop.f32.mrb[27].mxu1  ;;  %14825 = vmatmul.mubr.f32.vlgmr.msra.gmra.mrb[36].mxu1 %v16936_v37 }
 0x602   : > { %v10201_v14 = vsub.f32 %v9681_v63, %v17566_v60  ;;  %15355 = vmatpush3.bf16.msra.mxu1 %v18085_v50  ;;  %14831 = vmatprep.mubr.f32.mxu1 %v16919_v17 }
 0x603   : > { %v10220_v21 = vadd.f32 %v10202_v46, %v10200_v35  ;;  %15357 = vmatprep.subr.bf16.mxu1 %v17128_v41 }
 0x604   : > { %v10219_v45 = vadd.f32 %v10201_v14, %v10199_v36 }
 0x605   : > { %v10222_v47 = vadd.f32 0.0009, %v10220_v21 }
 0x606   : > { %v10221_v26 = vadd.f32 0.0009, %v10219_v45 }
 0x607   : > { %v10224_v6 = vmul.f32 %v10222_v47, %v10218_v55 }
 0x608   : > { %v10223_v56 = vmul.f32 %v10221_v26, %v10217_v23 }
 0x609   : > { %14832 = vmatmul.mubr.f32.vlgmr.msra.gmra.mrb[36].mxu1 %v16936_v37  ;;  %15836 = vrcp.f32 %v10224_v6 }
 0x60a   : > { %15359 = vmatpush3.bf16.msra.mxu1 %v17128_v41  ;;  %14838 = vmatprep.mubr.f32.mxu1 %v16929_v34  ;;  %15838 = vrcp.f32 %v10223_v56  ;;  %v10206_v34 = vmul.f32 2.0, %v17561_v3 }
 0x60b   : > { %15361 = vmatprep.subr.bf16.mxu1 %v17145_v22 }
 0x60d   : > { %14839 = vmatmul.mubr.f32.vlgmr.msra.gmra.mrb[38].mxu1 %v16949_v42 }
 0x60e   : > { %15363 = vmatpush3.bf16.msra.mxu1 %v17145_v22  ;;  %14845 = vmatprep.mubr.f32.mxu1 %v16919_v17  ;;  %v10208_v22 = vadd.f32 0.0001, %v10206_v34 }
 0x60f   : > { %15365 = vmatprep.subr.bf16.mxu1 %v17135_v25 }
 0x613   : > { %v15837_v15 = vpop.eup %15836 }
 0x614   : > { %v15839_v11 = vpop.eup %15838 }
 0x615   : > { %14846 = vmatmul.mubr.f32.vlgmr.msra.gmra.mrb[38].mxu1 %v16936_v37 }
 0x616   : > { %15367 = vmatpush3.bf16.msra.mxu1 %v17135_v25  ;;  %14852 = vmatprep.mubr.f32.mxu1 %v16922_v20 }
 0x617   : > { %15369 = vmatprep.subr.bf16.mxu1 %v17128_v41 }
 0x61d   : > { %14853 = vmatmul.mubr.f32.vlgmr.msra.gmra.mrb[38].mxu1 %v16939_v38 }
 0x61e   : > { %15371 = vmatpush3.bf16.msra.mxu1 %v17128_v41  ;;  %14859 = vmatprep.mubr.f32.mxu1 %v16925_v29  ;;  %v10205_v29 = vmul.f32 2.0, %v17568_v52 }
 0x61f   : > { %15373 = vmatprep.subr.bf16.mxu1 %v17139_v48 }
 0x620   : > { %v10207_v12 = vadd.f32 0.0001, %v10205_v29 }
 0x625   : > { %14860 = vmatmul.mubr.f32.vlgmr.msra.gmra.mrb[38].mxu1 %v16942_v39 }
 0x626   : > { %15375 = vmatpush3.bf16.msra.mxu1 %v17139_v48  ;;  %14866 = vmatprep.mubr.f32.mxu1 %v16919_v17 }
 0x627   : > { %15377 = vmatprep.subr.bf16.mxu1 %v17128_v41 }
 0x62c   : > { %v14665_v20 = vpop.f32.mrb[28].mxu1 }
 0x62d   : > { %v10204_v38 = vsub.f32 %v14665_v20, %v17561_v3  ;;  %v10183_v42 = vpop.f32.mrb[29].mxu1  ;;  %14867 = vmatmul.mubr.f32.vlgmr.msra.gmra.mrb[38].mxu1 %v16936_v37 }
 0x62e   : > { %v10203_v39 = vsub.f32 %v10183_v42, %v17568_v52  ;;  %15379 = vmatpush3.bf16.msra.mxu1 %v17128_v41  ;;  %14873 = vmatprep.mubr.f32.mxu1 %v16919_v17 }
 0x62f   : > { %v10210_v25 = vmul.f32 2.0, %v10204_v38 }
 0x630   : > { %v10209_v48 = vmul.f32 2.0, %v10203_v39 }
 0x631   : > { %v10212_v5 = vadd.f32 0.0009, %v10210_v25 }
 0x632   : > { %v10211_v24 = vadd.f32 0.0009, %v10209_v48 }
 0x633   : > { %v10214_v9 = vmul.f32 %v10212_v5, %v10208_v22 }
 0x634   : > { %v10213_v30 = vmul.f32 %v10211_v24, %v10207_v12 }
 0x635   : > { %v10228_v32 = vmul.f32 %v15837_v15, %v10214_v9  ;;  %14874 = vmatmul.mubr.f32.vlgmr.msra.gmra.mrb[38].mxu1 %v16936_v37 }
 0x636   : > { %v10227_v57 = vmul.f32 %v15839_v11, %v10213_v30 }
 0x637   : > { %v10230_v54 = vsel %vm304_vm0, %v10228_v32, 0.0 }
 0x638   : > { %v10229_v41 = vsel %vm304_vm0, %v10227_v57, 0.0 }
 0x639   : > { %v10231_v1 = vadd.f32 %v10230_v54, %v10229_v41 }
 0x63b   : > { %v10232_v17 = vrot.slane %v10231_v1, 4 }
 0x63d   : > { %v10233_v53 = vadd.f32 %v10232_v17, %v10231_v1  ;;  %v15948_v1 = vmov 0   ;;  %v5124_v17 = vpop.xlane.xlu0 %5123 }
 0x63e   : > { %15827 = vset.pattern.permute.xlu0 %v15948_v1 }
 0x63f   : > { %v10234_v58 = vrot.slane %v10233_v53, 2 }
 0x641   : > { %v10235_v33 = vadd.f32 %v10234_v58, %v10233_v53  ;;  %v7682_v53 = vpop.xlane.xlu0 %7681 }
 0x643   : > { %v10236_v13 = vrot.slane %v10235_v33, 1 }
 0x645   : > { %v10237_v44 = vadd.f32 %v10236_v13, %v10235_v33  ;;  %v12800_v33 = vsel %vm12799_vm1, %v5124_v17, %v7682_v53 }
 0x647   : > { %v10238_v40 = vsel %vm304_vm0, %v10237_v44, 0.0 }
 0x648   : > { %10239 = vadd.xlane.f32.xlu1 %v10238_v40 }
 0x658   : > { %v14707_v43 = vpop.f32.mrb[30].mxu1 }
 0x659   : > { %v10733_v51 = vpop.f32.mrb[31].mxu1  ;;  %v12752_v2 = vmul.f32 %v14707_v43, %v14707_v43 }
 0x65a   : > { %v12751_v62 = vmul.f32 %v10733_v51, %v10733_v51 }
 0x684   : > { %v14749_v7 = vpop.f32.mrb[32].mxu1 }
 0x685   : > { %v12754_v37 = vmul.f32 %v14749_v7, %v14749_v7  ;;  %v12756_v3 = vmul.f32 %v14749_v7, %v14707_v43  ;;  %v11235_v61 = vpop.f32.mrb[33].mxu1 }
 0x686   : > { %v12753_v60 = vmul.f32 %v11235_v61, %v11235_v61  ;;  %v12755_v52 = vmul.f32 %v11235_v61, %v10733_v51 }
 0x687   : > { %v12774_v4 = vadd.f32 %v12754_v37, %v12752_v2  ;;  %v12764_v45 = vmul.f32 2.0, %v12756_v3 }
 0x688   : > { %v12773_v0 = vadd.f32 %v12753_v60, %v12751_v62  ;;  %v12763_v23 = vmul.f32 2.0, %v12755_v52 }
 0x689   : > { %v12776_v8 = vadd.f32 0.0001, %v12774_v4  ;;  %v12766_v20 = vadd.f32 0.0001, %v12764_v45 }
 0x68a   : > { %v12775_v19 = vadd.f32 0.0001, %v12773_v0  ;;  %v12765_v38 = vadd.f32 0.0001, %v12763_v23 }
 0x6b0   : > { %v14791_v18 = vpop.f32.mrb[34].mxu1 }
 0x6b1   : > { %v12758_v49 = vsub.f32 %v14791_v18, %v12752_v2  ;;  %v11737_v16 = vpop.f32.mrb[35].mxu1 }
 0x6b2   : > { %v12757_v28 = vsub.f32 %v11737_v16, %v12751_v62 }
 0x6d5   : > { %v10240_v58 = vpop.xlane.xlu1 %10239 }
 0x6d6   : > { %v12802_v13 = vsel %vm12801_vm2, %v12800_v33, %v10240_v58 }
 0x6dc   : > { %v14833_v10 = vpop.f32.mrb[36].mxu1 }
 0x6dd   : > { %v12760_v35 = vsub.f32 %v14833_v10, %v12754_v37  ;;  %v12239_v31 = vpop.f32.mrb[37].mxu1 }
 0x6de   : > { %v12759_v36 = vsub.f32 %v12239_v31, %v12753_v60 }
 0x6df   : > { %v12778_v50 = vadd.f32 %v12760_v35, %v12758_v49 }
 0x6e0   : > { %v12777_v27 = vadd.f32 %v12759_v36, %v12757_v28 }
 0x6e1   : > { %v12780_v59 = vadd.f32 0.0009, %v12778_v50 }
 0x6e2   : > { %v12779_v46 = vadd.f32 0.0009, %v12777_v27 }
 0x6e3   : > { %v12782_v63 = vmul.f32 %v12780_v59, %v12776_v8 }
 0x6e4   : > { %v12781_v14 = vmul.f32 %v12779_v46, %v12775_v19 }
 0x6e5   : > { %15840 = vrcp.f32 %v12782_v63 }
 0x6e6   : > { %15842 = vrcp.f32 %v12781_v14 }
 0x6ef   : > { %v15841_v39 = vpop.eup %15840 }
 0x6f0   : > { %v15843_v48 = vpop.eup %15842 }
 0x708   : > { %v14875_v21 = vpop.f32.mrb[38].mxu1 }
 0x709   : > { %v12762_v55 = vsub.f32 %v14875_v21, %v12756_v3  ;;  %v12741_v47 = vpop.f32.mrb[39].mxu1 }
 0x70a   : > { %v12761_v26 = vsub.f32 %v12741_v47, %v12755_v52 }
 0x70b   : > { %v12768_v6 = vmul.f32 2.0, %v12762_v55 }
 0x70c   : > { %v12767_v56 = vmul.f32 2.0, %v12761_v26 }
 0x70d   : > { %v12770_v34 = vadd.f32 0.0009, %v12768_v6 }
 0x70e   : > { %v12769_v42 = vadd.f32 0.0009, %v12767_v56 }
 0x70f   : > { %v12772_v29 = vmul.f32 %v12770_v34, %v12766_v20 }
 0x710   : > { %v12771_v25 = vmul.f32 %v12769_v42, %v12765_v38 }
 0x711   : > { %v12786_v22 = vmul.f32 %v15841_v39, %v12772_v29 }
 0x712   : > { %v12785_v5 = vmul.f32 %v15843_v48, %v12771_v25 }
 0x713   : > { %v12788_v12 = vsel %vm304_vm0, %v12786_v22, 0.0 }
 0x714   : > { %v12787_v24 = vsel %vm304_vm0, %v12785_v5, 0.0 }
 0x715   : > { %v12789_v9 = vadd.f32 %v12788_v12, %v12787_v24 }
 0x717   : > { %v12790_v15 = vrot.slane %v12789_v9, 4 }
 0x719   : > { %v12791_v30 = vadd.f32 %v12790_v15, %v12789_v9 }
 0x71b   : > { %v12792_v11 = vrot.slane %v12791_v30, 2 }
 0x71d   : > { %v12793_v32 = vadd.f32 %v12792_v11, %v12791_v30 }
 0x71f   : > { %v12794_v57 = vrot.slane %v12793_v32, 1 }
 0x721   : > { %v12795_v54 = vadd.f32 %v12794_v57, %v12793_v32 }
 0x723   : > { %v12796_v41 = vsel %vm304_vm0, %v12795_v54, 0.0 }
 0x724   : > { %12797 = vadd.xlane.f32.xlu1 %v12796_v41 }
 0x7b1   : > { %v12798_v44 = vpop.xlane.xlu1 %12797 }
 0x7b2   : > { %v12804_v40 = vsel %vm12803_vm3, %v12802_v13, %v12798_v44 }
 0x7b3   : > { %12807 = vperm.xlu0 %15827, %v12804_v40  }
 0x832   : > { %v12808_v43 = vpop.permute.xlu0 %12807 }
 0x833   : > { %12810 = vst [vmem:[%s259_s26] sm:$0xf] %v12808_v43 }
 0x834 PF: > { %p17_p11 = scmp.ge.s32.totalorder %s15996_s20, 4   ;;  %s18089_s15 = smov %s15934_s16 }
 0x835   : > { %s18090_s16 = smov %s15938_s17  ;;  %s18091_s17 = smov %s16006_s23 }
 0x836   : > { %s18092_s18 = smov %s15996_s20  ;;  %19 = sbr.rel (!%p17_p11) target bundleno = 5 (0x5), region = 89 }
 0x83d   :  { %12830 = vsyncpa [#allocation3], 1 }
 0x83e   :  { %12832 = vsyncpa [#allocation3 + $0x1], 1 }
 0x83f   :  { %12833 = vsyncpa [#allocation5], 1 }
 0x840   :  { %12835 = vsyncpa [#allocation5 + $0x1], 1 }

</bundles_post_ra>
